<compile_context>
chip_gen: v5e
topology: v5e:2x2
jax: 0.10.0
libtpu: 0.0.40
codegen_flags: <defaults>
</compile_context>

<pallas_src>
import math
import jax
import jax.numpy as jnp
from jax.experimental import pallas as pl
from jax.experimental.pallas import tpu as pltpu

# ---------------- scaled-down ViT config ----------------
B = 2                       # batch
C = 3                       # image channels (RGB, as ViT expects)
IMG = 16                    # image spatial size
PATCH = 8                   # patch size
NUM_PATCHES = (IMG // PATCH) ** 2          # 4
SEQ = NUM_PATCHES + 1                      # 5  (CLS token + patches)
SEQ_PAD = 8                 # sublane-aligned sequence length (3 masked pad rows)
D = 32                      # hidden size
HEADS = 4
HEAD_DIM = D // HEADS       # 8
MLP = 64                    # intermediate size
LAYERS = 2                  # encoder depth (scaled down from 12)
NUM_CLASSES = 52
NCLS_PAD = 128              # lane-aligned classifier width (sliced outside)
LN_EPS = 1e-12              # ViTConfig default layer_norm_eps


# ---------------- kernel ----------------
def _layernorm(x, g, b):
    mu = jnp.mean(x, axis=-1, keepdims=True)
    var = jnp.mean(jnp.square(x - mu), axis=-1, keepdims=True)
    return (x - mu) * jax.lax.rsqrt(var + LN_EPS) * g + b


def vit_fused_kernel(
    p_ref, pe_w_ref, pe_b_ref, cls_ref, pos_ref, kmask_ref,
    ln1_g_ref, ln1_b_ref,
    wq_ref, bq_ref, wk_ref, bk_ref, wv_ref, bv_ref, wo_ref, bo_ref,
    ln2_g_ref, ln2_b_ref,
    w1_ref, b1_ref, w2_ref, b2_ref,
    lnf_g_ref, lnf_b_ref, wc_ref, bc_ref,
    o_ref,
    tok_scr,
):
    # ---- patch embedding: Conv2d(kernel=stride=PATCH) as one matmul ----
    emb = (jnp.dot(p_ref[...], pe_w_ref[...], preferred_element_type=jnp.float32)
           + pe_b_ref[...])                                     # (B*NP, D)

    # ---- assemble token slab: [CLS, patch_0..3, pad*3] + position embeddings ----
    tok_scr[...] = jnp.zeros((B * SEQ_PAD, D), jnp.float32)
    cls_tok = cls_ref[...] + pos_ref[0:1, :]                    # (1, D)
    pos_patch = pos_ref[1:1 + NUM_PATCHES, :]                   # (NP, D)
    for b in range(B):                                          # static unroll
        r0 = b * SEQ_PAD
        tok_scr[r0:r0 + 1, :] = cls_tok
        tok_scr[r0 + 1:r0 + 1 + NUM_PATCHES, :] = (
            emb[b * NUM_PATCHES:(b + 1) * NUM_PATCHES, :] + pos_patch)
    x = tok_scr[...]                                            # (B*SP, D)

    kmask = kmask_ref[...].reshape(1, 1, SEQ_PAD)               # additive key mask
    scale = 1.0 / math.sqrt(HEAD_DIM)

    for l in range(LAYERS):                                     # static unroll
        # ---- self-attention block (pre-LN) ----
        h = _layernorm(x, ln1_g_ref[l], ln1_b_ref[l])
        q = jnp.dot(h, wq_ref[l], preferred_element_type=jnp.float32) + bq_ref[l]
        k = jnp.dot(h, wk_ref[l], preferred_element_type=jnp.float32) + bk_ref[l]
        v = jnp.dot(h, wv_ref[l], preferred_element_type=jnp.float32) + bv_ref[l]
        wo_l = wo_ref[l]

        attn = jnp.zeros((B * SEQ_PAD, D), jnp.float32)
        for hh in range(HEADS):                                 # static unroll
            lo = hh * HEAD_DIM
            qh = q[:, lo:lo + HEAD_DIM].reshape(B, SEQ_PAD, HEAD_DIM)
            kh = k[:, lo:lo + HEAD_DIM].reshape(B, SEQ_PAD, HEAD_DIM)
            vh = v[:, lo:lo + HEAD_DIM].reshape(B, SEQ_PAD, HEAD_DIM)
            s = (jnp.einsum("bqd,bkd->bqk", qh, kh,
                            preferred_element_type=jnp.float32) * scale + kmask)
            s = s - jnp.max(s, axis=-1, keepdims=True)
            p = jnp.exp(s)
            p = p * pl.reciprocal(jnp.sum(p, axis=-1, keepdims=True), approx=True)
            ctx = jnp.einsum("bqk,bkd->bqd", p, vh,
                             preferred_element_type=jnp.float32)
            ctx = ctx.reshape(B * SEQ_PAD, HEAD_DIM)
            # accumulate this head's slice of the output projection (no concat)
            attn = attn + jnp.dot(ctx, wo_l[lo:lo + HEAD_DIM, :],
                                  preferred_element_type=jnp.float32)
        x = x + attn + bo_ref[l]                                # residual

        # ---- MLP block (pre-LN) ----
        h2 = _layernorm(x, ln2_g_ref[l], ln2_b_ref[l])
        m = jnp.dot(h2, w1_ref[l], preferred_element_type=jnp.float32) + b1_ref[l]
        # TODO(synk): HF ViT default is exact (erf) GELU; tanh approximation used here.
        m = jax.nn.gelu(m, approximate=True)
        x = x + jnp.dot(m, w2_ref[l], preferred_element_type=jnp.float32) + b2_ref[l]

    # ---- final LayerNorm on CLS tokens only, then classifier (lane-padded) ----
    cls_out = x.reshape(B, SEQ_PAD, D)[:, 0, :]                 # (B, D)
    cls_n = _layernorm(cls_out, lnf_g_ref[...], lnf_b_ref[...])
    o_ref[...] = (jnp.dot(cls_n, wc_ref[...], preferred_element_type=jnp.float32)
                  + bc_ref[...])


# ---------------- pallas_call wrapper ----------------
def _full_spec(a):
    n = a.ndim
    return pl.BlockSpec(a.shape, lambda i, n=n: (0,) * n)


@jax.jit
def vit_forward(x, params):
    """x: (B, C, H, W) float32  ->  logits (B, NUM_CLASSES)."""
    bsz = x.shape[0]
    # Patchify (layout glue): NCHW -> (B*N, C*P*P), flattened in (C, ph, pw)
    # order to match Conv2d(kernel=stride=PATCH) weight flattening.
    p = x.reshape(bsz, C, IMG // PATCH, PATCH, IMG // PATCH, PATCH)
    p = p.transpose(0, 2, 4, 1, 3, 5).reshape(bsz * NUM_PATCHES, C * PATCH * PATCH)

    pos_pad = jnp.pad(params["pos"][0], ((0, SEQ_PAD - SEQ), (0, 0)))  # (SP, D)
    kmask = jnp.where(jnp.arange(SEQ_PAD) < SEQ, 0.0, -1e30)
    kmask = kmask.astype(jnp.float32).reshape(1, SEQ_PAD)
    wc_pad = jnp.pad(params["wc"], ((0, 0), (0, NCLS_PAD - NUM_CLASSES)))
    bc_pad = jnp.pad(params["bc"], ((0, 0), (0, NCLS_PAD - NUM_CLASSES)))

    def stack(name):  # stack per-layer weights on a leading axis
        return jnp.stack([lp[name] for lp in params["layers"]], axis=0)

    inputs = [
        p, params["pe_w"], params["pe_b"], params["cls"][0], pos_pad, kmask,
        stack("ln1_g"), stack("ln1_b"),
        stack("wq"), stack("bq"), stack("wk"), stack("bk"),
        stack("wv"), stack("bv"), stack("wo"), stack("bo"),
        stack("ln2_g"), stack("ln2_b"),
        stack("w1"), stack("b1"), stack("w2"), stack("b2"),
        params["ln_g"], params["ln_b"], wc_pad, bc_pad,
    ]

    logits_pad = pl.pallas_call(
        vit_fused_kernel,
        out_shape=jax.ShapeDtypeStruct((bsz, NCLS_PAD), jnp.float32),
        grid=(1,),
        in_specs=[_full_spec(a) for a in inputs],
        out_specs=pl.BlockSpec((bsz, NCLS_PAD), lambda i: (0, 0)),
        scratch_shapes=[pltpu.VMEM((bsz * SEQ_PAD, D), jnp.float32)],
        compiler_params=pltpu.CompilerParams(
            dimension_semantics=("arbitrary",)),
    )(*inputs)
    return logits_pad[:, :NUM_CLASSES]


# ---------------- deterministic parameter init ----------------
def init_params(key):
    keys = jax.random.split(key, 4)

    def nrm(k, shape, scale=0.02):
        return (scale * jax.random.normal(k, shape)).astype(jnp.float32)

    def zeros(shape):
        return jnp.zeros(shape, jnp.float32)

    def ones(shape):
        return jnp.ones(shape, jnp.float32)

    params = {
        "pe_w": nrm(keys[0], (C * PATCH * PATCH, D)),
        "pe_b": zeros((1, D)),
        "cls": nrm(keys[1], (1, 1, D)),
        "pos": nrm(keys[2], (1, SEQ, D)),
        "ln_g": ones((1, D)),
        "ln_b": zeros((1, D)),
        "wc": nrm(keys[3], (D, NUM_CLASSES)),
        "bc": zeros((1, NUM_CLASSES)),
        "layers": [],
    }
    for l in range(LAYERS):
        lk = jax.random.split(jax.random.fold_in(key, 100 + l), 6)
        params["layers"].append({
            "ln1_g": ones((1, D)), "ln1_b": zeros((1, D)),
            "wq": nrm(lk[0], (D, D)), "bq": zeros((1, D)),
            "wk": nrm(lk[1], (D, D)), "bk": zeros((1, D)),
            "wv": nrm(lk[2], (D, D)), "bv": zeros((1, D)),
            "wo": nrm(lk[3], (D, D)), "bo": zeros((1, D)),
            "ln2_g": ones((1, D)), "ln2_b": zeros((1, D)),
            "w1": nrm(lk[4], (D, MLP)), "b1": zeros((1, MLP)),
            "w2": nrm(lk[5], (MLP, D)), "b2": zeros((1, D)),
        })
    return params


if __name__ == "__main__":
    key = jax.random.PRNGKey(0)
    pkey, xkey = jax.random.split(key)
    params = init_params(pkey)
    x = jax.random.normal(xkey, (B, C, IMG, IMG), dtype=jnp.float32)

    logits = vit_forward(x, params)
    logits = jax.block_until_ready(logits)
    assert logits.shape == (B, NUM_CLASSES), logits.shape
    assert jnp.all(jnp.isfinite(logits))
    print("KERNEL_OK")
</pallas_src>

<mosaic_0001>
module attributes {stable_mosaic.version = 11 : i64} {
  func.func @vit_fused_kernel(%arg0: i32, %arg1: memref<8x192xf32, #tpu.memory_space<vmem>>, %arg2: memref<192x32xf32, #tpu.memory_space<vmem>>, %arg3: memref<1x32xf32, #tpu.memory_space<vmem>>, %arg4: memref<1x32xf32, #tpu.memory_space<vmem>>, %arg5: memref<8x32xf32, #tpu.memory_space<vmem>>, %arg6: memref<1x8xf32, #tpu.memory_space<vmem>>, %arg7: memref<2x1x32xf32, #tpu.memory_space<vmem>>, %arg8: memref<2x1x32xf32, #tpu.memory_space<vmem>>, %arg9: memref<2x32x32xf32, #tpu.memory_space<vmem>>, %arg10: memref<2x1x32xf32, #tpu.memory_space<vmem>>, %arg11: memref<2x32x32xf32, #tpu.memory_space<vmem>>, %arg12: memref<2x1x32xf32, #tpu.memory_space<vmem>>, %arg13: memref<2x32x32xf32, #tpu.memory_space<vmem>>, %arg14: memref<2x1x32xf32, #tpu.memory_space<vmem>>, %arg15: memref<2x32x32xf32, #tpu.memory_space<vmem>>, %arg16: memref<2x1x32xf32, #tpu.memory_space<vmem>>, %arg17: memref<2x1x32xf32, #tpu.memory_space<vmem>>, %arg18: memref<2x1x32xf32, #tpu.memory_space<vmem>>, %arg19: memref<2x32x64xf32, #tpu.memory_space<vmem>>, %arg20: memref<2x1x64xf32, #tpu.memory_space<vmem>>, %arg21: memref<2x64x32xf32, #tpu.memory_space<vmem>>, %arg22: memref<2x1x32xf32, #tpu.memory_space<vmem>>, %arg23: memref<1x32xf32, #tpu.memory_space<vmem>>, %arg24: memref<1x32xf32, #tpu.memory_space<vmem>>, %arg25: memref<32x128xf32, #tpu.memory_space<vmem>>, %arg26: memref<1x128xf32, #tpu.memory_space<vmem>>, %arg27: memref<2x128xf32, #tpu.memory_space<vmem>>, %arg28: memref<16x32xf32, #tpu.memory_space<vmem>>) attributes {dimension_semantics = [#tpu.dimension_semantics<arbitrary>], iteration_bounds = array<i64: 1>, scalar_prefetch = 0 : i64, scratch_operands = 1 : i64, tpu.core_type = #tpu.core_type<tc>, window_params = [{pipeline_mode = #tpu.pipeline_mode<synchronous>, transform_indices = @transform_0, window_bounds = array<i64: 8, 192>}, {pipeline_mode = #tpu.pipeline_mode<synchronous>, transform_indices = @transform_1, window_bounds = array<i64: 192, 32>}, {pipeline_mode = #tpu.pipeline_mode<synchronous>, transform_indices = @transform_2, window_bounds = array<i64: 1, 32>}, {pipeline_mode = #tpu.pipeline_mode<synchronous>, transform_indices = @transform_3, window_bounds = array<i64: 1, 32>}, {pipeline_mode = #tpu.pipeline_mode<synchronous>, transform_indices = @transform_4, window_bounds = array<i64: 8, 32>}, {pipeline_mode = #tpu.pipeline_mode<synchronous>, transform_indices = @transform_5, window_bounds = array<i64: 1, 8>}, {pipeline_mode = #tpu.pipeline_mode<synchronous>, transform_indices = @transform_6, window_bounds = array<i64: 2, 1, 32>}, {pipeline_mode = #tpu.pipeline_mode<synchronous>, transform_indices = @transform_7, window_bounds = array<i64: 2, 1, 32>}, {pipeline_mode = #tpu.pipeline_mode<synchronous>, transform_indices = @transform_8, window_bounds = array<i64: 2, 32, 32>}, {pipeline_mode = #tpu.pipeline_mode<synchronous>, transform_indices = @transform_9, window_bounds = array<i64: 2, 1, 32>}, {pipeline_mode = #tpu.pipeline_mode<synchronous>, transform_indices = @transform_10, window_bounds = array<i64: 2, 32, 32>}, {pipeline_mode = #tpu.pipeline_mode<synchronous>, transform_indices = @transform_11, window_bounds = array<i64: 2, 1, 32>}, {pipeline_mode = #tpu.pipeline_mode<synchronous>, transform_indices = @transform_12, window_bounds = array<i64: 2, 32, 32>}, {pipeline_mode = #tpu.pipeline_mode<synchronous>, transform_indices = @transform_13, window_bounds = array<i64: 2, 1, 32>}, {pipeline_mode = #tpu.pipeline_mode<synchronous>, transform_indices = @transform_14, window_bounds = array<i64: 2, 32, 32>}, {pipeline_mode = #tpu.pipeline_mode<synchronous>, transform_indices = @transform_15, window_bounds = array<i64: 2, 1, 32>}, {pipeline_mode = #tpu.pipeline_mode<synchronous>, transform_indices = @transform_16, window_bounds = array<i64: 2, 1, 32>}, {pipeline_mode = #tpu.pipeline_mode<synchronous>, transform_indices = @transform_17, window_bounds = array<i64: 2, 1, 32>}, {pipeline_mode = #tpu.pipeline_mode<synchronous>, transform_indices = @transform_18, window_bounds = array<i64: 2, 32, 64>}, {pipeline_mode = #tpu.pipeline_mode<synchronous>, transform_indices = @transform_19, window_bounds = array<i64: 2, 1, 64>}, {pipeline_mode = #tpu.pipeline_mode<synchronous>, transform_indices = @transform_20, window_bounds = array<i64: 2, 64, 32>}, {pipeline_mode = #tpu.pipeline_mode<synchronous>, transform_indices = @transform_21, window_bounds = array<i64: 2, 1, 32>}, {pipeline_mode = #tpu.pipeline_mode<synchronous>, transform_indices = @transform_22, window_bounds = array<i64: 1, 32>}, {pipeline_mode = #tpu.pipeline_mode<synchronous>, transform_indices = @transform_23, window_bounds = array<i64: 1, 32>}, {pipeline_mode = #tpu.pipeline_mode<synchronous>, transform_indices = @transform_24, window_bounds = array<i64: 32, 128>}, {pipeline_mode = #tpu.pipeline_mode<synchronous>, transform_indices = @transform_25, window_bounds = array<i64: 1, 128>}, {pipeline_mode = #tpu.pipeline_mode<synchronous>, transform_indices = @transform_26, window_bounds = array<i64: 2, 128>}]} {
    %c0 = arith.constant 0 : index
    %c0_0 = arith.constant 0 : index
    %0 = vector.load %arg1[%c0, %c0_0] : memref<8x192xf32, #tpu.memory_space<vmem>>, vector<8x192xf32>
    %c0_1 = arith.constant 0 : index
    %c0_2 = arith.constant 0 : index
    %1 = vector.load %arg2[%c0_1, %c0_2] : memref<192x32xf32, #tpu.memory_space<vmem>>, vector<192x32xf32>
    %cst = arith.constant dense<0.000000e+00> : vector<8x32xf32>
    %2 = tpu.matmul %0, %1, %cst {dimension_numbers = #tpu.dot_dimension_numbers<[1], [0], [0], [1], [0, 0, 1, 1], [], []>} : vector<8x192xf32>, vector<192x32xf32>, vector<8x32xf32> -> vector<8x32xf32>
    %c0_3 = arith.constant 0 : index
    %c0_4 = arith.constant 0 : index
    %3 = vector.load %arg3[%c0_3, %c0_4] : memref<1x32xf32, #tpu.memory_space<vmem>>, vector<1x32xf32>
    %4 = vector.broadcast %3 : vector<1x32xf32> to vector<8x32xf32>
    %5 = arith.addf %2, %4 : vector<8x32xf32>
    %cst_5 = arith.constant 0.000000e+00 : f32
    %6 = vector.broadcast %cst_5 : f32 to vector<16x32xf32>
    %c0_6 = arith.constant 0 : index
    %c0_7 = arith.constant 0 : index
    %7 = vector.load %arg28[%c0_6, %c0_7] : memref<16x32xf32, #tpu.memory_space<vmem>>, vector<16x32xf32>
    tpu.vector_store %arg28[%c0_6, %c0_7], %6 {strides = array<i32>} : memref<16x32xf32, #tpu.memory_space<vmem>>, vector<16x32xf32>,
    %c0_8 = arith.constant 0 : index
    %c0_9 = arith.constant 0 : index
    %8 = vector.load %arg4[%c0_8, %c0_9] : memref<1x32xf32, #tpu.memory_space<vmem>>, vector<1x32xf32>
    %c0_10 = arith.constant 0 : index
    %c0_11 = arith.constant 0 : index
    %9 = vector.load %arg5[%c0_10, %c0_11] : memref<8x32xf32, #tpu.memory_space<vmem>>, vector<1x32xf32>
    %10 = arith.addf %8, %9 : vector<1x32xf32>
    %c1 = arith.constant 1 : index
    %c0_12 = arith.constant 0 : index
    %11 = vector.load %arg5[%c1, %c0_12] : memref<8x32xf32, #tpu.memory_space<vmem>>, vector<4x32xf32>
    %c0_13 = arith.constant 0 : index
    %c0_14 = arith.constant 0 : index
    %12 = vector.load %arg28[%c0_13, %c0_14] : memref<16x32xf32, #tpu.memory_space<vmem>>, vector<1x32xf32>
    tpu.vector_store %arg28[%c0_13, %c0_14], %10 {strides = array<i32>} : memref<16x32xf32, #tpu.memory_space<vmem>>, vector<1x32xf32>,
    %13 = vector.extract_strided_slice %5 {offsets = [0, 0], sizes = [4, 32], strides = [1, 1]} : vector<8x32xf32> to vector<4x32xf32>
    %14 = arith.addf %13, %11 : vector<4x32xf32>
    %c1_15 = arith.constant 1 : index
    %c0_16 = arith.constant 0 : index
    %15 = vector.load %arg28[%c1_15, %c0_16] : memref<16x32xf32, #tpu.memory_space<vmem>>, vector<4x32xf32>
    tpu.vector_store %arg28[%c1_15, %c0_16], %14 {strides = array<i32>} : memref<16x32xf32, #tpu.memory_space<vmem>>, vector<4x32xf32>,
    %c8 = arith.constant 8 : index
    %c0_17 = arith.constant 0 : index
    %16 = vector.load %arg28[%c8, %c0_17] : memref<16x32xf32, #tpu.memory_space<vmem>>, vector<1x32xf32>
    tpu.vector_store %arg28[%c8, %c0_17], %10 {strides = array<i32>} : memref<16x32xf32, #tpu.memory_space<vmem>>, vector<1x32xf32>,
    %17 = vector.extract_strided_slice %5 {offsets = [4, 0], sizes = [4, 32], strides = [1, 1]} : vector<8x32xf32> to vector<4x32xf32>
    %18 = arith.addf %17, %11 : vector<4x32xf32>
    %c9 = arith.constant 9 : index
    %c0_18 = arith.constant 0 : index
    %19 = vector.load %arg28[%c9, %c0_18] : memref<16x32xf32, #tpu.memory_space<vmem>>, vector<4x32xf32>
    tpu.vector_store %arg28[%c9, %c0_18], %18 {strides = array<i32>} : memref<16x32xf32, #tpu.memory_space<vmem>>, vector<4x32xf32>,
    %c0_19 = arith.constant 0 : index
    %c0_20 = arith.constant 0 : index
    %20 = vector.load %arg28[%c0_19, %c0_20] : memref<16x32xf32, #tpu.memory_space<vmem>>, vector<16x32xf32>
    %c0_21 = arith.constant 0 : index
    %c0_22 = arith.constant 0 : index
    %21 = vector.load %arg6[%c0_21, %c0_22] : memref<1x8xf32, #tpu.memory_space<vmem>>, vector<1x8xf32>
    %22 = vector.shape_cast %21 : vector<1x8xf32> to vector<1x1x8xf32>
    %c0_23 = arith.constant 0 : index
    %c0_24 = arith.constant 0 : index
    %c0_25 = arith.constant 0 : index
    %23 = vector.load %arg7[%c0_23, %c0_24, %c0_25] : memref<2x1x32xf32, #tpu.memory_space<vmem>>, vector<1x1x32xf32>
    %24 = vector.shape_cast %23 : vector<1x1x32xf32> to vector<1x32xf32>
    %c0_26 = arith.constant 0 : index
    %c0_27 = arith.constant 0 : index
    %c0_28 = arith.constant 0 : index
    %25 = vector.load %arg8[%c0_26, %c0_27, %c0_28] : memref<2x1x32xf32, #tpu.memory_space<vmem>>, vector<1x1x32xf32>
    %26 = vector.shape_cast %25 : vector<1x1x32xf32> to vector<1x32xf32>
    %cst_29 = arith.constant dense<0.000000e+00> : vector<16xf32>
    %27 = vector.multi_reduction <add>, %20, %cst_29 [1] : vector<16x32xf32> to vector<16xf32>
    %28 = vector.shape_cast %27 : vector<16xf32> to vector<16x1xf32>
    %cst_30 = arith.constant 3.200000e+01 : f32
    %29 = vector.broadcast %cst_30 : f32 to vector<16x1xf32>
    %30 = arith.divf %28, %29 : vector<16x1xf32>
    %31 = vector.broadcast %30 : vector<16x1xf32> to vector<16x32xf32>
    %32 = arith.subf %20, %31 : vector<16x32xf32>
    %33 = arith.mulf %32, %32 : vector<16x32xf32>
    %cst_31 = arith.constant dense<0.000000e+00> : vector<16xf32>
    %34 = vector.multi_reduction <add>, %33, %cst_31 [1] : vector<16x32xf32> to vector<16xf32>
    %35 = vector.shape_cast %34 : vector<16xf32> to vector<16x1xf32>
    %cst_32 = arith.constant 3.200000e+01 : f32
    %36 = vector.broadcast %cst_32 : f32 to vector<16x1xf32>
    %37 = arith.divf %35, %36 : vector<16x1xf32>
    %38 = vector.broadcast %30 : vector<16x1xf32> to vector<16x32xf32>
    %39 = arith.subf %20, %38 : vector<16x32xf32>
    %cst_33 = arith.constant 9.99999996E-13 : f32
    %40 = vector.broadcast %cst_33 : f32 to vector<16x1xf32>
    %41 = arith.addf %37, %40 : vector<16x1xf32>
    %42 = math.rsqrt %41 : vector<16x1xf32>
    %43 = vector.broadcast %42 : vector<16x1xf32> to vector<16x32xf32>
    %44 = arith.mulf %39, %43 : vector<16x32xf32>
    %45 = vector.broadcast %24 : vector<1x32xf32> to vector<16x32xf32>
    %46 = arith.mulf %44, %45 : vector<16x32xf32>
    %47 = vector.broadcast %26 : vector<1x32xf32> to vector<16x32xf32>
    %48 = arith.addf %46, %47 : vector<16x32xf32>
    %c0_34 = arith.constant 0 : index
    %c0_35 = arith.constant 0 : index
    %c0_36 = arith.constant 0 : index
    %49 = vector.load %arg9[%c0_34, %c0_35, %c0_36] : memref<2x32x32xf32, #tpu.memory_space<vmem>>, vector<1x32x32xf32>
    %50 = vector.shape_cast %49 : vector<1x32x32xf32> to vector<32x32xf32>
    %cst_37 = arith.constant dense<0.000000e+00> : vector<16x32xf32>
    %51 = tpu.matmul %48, %50, %cst_37 {dimension_numbers = #tpu.dot_dimension_numbers<[1], [0], [0], [1], [0, 0, 1, 1], [], []>} : vector<16x32xf32>, vector<32x32xf32>, vector<16x32xf32> -> vector<16x32xf32>
    %c0_38 = arith.constant 0 : index
    %c0_39 = arith.constant 0 : index
    %c0_40 = arith.constant 0 : index
    %52 = vector.load %arg10[%c0_38, %c0_39, %c0_40] : memref<2x1x32xf32, #tpu.memory_space<vmem>>, vector<1x1x32xf32>
    %53 = vector.shape_cast %52 : vector<1x1x32xf32> to vector<1x32xf32>
    %54 = vector.broadcast %53 : vector<1x32xf32> to vector<16x32xf32>
    %55 = arith.addf %51, %54 : vector<16x32xf32>
    %c0_41 = arith.constant 0 : index
    %c0_42 = arith.constant 0 : index
    %c0_43 = arith.constant 0 : index
    %56 = vector.load %arg11[%c0_41, %c0_42, %c0_43] : memref<2x32x32xf32, #tpu.memory_space<vmem>>, vector<1x32x32xf32>
    %57 = vector.shape_cast %56 : vector<1x32x32xf32> to vector<32x32xf32>
    %cst_44 = arith.constant dense<0.000000e+00> : vector<16x32xf32>
    %58 = tpu.matmul %48, %57, %cst_44 {dimension_numbers = #tpu.dot_dimension_numbers<[1], [0], [0], [1], [0, 0, 1, 1], [], []>} : vector<16x32xf32>, vector<32x32xf32>, vector<16x32xf32> -> vector<16x32xf32>
    %c0_45 = arith.constant 0 : index
    %c0_46 = arith.constant 0 : index
    %c0_47 = arith.constant 0 : index
    %59 = vector.load %arg12[%c0_45, %c0_46, %c0_47] : memref<2x1x32xf32, #tpu.memory_space<vmem>>, vector<1x1x32xf32>
    %60 = vector.shape_cast %59 : vector<1x1x32xf32> to vector<1x32xf32>
    %61 = vector.broadcast %60 : vector<1x32xf32> to vector<16x32xf32>
    %62 = arith.addf %58, %61 : vector<16x32xf32>
    %c0_48 = arith.constant 0 : index
    %c0_49 = arith.constant 0 : index
    %c0_50 = arith.constant 0 : index
    %63 = vector.load %arg13[%c0_48, %c0_49, %c0_50] : memref<2x32x32xf32, #tpu.memory_space<vmem>>, vector<1x32x32xf32>
    %64 = vector.shape_cast %63 : vector<1x32x32xf32> to vector<32x32xf32>
    %cst_51 = arith.constant dense<0.000000e+00> : vector<16x32xf32>
    %65 = tpu.matmul %48, %64, %cst_51 {dimension_numbers = #tpu.dot_dimension_numbers<[1], [0], [0], [1], [0, 0, 1, 1], [], []>} : vector<16x32xf32>, vector<32x32xf32>, vector<16x32xf32> -> vector<16x32xf32>
    %c0_52 = arith.constant 0 : index
    %c0_53 = arith.constant 0 : index
    %c0_54 = arith.constant 0 : index
    %66 = vector.load %arg14[%c0_52, %c0_53, %c0_54] : memref<2x1x32xf32, #tpu.memory_space<vmem>>, vector<1x1x32xf32>
    %67 = vector.shape_cast %66 : vector<1x1x32xf32> to vector<1x32xf32>
    %68 = vector.broadcast %67 : vector<1x32xf32> to vector<16x32xf32>
    %69 = arith.addf %65, %68 : vector<16x32xf32>
    %c0_55 = arith.constant 0 : index
    %c0_56 = arith.constant 0 : index
    %c0_57 = arith.constant 0 : index
    %70 = vector.load %arg15[%c0_55, %c0_56, %c0_57] : memref<2x32x32xf32, #tpu.memory_space<vmem>>, vector<1x32x32xf32>
    %71 = vector.shape_cast %70 : vector<1x32x32xf32> to vector<32x32xf32>
    %cst_58 = arith.constant 0.000000e+00 : f32
    %72 = vector.broadcast %cst_58 : f32 to vector<16x32xf32>
    %73 = vector.extract_strided_slice %55 {offsets = [0, 0], sizes = [16, 8], strides = [1, 1]} : vector<16x32xf32> to vector<16x8xf32>
    %74 = vector.shape_cast %73 : vector<16x8xf32> to vector<2x8x8xf32>
    %75 = vector.extract_strided_slice %62 {offsets = [0, 0], sizes = [16, 8], strides = [1, 1]} : vector<16x32xf32> to vector<16x8xf32>
    %76 = vector.shape_cast %75 : vector<16x8xf32> to vector<2x8x8xf32>
    %77 = vector.extract_strided_slice %69 {offsets = [0, 0], sizes = [16, 8], strides = [1, 1]} : vector<16x32xf32> to vector<16x8xf32>
    %78 = vector.shape_cast %77 : vector<16x8xf32> to vector<2x8x8xf32>
    "tpu.trace_start"() <{level = 10 : i32, message = "bqd,bkd->bqk"}> : () -> ()
    %cst_59 = arith.constant dense<0.000000e+00> : vector<2x8x8xf32>
    %79 = tpu.matmul %74, %76, %cst_59 {dimension_numbers = #tpu.dot_dimension_numbers<[2], [2], [1], [1], [0, 0, 0, 1, 1, 1], [0], [0]>} : vector<2x8x8xf32>, vector<2x8x8xf32>, vector<2x8x8xf32> -> vector<2x8x8xf32>
    "tpu.trace_stop"() : () -> ()
    %cst_60 = arith.constant 0.353553385 : f32
    %80 = vector.broadcast %cst_60 : f32 to vector<2x8x8xf32>
    %81 = arith.mulf %79, %80 : vector<2x8x8xf32>
    %82 = vector.broadcast %22 : vector<1x1x8xf32> to vector<2x8x8xf32>
    %83 = arith.addf %81, %82 : vector<2x8x8xf32>
    %cst_61 = arith.constant dense<0xFF800000> : vector<2x8xf32>
    %84 = vector.multi_reduction <maximumf>, %83, %cst_61 [2] : vector<2x8x8xf32> to vector<2x8xf32>
    %85 = vector.shape_cast %84 : vector<2x8xf32> to vector<2x8x1xf32>
    %86 = vector.broadcast %85 : vector<2x8x1xf32> to vector<2x8x8xf32>
    %87 = arith.subf %83, %86 : vector<2x8x8xf32>
    %88 = math.exp %87 : vector<2x8x8xf32>
    %cst_62 = arith.constant dense<0.000000e+00> : vector<2x8xf32>
    %89 = vector.multi_reduction <add>, %88, %cst_62 [2] : vector<2x8x8xf32> to vector<2x8xf32>
    %90 = vector.shape_cast %89 : vector<2x8xf32> to vector<2x8x1xf32>
    %91 = tpu.reciprocal %90 {approx = true} : vector<2x8x1xf32> -> vector<2x8x1xf32>
    %92 = vector.broadcast %91 : vector<2x8x1xf32> to vector<2x8x8xf32>
    %93 = arith.mulf %88, %92 : vector<2x8x8xf32>
    "tpu.trace_start"() <{level = 10 : i32, message = "bqk,bkd->bqd"}> : () -> ()
    %cst_63 = arith.constant dense<0.000000e+00> : vector<2x8x8xf32>
    %94 = tpu.matmul %93, %78, %cst_63 {dimension_numbers = #tpu.dot_dimension_numbers<[2], [1], [1], [2], [0, 0, 0, 1, 1, 2], [0], [0]>} : vector<2x8x8xf32>, vector<2x8x8xf32>, vector<2x8x8xf32> -> vector<2x8x8xf32>
    "tpu.trace_stop"() : () -> ()
    %95 = vector.shape_cast %94 : vector<2x8x8xf32> to vector<16x8xf32>
    %96 = vector.extract_strided_slice %71 {offsets = [0, 0], sizes = [8, 32], strides = [1, 1]} : vector<32x32xf32> to vector<8x32xf32>
    %cst_64 = arith.constant dense<0.000000e+00> : vector<16x32xf32>
    %97 = tpu.matmul %95, %96, %cst_64 {dimension_numbers = #tpu.dot_dimension_numbers<[1], [0], [0], [1], [0, 0, 1, 1], [], []>} : vector<16x8xf32>, vector<8x32xf32>, vector<16x32xf32> -> vector<16x32xf32>
    %98 = arith.addf %72, %97 : vector<16x32xf32>
    %99 = vector.extract_strided_slice %55 {offsets = [0, 8], sizes = [16, 8], strides = [1, 1]} : vector<16x32xf32> to vector<16x8xf32>
    %100 = vector.shape_cast %99 : vector<16x8xf32> to vector<2x8x8xf32>
    %101 = vector.extract_strided_slice %62 {offsets = [0, 8], sizes = [16, 8], strides = [1, 1]} : vector<16x32xf32> to vector<16x8xf32>
    %102 = vector.shape_cast %101 : vector<16x8xf32> to vector<2x8x8xf32>
    %103 = vector.extract_strided_slice %69 {offsets = [0, 8], sizes = [16, 8], strides = [1, 1]} : vector<16x32xf32> to vector<16x8xf32>
    %104 = vector.shape_cast %103 : vector<16x8xf32> to vector<2x8x8xf32>
    "tpu.trace_start"() <{level = 10 : i32, message = "bqd,bkd->bqk"}> : () -> ()
    %cst_65 = arith.constant dense<0.000000e+00> : vector<2x8x8xf32>
    %105 = tpu.matmul %100, %102, %cst_65 {dimension_numbers = #tpu.dot_dimension_numbers<[2], [2], [1], [1], [0, 0, 0, 1, 1, 1], [0], [0]>} : vector<2x8x8xf32>, vector<2x8x8xf32>, vector<2x8x8xf32> -> vector<2x8x8xf32>
    "tpu.trace_stop"() : () -> ()
    %cst_66 = arith.constant 0.353553385 : f32
    %106 = vector.broadcast %cst_66 : f32 to vector<2x8x8xf32>
    %107 = arith.mulf %105, %106 : vector<2x8x8xf32>
    %108 = vector.broadcast %22 : vector<1x1x8xf32> to vector<2x8x8xf32>
    %109 = arith.addf %107, %108 : vector<2x8x8xf32>
    %cst_67 = arith.constant dense<0xFF800000> : vector<2x8xf32>
    %110 = vector.multi_reduction <maximumf>, %109, %cst_67 [2] : vector<2x8x8xf32> to vector<2x8xf32>
    %111 = vector.shape_cast %110 : vector<2x8xf32> to vector<2x8x1xf32>
    %112 = vector.broadcast %111 : vector<2x8x1xf32> to vector<2x8x8xf32>
    %113 = arith.subf %109, %112 : vector<2x8x8xf32>
    %114 = math.exp %113 : vector<2x8x8xf32>
    %cst_68 = arith.constant dense<0.000000e+00> : vector<2x8xf32>
    %115 = vector.multi_reduction <add>, %114, %cst_68 [2] : vector<2x8x8xf32> to vector<2x8xf32>
    %116 = vector.shape_cast %115 : vector<2x8xf32> to vector<2x8x1xf32>
    %117 = tpu.reciprocal %116 {approx = true} : vector<2x8x1xf32> -> vector<2x8x1xf32>
    %118 = vector.broadcast %117 : vector<2x8x1xf32> to vector<2x8x8xf32>
    %119 = arith.mulf %114, %118 : vector<2x8x8xf32>
    "tpu.trace_start"() <{level = 10 : i32, message = "bqk,bkd->bqd"}> : () -> ()
    %cst_69 = arith.constant dense<0.000000e+00> : vector<2x8x8xf32>
    %120 = tpu.matmul %119, %104, %cst_69 {dimension_numbers = #tpu.dot_dimension_numbers<[2], [1], [1], [2], [0, 0, 0, 1, 1, 2], [0], [0]>} : vector<2x8x8xf32>, vector<2x8x8xf32>, vector<2x8x8xf32> -> vector<2x8x8xf32>
    "tpu.trace_stop"() : () -> ()
    %121 = vector.shape_cast %120 : vector<2x8x8xf32> to vector<16x8xf32>
    %122 = vector.extract_strided_slice %71 {offsets = [8, 0], sizes = [8, 32], strides = [1, 1]} : vector<32x32xf32> to vector<8x32xf32>
    %cst_70 = arith.constant dense<0.000000e+00> : vector<16x32xf32>
    %123 = tpu.matmul %121, %122, %cst_70 {dimension_numbers = #tpu.dot_dimension_numbers<[1], [0], [0], [1], [0, 0, 1, 1], [], []>} : vector<16x8xf32>, vector<8x32xf32>, vector<16x32xf32> -> vector<16x32xf32>
    %124 = arith.addf %98, %123 : vector<16x32xf32>
    %125 = vector.extract_strided_slice %55 {offsets = [0, 16], sizes = [16, 8], strides = [1, 1]} : vector<16x32xf32> to vector<16x8xf32>
    %126 = vector.shape_cast %125 : vector<16x8xf32> to vector<2x8x8xf32>
    %127 = vector.extract_strided_slice %62 {offsets = [0, 16], sizes = [16, 8], strides = [1, 1]} : vector<16x32xf32> to vector<16x8xf32>
    %128 = vector.shape_cast %127 : vector<16x8xf32> to vector<2x8x8xf32>
    %129 = vector.extract_strided_slice %69 {offsets = [0, 16], sizes = [16, 8], strides = [1, 1]} : vector<16x32xf32> to vector<16x8xf32>
    %130 = vector.shape_cast %129 : vector<16x8xf32> to vector<2x8x8xf32>
    "tpu.trace_start"() <{level = 10 : i32, message = "bqd,bkd->bqk"}> : () -> ()
    %cst_71 = arith.constant dense<0.000000e+00> : vector<2x8x8xf32>
    %131 = tpu.matmul %126, %128, %cst_71 {dimension_numbers = #tpu.dot_dimension_numbers<[2], [2], [1], [1], [0, 0, 0, 1, 1, 1], [0], [0]>} : vector<2x8x8xf32>, vector<2x8x8xf32>, vector<2x8x8xf32> -> vector<2x8x8xf32>
    "tpu.trace_stop"() : () -> ()
    %cst_72 = arith.constant 0.353553385 : f32
    %132 = vector.broadcast %cst_72 : f32 to vector<2x8x8xf32>
    %133 = arith.mulf %131, %132 : vector<2x8x8xf32>
    %134 = vector.broadcast %22 : vector<1x1x8xf32> to vector<2x8x8xf32>
    %135 = arith.addf %133, %134 : vector<2x8x8xf32>
    %cst_73 = arith.constant dense<0xFF800000> : vector<2x8xf32>
    %136 = vector.multi_reduction <maximumf>, %135, %cst_73 [2] : vector<2x8x8xf32> to vector<2x8xf32>
    %137 = vector.shape_cast %136 : vector<2x8xf32> to vector<2x8x1xf32>
    %138 = vector.broadcast %137 : vector<2x8x1xf32> to vector<2x8x8xf32>
    %139 = arith.subf %135, %138 : vector<2x8x8xf32>
    %140 = math.exp %139 : vector<2x8x8xf32>
    %cst_74 = arith.constant dense<0.000000e+00> : vector<2x8xf32>
    %141 = vector.multi_reduction <add>, %140, %cst_74 [2] : vector<2x8x8xf32> to vector<2x8xf32>
    %142 = vector.shape_cast %141 : vector<2x8xf32> to vector<2x8x1xf32>
    %143 = tpu.reciprocal %142 {approx = true} : vector<2x8x1xf32> -> vector<2x8x1xf32>
    %144 = vector.broadcast %143 : vector<2x8x1xf32> to vector<2x8x8xf32>
    %145 = arith.mulf %140, %144 : vector<2x8x8xf32>
    "tpu.trace_start"() <{level = 10 : i32, message = "bqk,bkd->bqd"}> : () -> ()
    %cst_75 = arith.constant dense<0.000000e+00> : vector<2x8x8xf32>
    %146 = tpu.matmul %145, %130, %cst_75 {dimension_numbers = #tpu.dot_dimension_numbers<[2], [1], [1], [2], [0, 0, 0, 1, 1, 2], [0], [0]>} : vector<2x8x8xf32>, vector<2x8x8xf32>, vector<2x8x8xf32> -> vector<2x8x8xf32>
    "tpu.trace_stop"() : () -> ()
    %147 = vector.shape_cast %146 : vector<2x8x8xf32> to vector<16x8xf32>
    %148 = vector.extract_strided_slice %71 {offsets = [16, 0], sizes = [8, 32], strides = [1, 1]} : vector<32x32xf32> to vector<8x32xf32>
    %cst_76 = arith.constant dense<0.000000e+00> : vector<16x32xf32>
    %149 = tpu.matmul %147, %148, %cst_76 {dimension_numbers = #tpu.dot_dimension_numbers<[1], [0], [0], [1], [0, 0, 1, 1], [], []>} : vector<16x8xf32>, vector<8x32xf32>, vector<16x32xf32> -> vector<16x32xf32>
    %150 = arith.addf %124, %149 : vector<16x32xf32>
    %151 = vector.extract_strided_slice %55 {offsets = [0, 24], sizes = [16, 8], strides = [1, 1]} : vector<16x32xf32> to vector<16x8xf32>
    %152 = vector.shape_cast %151 : vector<16x8xf32> to vector<2x8x8xf32>
    %153 = vector.extract_strided_slice %62 {offsets = [0, 24], sizes = [16, 8], strides = [1, 1]} : vector<16x32xf32> to vector<16x8xf32>
    %154 = vector.shape_cast %153 : vector<16x8xf32> to vector<2x8x8xf32>
    %155 = vector.extract_strided_slice %69 {offsets = [0, 24], sizes = [16, 8], strides = [1, 1]} : vector<16x32xf32> to vector<16x8xf32>
    %156 = vector.shape_cast %155 : vector<16x8xf32> to vector<2x8x8xf32>
    "tpu.trace_start"() <{level = 10 : i32, message = "bqd,bkd->bqk"}> : () -> ()
    %cst_77 = arith.constant dense<0.000000e+00> : vector<2x8x8xf32>
    %157 = tpu.matmul %152, %154, %cst_77 {dimension_numbers = #tpu.dot_dimension_numbers<[2], [2], [1], [1], [0, 0, 0, 1, 1, 1], [0], [0]>} : vector<2x8x8xf32>, vector<2x8x8xf32>, vector<2x8x8xf32> -> vector<2x8x8xf32>
    "tpu.trace_stop"() : () -> ()
    %cst_78 = arith.constant 0.353553385 : f32
    %158 = vector.broadcast %cst_78 : f32 to vector<2x8x8xf32>
    %159 = arith.mulf %157, %158 : vector<2x8x8xf32>
    %160 = vector.broadcast %22 : vector<1x1x8xf32> to vector<2x8x8xf32>
    %161 = arith.addf %159, %160 : vector<2x8x8xf32>
    %cst_79 = arith.constant dense<0xFF800000> : vector<2x8xf32>
    %162 = vector.multi_reduction <maximumf>, %161, %cst_79 [2] : vector<2x8x8xf32> to vector<2x8xf32>
    %163 = vector.shape_cast %162 : vector<2x8xf32> to vector<2x8x1xf32>
    %164 = vector.broadcast %163 : vector<2x8x1xf32> to vector<2x8x8xf32>
    %165 = arith.subf %161, %164 : vector<2x8x8xf32>
    %166 = math.exp %165 : vector<2x8x8xf32>
    %cst_80 = arith.constant dense<0.000000e+00> : vector<2x8xf32>
    %167 = vector.multi_reduction <add>, %166, %cst_80 [2] : vector<2x8x8xf32> to vector<2x8xf32>
    %168 = vector.shape_cast %167 : vector<2x8xf32> to vector<2x8x1xf32>
    %169 = tpu.reciprocal %168 {approx = true} : vector<2x8x1xf32> -> vector<2x8x1xf32>
    %170 = vector.broadcast %169 : vector<2x8x1xf32> to vector<2x8x8xf32>
    %171 = arith.mulf %166, %170 : vector<2x8x8xf32>
    "tpu.trace_start"() <{level = 10 : i32, message = "bqk,bkd->bqd"}> : () -> ()
    %cst_81 = arith.constant dense<0.000000e+00> : vector<2x8x8xf32>
    %172 = tpu.matmul %171, %156, %cst_81 {dimension_numbers = #tpu.dot_dimension_numbers<[2], [1], [1], [2], [0, 0, 0, 1, 1, 2], [0], [0]>} : vector<2x8x8xf32>, vector<2x8x8xf32>, vector<2x8x8xf32> -> vector<2x8x8xf32>
    "tpu.trace_stop"() : () -> ()
    %173 = vector.shape_cast %172 : vector<2x8x8xf32> to vector<16x8xf32>
    %174 = vector.extract_strided_slice %71 {offsets = [24, 0], sizes = [8, 32], strides = [1, 1]} : vector<32x32xf32> to vector<8x32xf32>
    %cst_82 = arith.constant dense<0.000000e+00> : vector<16x32xf32>
    %175 = tpu.matmul %173, %174, %cst_82 {dimension_numbers = #tpu.dot_dimension_numbers<[1], [0], [0], [1], [0, 0, 1, 1], [], []>} : vector<16x8xf32>, vector<8x32xf32>, vector<16x32xf32> -> vector<16x32xf32>
    %176 = arith.addf %150, %175 : vector<16x32xf32>
    %177 = arith.addf %20, %176 : vector<16x32xf32>
    %c0_83 = arith.constant 0 : index
    %c0_84 = arith.constant 0 : index
    %c0_85 = arith.constant 0 : index
    %178 = vector.load %arg16[%c0_83, %c0_84, %c0_85] : memref<2x1x32xf32, #tpu.memory_space<vmem>>, vector<1x1x32xf32>
    %179 = vector.shape_cast %178 : vector<1x1x32xf32> to vector<1x32xf32>
    %180 = vector.broadcast %179 : vector<1x32xf32> to vector<16x32xf32>
    %181 = arith.addf %177, %180 : vector<16x32xf32>
    %c0_86 = arith.constant 0 : index
    %c0_87 = arith.constant 0 : index
    %c0_88 = arith.constant 0 : index
    %182 = vector.load %arg17[%c0_86, %c0_87, %c0_88] : memref<2x1x32xf32, #tpu.memory_space<vmem>>, vector<1x1x32xf32>
    %183 = vector.shape_cast %182 : vector<1x1x32xf32> to vector<1x32xf32>
    %c0_89 = arith.constant 0 : index
    %c0_90 = arith.constant 0 : index
    %c0_91 = arith.constant 0 : index
    %184 = vector.load %arg18[%c0_89, %c0_90, %c0_91] : memref<2x1x32xf32, #tpu.memory_space<vmem>>, vector<1x1x32xf32>
    %185 = vector.shape_cast %184 : vector<1x1x32xf32> to vector<1x32xf32>
    %cst_92 = arith.constant dense<0.000000e+00> : vector<16xf32>
    %186 = vector.multi_reduction <add>, %181, %cst_92 [1] : vector<16x32xf32> to vector<16xf32>
    %187 = vector.shape_cast %186 : vector<16xf32> to vector<16x1xf32>
    %cst_93 = arith.constant 3.200000e+01 : f32
    %188 = vector.broadcast %cst_93 : f32 to vector<16x1xf32>
    %189 = arith.divf %187, %188 : vector<16x1xf32>
    %190 = vector.broadcast %189 : vector<16x1xf32> to vector<16x32xf32>
    %191 = arith.subf %181, %190 : vector<16x32xf32>
    %192 = arith.mulf %191, %191 : vector<16x32xf32>
    %cst_94 = arith.constant dense<0.000000e+00> : vector<16xf32>
    %193 = vector.multi_reduction <add>, %192, %cst_94 [1] : vector<16x32xf32> to vector<16xf32>
    %194 = vector.shape_cast %193 : vector<16xf32> to vector<16x1xf32>
    %cst_95 = arith.constant 3.200000e+01 : f32
    %195 = vector.broadcast %cst_95 : f32 to vector<16x1xf32>
    %196 = arith.divf %194, %195 : vector<16x1xf32>
    %197 = vector.broadcast %189 : vector<16x1xf32> to vector<16x32xf32>
    %198 = arith.subf %181, %197 : vector<16x32xf32>
    %cst_96 = arith.constant 9.99999996E-13 : f32
    %199 = vector.broadcast %cst_96 : f32 to vector<16x1xf32>
    %200 = arith.addf %196, %199 : vector<16x1xf32>
    %201 = math.rsqrt %200 : vector<16x1xf32>
    %202 = vector.broadcast %201 : vector<16x1xf32> to vector<16x32xf32>
    %203 = arith.mulf %198, %202 : vector<16x32xf32>
    %204 = vector.broadcast %183 : vector<1x32xf32> to vector<16x32xf32>
    %205 = arith.mulf %203, %204 : vector<16x32xf32>
    %206 = vector.broadcast %185 : vector<1x32xf32> to vector<16x32xf32>
    %207 = arith.addf %205, %206 : vector<16x32xf32>
    %c0_97 = arith.constant 0 : index
    %c0_98 = arith.constant 0 : index
    %c0_99 = arith.constant 0 : index
    %208 = vector.load %arg19[%c0_97, %c0_98, %c0_99] : memref<2x32x64xf32, #tpu.memory_space<vmem>>, vector<1x32x64xf32>
    %209 = vector.shape_cast %208 : vector<1x32x64xf32> to vector<32x64xf32>
    %cst_100 = arith.constant dense<0.000000e+00> : vector<16x64xf32>
    %210 = tpu.matmul %207, %209, %cst_100 {dimension_numbers = #tpu.dot_dimension_numbers<[1], [0], [0], [1], [0, 0, 1, 1], [], []>} : vector<16x32xf32>, vector<32x64xf32>, vector<16x64xf32> -> vector<16x64xf32>
    %c0_101 = arith.constant 0 : index
    %c0_102 = arith.constant 0 : index
    %c0_103 = arith.constant 0 : index
    %211 = vector.load %arg20[%c0_101, %c0_102, %c0_103] : memref<2x1x64xf32, #tpu.memory_space<vmem>>, vector<1x1x64xf32>
    %212 = vector.shape_cast %211 : vector<1x1x64xf32> to vector<1x64xf32>
    %213 = vector.broadcast %212 : vector<1x64xf32> to vector<16x64xf32>
    %214 = arith.addf %210, %213 : vector<16x64xf32>
    %215 = arith.mulf %214, %214 : vector<16x64xf32>
    %216 = arith.mulf %214, %215 : vector<16x64xf32>
    %cst_104 = arith.constant 4.471500e-02 : f32
    %217 = vector.broadcast %cst_104 : f32 to vector<16x64xf32>
    %218 = arith.mulf %217, %216 : vector<16x64xf32>
    %219 = arith.addf %214, %218 : vector<16x64xf32>
    %cst_105 = arith.constant 0.797884583 : f32
    %220 = vector.broadcast %cst_105 : f32 to vector<16x64xf32>
    %221 = arith.mulf %220, %219 : vector<16x64xf32>
    %222 = math.tanh %221 : vector<16x64xf32>
    %cst_106 = arith.constant 1.000000e+00 : f32
    %223 = vector.broadcast %cst_106 : f32 to vector<16x64xf32>
    %224 = arith.addf %223, %222 : vector<16x64xf32>
    %cst_107 = arith.constant 5.000000e-01 : f32
    %225 = vector.broadcast %cst_107 : f32 to vector<16x64xf32>
    %226 = arith.mulf %225, %224 : vector<16x64xf32>
    %227 = arith.mulf %214, %226 : vector<16x64xf32>
    %c0_108 = arith.constant 0 : index
    %c0_109 = arith.constant 0 : index
    %c0_110 = arith.constant 0 : index
    %228 = vector.load %arg21[%c0_108, %c0_109, %c0_110] : memref<2x64x32xf32, #tpu.memory_space<vmem>>, vector<1x64x32xf32>
    %229 = vector.shape_cast %228 : vector<1x64x32xf32> to vector<64x32xf32>
    %cst_111 = arith.constant dense<0.000000e+00> : vector<16x32xf32>
    %230 = tpu.matmul %227, %229, %cst_111 {dimension_numbers = #tpu.dot_dimension_numbers<[1], [0], [0], [1], [0, 0, 1, 1], [], []>} : vector<16x64xf32>, vector<64x32xf32>, vector<16x32xf32> -> vector<16x32xf32>
    %231 = arith.addf %181, %230 : vector<16x32xf32>
    %c0_112 = arith.constant 0 : index
    %c0_113 = arith.constant 0 : index
    %c0_114 = arith.constant 0 : index
    %232 = vector.load %arg22[%c0_112, %c0_113, %c0_114] : memref<2x1x32xf32, #tpu.memory_space<vmem>>, vector<1x1x32xf32>
    %233 = vector.shape_cast %232 : vector<1x1x32xf32> to vector<1x32xf32>
    %234 = vector.broadcast %233 : vector<1x32xf32> to vector<16x32xf32>
    %235 = arith.addf %231, %234 : vector<16x32xf32>
    %c1_115 = arith.constant 1 : index
    %c0_116 = arith.constant 0 : index
    %c0_117 = arith.constant 0 : index
    %236 = vector.load %arg7[%c1_115, %c0_116, %c0_117] : memref<2x1x32xf32, #tpu.memory_space<vmem>>, vector<1x1x32xf32>
    %237 = vector.shape_cast %236 : vector<1x1x32xf32> to vector<1x32xf32>
    %c1_118 = arith.constant 1 : index
    %c0_119 = arith.constant 0 : index
    %c0_120 = arith.constant 0 : index
    %238 = vector.load %arg8[%c1_118, %c0_119, %c0_120] : memref<2x1x32xf32, #tpu.memory_space<vmem>>, vector<1x1x32xf32>
    %239 = vector.shape_cast %238 : vector<1x1x32xf32> to vector<1x32xf32>
    %cst_121 = arith.constant dense<0.000000e+00> : vector<16xf32>
    %240 = vector.multi_reduction <add>, %235, %cst_121 [1] : vector<16x32xf32> to vector<16xf32>
    %241 = vector.shape_cast %240 : vector<16xf32> to vector<16x1xf32>
    %cst_122 = arith.constant 3.200000e+01 : f32
    %242 = vector.broadcast %cst_122 : f32 to vector<16x1xf32>
    %243 = arith.divf %241, %242 : vector<16x1xf32>
    %244 = vector.broadcast %243 : vector<16x1xf32> to vector<16x32xf32>
    %245 = arith.subf %235, %244 : vector<16x32xf32>
    %246 = arith.mulf %245, %245 : vector<16x32xf32>
    %cst_123 = arith.constant dense<0.000000e+00> : vector<16xf32>
    %247 = vector.multi_reduction <add>, %246, %cst_123 [1] : vector<16x32xf32> to vector<16xf32>
    %248 = vector.shape_cast %247 : vector<16xf32> to vector<16x1xf32>
    %cst_124 = arith.constant 3.200000e+01 : f32
    %249 = vector.broadcast %cst_124 : f32 to vector<16x1xf32>
    %250 = arith.divf %248, %249 : vector<16x1xf32>
    %251 = vector.broadcast %243 : vector<16x1xf32> to vector<16x32xf32>
    %252 = arith.subf %235, %251 : vector<16x32xf32>
    %cst_125 = arith.constant 9.99999996E-13 : f32
    %253 = vector.broadcast %cst_125 : f32 to vector<16x1xf32>
    %254 = arith.addf %250, %253 : vector<16x1xf32>
    %255 = math.rsqrt %254 : vector<16x1xf32>
    %256 = vector.broadcast %255 : vector<16x1xf32> to vector<16x32xf32>
    %257 = arith.mulf %252, %256 : vector<16x32xf32>
    %258 = vector.broadcast %237 : vector<1x32xf32> to vector<16x32xf32>
    %259 = arith.mulf %257, %258 : vector<16x32xf32>
    %260 = vector.broadcast %239 : vector<1x32xf32> to vector<16x32xf32>
    %261 = arith.addf %259, %260 : vector<16x32xf32>
    %c1_126 = arith.constant 1 : index
    %c0_127 = arith.constant 0 : index
    %c0_128 = arith.constant 0 : index
    %262 = vector.load %arg9[%c1_126, %c0_127, %c0_128] : memref<2x32x32xf32, #tpu.memory_space<vmem>>, vector<1x32x32xf32>
    %263 = vector.shape_cast %262 : vector<1x32x32xf32> to vector<32x32xf32>
    %cst_129 = arith.constant dense<0.000000e+00> : vector<16x32xf32>
    %264 = tpu.matmul %261, %263, %cst_129 {dimension_numbers = #tpu.dot_dimension_numbers<[1], [0], [0], [1], [0, 0, 1, 1], [], []>} : vector<16x32xf32>, vector<32x32xf32>, vector<16x32xf32> -> vector<16x32xf32>
    %c1_130 = arith.constant 1 : index
    %c0_131 = arith.constant 0 : index
    %c0_132 = arith.constant 0 : index
    %265 = vector.load %arg10[%c1_130, %c0_131, %c0_132] : memref<2x1x32xf32, #tpu.memory_space<vmem>>, vector<1x1x32xf32>
    %266 = vector.shape_cast %265 : vector<1x1x32xf32> to vector<1x32xf32>
    %267 = vector.broadcast %266 : vector<1x32xf32> to vector<16x32xf32>
    %268 = arith.addf %264, %267 : vector<16x32xf32>
    %c1_133 = arith.constant 1 : index
    %c0_134 = arith.constant 0 : index
    %c0_135 = arith.constant 0 : index
    %269 = vector.load %arg11[%c1_133, %c0_134, %c0_135] : memref<2x32x32xf32, #tpu.memory_space<vmem>>, vector<1x32x32xf32>
    %270 = vector.shape_cast %269 : vector<1x32x32xf32> to vector<32x32xf32>
    %cst_136 = arith.constant dense<0.000000e+00> : vector<16x32xf32>
    %271 = tpu.matmul %261, %270, %cst_136 {dimension_numbers = #tpu.dot_dimension_numbers<[1], [0], [0], [1], [0, 0, 1, 1], [], []>} : vector<16x32xf32>, vector<32x32xf32>, vector<16x32xf32> -> vector<16x32xf32>
    %c1_137 = arith.constant 1 : index
    %c0_138 = arith.constant 0 : index
    %c0_139 = arith.constant 0 : index
    %272 = vector.load %arg12[%c1_137, %c0_138, %c0_139] : memref<2x1x32xf32, #tpu.memory_space<vmem>>, vector<1x1x32xf32>
    %273 = vector.shape_cast %272 : vector<1x1x32xf32> to vector<1x32xf32>
    %274 = vector.broadcast %273 : vector<1x32xf32> to vector<16x32xf32>
    %275 = arith.addf %271, %274 : vector<16x32xf32>
    %c1_140 = arith.constant 1 : index
    %c0_141 = arith.constant 0 : index
    %c0_142 = arith.constant 0 : index
    %276 = vector.load %arg13[%c1_140, %c0_141, %c0_142] : memref<2x32x32xf32, #tpu.memory_space<vmem>>, vector<1x32x32xf32>
    %277 = vector.shape_cast %276 : vector<1x32x32xf32> to vector<32x32xf32>
    %cst_143 = arith.constant dense<0.000000e+00> : vector<16x32xf32>
    %278 = tpu.matmul %261, %277, %cst_143 {dimension_numbers = #tpu.dot_dimension_numbers<[1], [0], [0], [1], [0, 0, 1, 1], [], []>} : vector<16x32xf32>, vector<32x32xf32>, vector<16x32xf32> -> vector<16x32xf32>
    %c1_144 = arith.constant 1 : index
    %c0_145 = arith.constant 0 : index
    %c0_146 = arith.constant 0 : index
    %279 = vector.load %arg14[%c1_144, %c0_145, %c0_146] : memref<2x1x32xf32, #tpu.memory_space<vmem>>, vector<1x1x32xf32>
    %280 = vector.shape_cast %279 : vector<1x1x32xf32> to vector<1x32xf32>
    %281 = vector.broadcast %280 : vector<1x32xf32> to vector<16x32xf32>
    %282 = arith.addf %278, %281 : vector<16x32xf32>
    %c1_147 = arith.constant 1 : index
    %c0_148 = arith.constant 0 : index
    %c0_149 = arith.constant 0 : index
    %283 = vector.load %arg15[%c1_147, %c0_148, %c0_149] : memref<2x32x32xf32, #tpu.memory_space<vmem>>, vector<1x32x32xf32>
    %284 = vector.shape_cast %283 : vector<1x32x32xf32> to vector<32x32xf32>
    %cst_150 = arith.constant 0.000000e+00 : f32
    %285 = vector.broadcast %cst_150 : f32 to vector<16x32xf32>
    %286 = vector.extract_strided_slice %268 {offsets = [0, 0], sizes = [16, 8], strides = [1, 1]} : vector<16x32xf32> to vector<16x8xf32>
    %287 = vector.shape_cast %286 : vector<16x8xf32> to vector<2x8x8xf32>
    %288 = vector.extract_strided_slice %275 {offsets = [0, 0], sizes = [16, 8], strides = [1, 1]} : vector<16x32xf32> to vector<16x8xf32>
    %289 = vector.shape_cast %288 : vector<16x8xf32> to vector<2x8x8xf32>
    %290 = vector.extract_strided_slice %282 {offsets = [0, 0], sizes = [16, 8], strides = [1, 1]} : vector<16x32xf32> to vector<16x8xf32>
    %291 = vector.shape_cast %290 : vector<16x8xf32> to vector<2x8x8xf32>
    "tpu.trace_start"() <{level = 10 : i32, message = "bqd,bkd->bqk"}> : () -> ()
    %cst_151 = arith.constant dense<0.000000e+00> : vector<2x8x8xf32>
    %292 = tpu.matmul %287, %289, %cst_151 {dimension_numbers = #tpu.dot_dimension_numbers<[2], [2], [1], [1], [0, 0, 0, 1, 1, 1], [0], [0]>} : vector<2x8x8xf32>, vector<2x8x8xf32>, vector<2x8x8xf32> -> vector<2x8x8xf32>
    "tpu.trace_stop"() : () -> ()
    %cst_152 = arith.constant 0.353553385 : f32
    %293 = vector.broadcast %cst_152 : f32 to vector<2x8x8xf32>
    %294 = arith.mulf %292, %293 : vector<2x8x8xf32>
    %295 = vector.broadcast %22 : vector<1x1x8xf32> to vector<2x8x8xf32>
    %296 = arith.addf %294, %295 : vector<2x8x8xf32>
    %cst_153 = arith.constant dense<0xFF800000> : vector<2x8xf32>
    %297 = vector.multi_reduction <maximumf>, %296, %cst_153 [2] : vector<2x8x8xf32> to vector<2x8xf32>
    %298 = vector.shape_cast %297 : vector<2x8xf32> to vector<2x8x1xf32>
    %299 = vector.broadcast %298 : vector<2x8x1xf32> to vector<2x8x8xf32>
    %300 = arith.subf %296, %299 : vector<2x8x8xf32>
    %301 = math.exp %300 : vector<2x8x8xf32>
    %cst_154 = arith.constant dense<0.000000e+00> : vector<2x8xf32>
    %302 = vector.multi_reduction <add>, %301, %cst_154 [2] : vector<2x8x8xf32> to vector<2x8xf32>
    %303 = vector.shape_cast %302 : vector<2x8xf32> to vector<2x8x1xf32>
    %304 = tpu.reciprocal %303 {approx = true} : vector<2x8x1xf32> -> vector<2x8x1xf32>
    %305 = vector.broadcast %304 : vector<2x8x1xf32> to vector<2x8x8xf32>
    %306 = arith.mulf %301, %305 : vector<2x8x8xf32>
    "tpu.trace_start"() <{level = 10 : i32, message = "bqk,bkd->bqd"}> : () -> ()
    %cst_155 = arith.constant dense<0.000000e+00> : vector<2x8x8xf32>
    %307 = tpu.matmul %306, %291, %cst_155 {dimension_numbers = #tpu.dot_dimension_numbers<[2], [1], [1], [2], [0, 0, 0, 1, 1, 2], [0], [0]>} : vector<2x8x8xf32>, vector<2x8x8xf32>, vector<2x8x8xf32> -> vector<2x8x8xf32>
    "tpu.trace_stop"() : () -> ()
    %308 = vector.shape_cast %307 : vector<2x8x8xf32> to vector<16x8xf32>
    %309 = vector.extract_strided_slice %284 {offsets = [0, 0], sizes = [8, 32], strides = [1, 1]} : vector<32x32xf32> to vector<8x32xf32>
    %cst_156 = arith.constant dense<0.000000e+00> : vector<16x32xf32>
    %310 = tpu.matmul %308, %309, %cst_156 {dimension_numbers = #tpu.dot_dimension_numbers<[1], [0], [0], [1], [0, 0, 1, 1], [], []>} : vector<16x8xf32>, vector<8x32xf32>, vector<16x32xf32> -> vector<16x32xf32>
    %311 = arith.addf %285, %310 : vector<16x32xf32>
    %312 = vector.extract_strided_slice %268 {offsets = [0, 8], sizes = [16, 8], strides = [1, 1]} : vector<16x32xf32> to vector<16x8xf32>
    %313 = vector.shape_cast %312 : vector<16x8xf32> to vector<2x8x8xf32>
    %314 = vector.extract_strided_slice %275 {offsets = [0, 8], sizes = [16, 8], strides = [1, 1]} : vector<16x32xf32> to vector<16x8xf32>
    %315 = vector.shape_cast %314 : vector<16x8xf32> to vector<2x8x8xf32>
    %316 = vector.extract_strided_slice %282 {offsets = [0, 8], sizes = [16, 8], strides = [1, 1]} : vector<16x32xf32> to vector<16x8xf32>
    %317 = vector.shape_cast %316 : vector<16x8xf32> to vector<2x8x8xf32>
    "tpu.trace_start"() <{level = 10 : i32, message = "bqd,bkd->bqk"}> : () -> ()
    %cst_157 = arith.constant dense<0.000000e+00> : vector<2x8x8xf32>
    %318 = tpu.matmul %313, %315, %cst_157 {dimension_numbers = #tpu.dot_dimension_numbers<[2], [2], [1], [1], [0, 0, 0, 1, 1, 1], [0], [0]>} : vector<2x8x8xf32>, vector<2x8x8xf32>, vector<2x8x8xf32> -> vector<2x8x8xf32>
    "tpu.trace_stop"() : () -> ()
    %cst_158 = arith.constant 0.353553385 : f32
    %319 = vector.broadcast %cst_158 : f32 to vector<2x8x8xf32>
    %320 = arith.mulf %318, %319 : vector<2x8x8xf32>
    %321 = vector.broadcast %22 : vector<1x1x8xf32> to vector<2x8x8xf32>
    %322 = arith.addf %320, %321 : vector<2x8x8xf32>
    %cst_159 = arith.constant dense<0xFF800000> : vector<2x8xf32>
    %323 = vector.multi_reduction <maximumf>, %322, %cst_159 [2] : vector<2x8x8xf32> to vector<2x8xf32>
    %324 = vector.shape_cast %323 : vector<2x8xf32> to vector<2x8x1xf32>
    %325 = vector.broadcast %324 : vector<2x8x1xf32> to vector<2x8x8xf32>
    %326 = arith.subf %322, %325 : vector<2x8x8xf32>
    %327 = math.exp %326 : vector<2x8x8xf32>
    %cst_160 = arith.constant dense<0.000000e+00> : vector<2x8xf32>
    %328 = vector.multi_reduction <add>, %327, %cst_160 [2] : vector<2x8x8xf32> to vector<2x8xf32>
    %329 = vector.shape_cast %328 : vector<2x8xf32> to vector<2x8x1xf32>
    %330 = tpu.reciprocal %329 {approx = true} : vector<2x8x1xf32> -> vector<2x8x1xf32>
    %331 = vector.broadcast %330 : vector<2x8x1xf32> to vector<2x8x8xf32>
    %332 = arith.mulf %327, %331 : vector<2x8x8xf32>
    "tpu.trace_start"() <{level = 10 : i32, message = "bqk,bkd->bqd"}> : () -> ()
    %cst_161 = arith.constant dense<0.000000e+00> : vector<2x8x8xf32>
    %333 = tpu.matmul %332, %317, %cst_161 {dimension_numbers = #tpu.dot_dimension_numbers<[2], [1], [1], [2], [0, 0, 0, 1, 1, 2], [0], [0]>} : vector<2x8x8xf32>, vector<2x8x8xf32>, vector<2x8x8xf32> -> vector<2x8x8xf32>
    "tpu.trace_stop"() : () -> ()
    %334 = vector.shape_cast %333 : vector<2x8x8xf32> to vector<16x8xf32>
    %335 = vector.extract_strided_slice %284 {offsets = [8, 0], sizes = [8, 32], strides = [1, 1]} : vector<32x32xf32> to vector<8x32xf32>
    %cst_162 = arith.constant dense<0.000000e+00> : vector<16x32xf32>
    %336 = tpu.matmul %334, %335, %cst_162 {dimension_numbers = #tpu.dot_dimension_numbers<[1], [0], [0], [1], [0, 0, 1, 1], [], []>} : vector<16x8xf32>, vector<8x32xf32>, vector<16x32xf32> -> vector<16x32xf32>
    %337 = arith.addf %311, %336 : vector<16x32xf32>
    %338 = vector.extract_strided_slice %268 {offsets = [0, 16], sizes = [16, 8], strides = [1, 1]} : vector<16x32xf32> to vector<16x8xf32>
    %339 = vector.shape_cast %338 : vector<16x8xf32> to vector<2x8x8xf32>
    %340 = vector.extract_strided_slice %275 {offsets = [0, 16], sizes = [16, 8], strides = [1, 1]} : vector<16x32xf32> to vector<16x8xf32>
    %341 = vector.shape_cast %340 : vector<16x8xf32> to vector<2x8x8xf32>
    %342 = vector.extract_strided_slice %282 {offsets = [0, 16], sizes = [16, 8], strides = [1, 1]} : vector<16x32xf32> to vector<16x8xf32>
    %343 = vector.shape_cast %342 : vector<16x8xf32> to vector<2x8x8xf32>
    "tpu.trace_start"() <{level = 10 : i32, message = "bqd,bkd->bqk"}> : () -> ()
    %cst_163 = arith.constant dense<0.000000e+00> : vector<2x8x8xf32>
    %344 = tpu.matmul %339, %341, %cst_163 {dimension_numbers = #tpu.dot_dimension_numbers<[2], [2], [1], [1], [0, 0, 0, 1, 1, 1], [0], [0]>} : vector<2x8x8xf32>, vector<2x8x8xf32>, vector<2x8x8xf32> -> vector<2x8x8xf32>
    "tpu.trace_stop"() : () -> ()
    %cst_164 = arith.constant 0.353553385 : f32
    %345 = vector.broadcast %cst_164 : f32 to vector<2x8x8xf32>
    %346 = arith.mulf %344, %345 : vector<2x8x8xf32>
    %347 = vector.broadcast %22 : vector<1x1x8xf32> to vector<2x8x8xf32>
    %348 = arith.addf %346, %347 : vector<2x8x8xf32>
    %cst_165 = arith.constant dense<0xFF800000> : vector<2x8xf32>
    %349 = vector.multi_reduction <maximumf>, %348, %cst_165 [2] : vector<2x8x8xf32> to vector<2x8xf32>
    %350 = vector.shape_cast %349 : vector<2x8xf32> to vector<2x8x1xf32>
    %351 = vector.broadcast %350 : vector<2x8x1xf32> to vector<2x8x8xf32>
    %352 = arith.subf %348, %351 : vector<2x8x8xf32>
    %353 = math.exp %352 : vector<2x8x8xf32>
    %cst_166 = arith.constant dense<0.000000e+00> : vector<2x8xf32>
    %354 = vector.multi_reduction <add>, %353, %cst_166 [2] : vector<2x8x8xf32> to vector<2x8xf32>
    %355 = vector.shape_cast %354 : vector<2x8xf32> to vector<2x8x1xf32>
    %356 = tpu.reciprocal %355 {approx = true} : vector<2x8x1xf32> -> vector<2x8x1xf32>
    %357 = vector.broadcast %356 : vector<2x8x1xf32> to vector<2x8x8xf32>
    %358 = arith.mulf %353, %357 : vector<2x8x8xf32>
    "tpu.trace_start"() <{level = 10 : i32, message = "bqk,bkd->bqd"}> : () -> ()
    %cst_167 = arith.constant dense<0.000000e+00> : vector<2x8x8xf32>
    %359 = tpu.matmul %358, %343, %cst_167 {dimension_numbers = #tpu.dot_dimension_numbers<[2], [1], [1], [2], [0, 0, 0, 1, 1, 2], [0], [0]>} : vector<2x8x8xf32>, vector<2x8x8xf32>, vector<2x8x8xf32> -> vector<2x8x8xf32>
    "tpu.trace_stop"() : () -> ()
    %360 = vector.shape_cast %359 : vector<2x8x8xf32> to vector<16x8xf32>
    %361 = vector.extract_strided_slice %284 {offsets = [16, 0], sizes = [8, 32], strides = [1, 1]} : vector<32x32xf32> to vector<8x32xf32>
    %cst_168 = arith.constant dense<0.000000e+00> : vector<16x32xf32>
    %362 = tpu.matmul %360, %361, %cst_168 {dimension_numbers = #tpu.dot_dimension_numbers<[1], [0], [0], [1], [0, 0, 1, 1], [], []>} : vector<16x8xf32>, vector<8x32xf32>, vector<16x32xf32> -> vector<16x32xf32>
    %363 = arith.addf %337, %362 : vector<16x32xf32>
    %364 = vector.extract_strided_slice %268 {offsets = [0, 24], sizes = [16, 8], strides = [1, 1]} : vector<16x32xf32> to vector<16x8xf32>
    %365 = vector.shape_cast %364 : vector<16x8xf32> to vector<2x8x8xf32>
    %366 = vector.extract_strided_slice %275 {offsets = [0, 24], sizes = [16, 8], strides = [1, 1]} : vector<16x32xf32> to vector<16x8xf32>
    %367 = vector.shape_cast %366 : vector<16x8xf32> to vector<2x8x8xf32>
    %368 = vector.extract_strided_slice %282 {offsets = [0, 24], sizes = [16, 8], strides = [1, 1]} : vector<16x32xf32> to vector<16x8xf32>
    %369 = vector.shape_cast %368 : vector<16x8xf32> to vector<2x8x8xf32>
    "tpu.trace_start"() <{level = 10 : i32, message = "bqd,bkd->bqk"}> : () -> ()
    %cst_169 = arith.constant dense<0.000000e+00> : vector<2x8x8xf32>
    %370 = tpu.matmul %365, %367, %cst_169 {dimension_numbers = #tpu.dot_dimension_numbers<[2], [2], [1], [1], [0, 0, 0, 1, 1, 1], [0], [0]>} : vector<2x8x8xf32>, vector<2x8x8xf32>, vector<2x8x8xf32> -> vector<2x8x8xf32>
    "tpu.trace_stop"() : () -> ()
    %cst_170 = arith.constant 0.353553385 : f32
    %371 = vector.broadcast %cst_170 : f32 to vector<2x8x8xf32>
    %372 = arith.mulf %370, %371 : vector<2x8x8xf32>
    %373 = vector.broadcast %22 : vector<1x1x8xf32> to vector<2x8x8xf32>
    %374 = arith.addf %372, %373 : vector<2x8x8xf32>
    %cst_171 = arith.constant dense<0xFF800000> : vector<2x8xf32>
    %375 = vector.multi_reduction <maximumf>, %374, %cst_171 [2] : vector<2x8x8xf32> to vector<2x8xf32>
    %376 = vector.shape_cast %375 : vector<2x8xf32> to vector<2x8x1xf32>
    %377 = vector.broadcast %376 : vector<2x8x1xf32> to vector<2x8x8xf32>
    %378 = arith.subf %374, %377 : vector<2x8x8xf32>
    %379 = math.exp %378 : vector<2x8x8xf32>
    %cst_172 = arith.constant dense<0.000000e+00> : vector<2x8xf32>
    %380 = vector.multi_reduction <add>, %379, %cst_172 [2] : vector<2x8x8xf32> to vector<2x8xf32>
    %381 = vector.shape_cast %380 : vector<2x8xf32> to vector<2x8x1xf32>
    %382 = tpu.reciprocal %381 {approx = true} : vector<2x8x1xf32> -> vector<2x8x1xf32>
    %383 = vector.broadcast %382 : vector<2x8x1xf32> to vector<2x8x8xf32>
    %384 = arith.mulf %379, %383 : vector<2x8x8xf32>
    "tpu.trace_start"() <{level = 10 : i32, message = "bqk,bkd->bqd"}> : () -> ()
    %cst_173 = arith.constant dense<0.000000e+00> : vector<2x8x8xf32>
    %385 = tpu.matmul %384, %369, %cst_173 {dimension_numbers = #tpu.dot_dimension_numbers<[2], [1], [1], [2], [0, 0, 0, 1, 1, 2], [0], [0]>} : vector<2x8x8xf32>, vector<2x8x8xf32>, vector<2x8x8xf32> -> vector<2x8x8xf32>
    "tpu.trace_stop"() : () -> ()
    %386 = vector.shape_cast %385 : vector<2x8x8xf32> to vector<16x8xf32>
    %387 = vector.extract_strided_slice %284 {offsets = [24, 0], sizes = [8, 32], strides = [1, 1]} : vector<32x32xf32> to vector<8x32xf32>
    %cst_174 = arith.constant dense<0.000000e+00> : vector<16x32xf32>
    %388 = tpu.matmul %386, %387, %cst_174 {dimension_numbers = #tpu.dot_dimension_numbers<[1], [0], [0], [1], [0, 0, 1, 1], [], []>} : vector<16x8xf32>, vector<8x32xf32>, vector<16x32xf32> -> vector<16x32xf32>
    %389 = arith.addf %363, %388 : vector<16x32xf32>
    %390 = arith.addf %235, %389 : vector<16x32xf32>
    %c1_175 = arith.constant 1 : index
    %c0_176 = arith.constant 0 : index
    %c0_177 = arith.constant 0 : index
    %391 = vector.load %arg16[%c1_175, %c0_176, %c0_177] : memref<2x1x32xf32, #tpu.memory_space<vmem>>, vector<1x1x32xf32>
    %392 = vector.shape_cast %391 : vector<1x1x32xf32> to vector<1x32xf32>
    %393 = vector.broadcast %392 : vector<1x32xf32> to vector<16x32xf32>
    %394 = arith.addf %390, %393 : vector<16x32xf32>
    %c1_178 = arith.constant 1 : index
    %c0_179 = arith.constant 0 : index
    %c0_180 = arith.constant 0 : index
    %395 = vector.load %arg17[%c1_178, %c0_179, %c0_180] : memref<2x1x32xf32, #tpu.memory_space<vmem>>, vector<1x1x32xf32>
    %396 = vector.shape_cast %395 : vector<1x1x32xf32> to vector<1x32xf32>
    %c1_181 = arith.constant 1 : index
    %c0_182 = arith.constant 0 : index
    %c0_183 = arith.constant 0 : index
    %397 = vector.load %arg18[%c1_181, %c0_182, %c0_183] : memref<2x1x32xf32, #tpu.memory_space<vmem>>, vector<1x1x32xf32>
    %398 = vector.shape_cast %397 : vector<1x1x32xf32> to vector<1x32xf32>
    %cst_184 = arith.constant dense<0.000000e+00> : vector<16xf32>
    %399 = vector.multi_reduction <add>, %394, %cst_184 [1] : vector<16x32xf32> to vector<16xf32>
    %400 = vector.shape_cast %399 : vector<16xf32> to vector<16x1xf32>
    %cst_185 = arith.constant 3.200000e+01 : f32
    %401 = vector.broadcast %cst_185 : f32 to vector<16x1xf32>
    %402 = arith.divf %400, %401 : vector<16x1xf32>
    %403 = vector.broadcast %402 : vector<16x1xf32> to vector<16x32xf32>
    %404 = arith.subf %394, %403 : vector<16x32xf32>
    %405 = arith.mulf %404, %404 : vector<16x32xf32>
    %cst_186 = arith.constant dense<0.000000e+00> : vector<16xf32>
    %406 = vector.multi_reduction <add>, %405, %cst_186 [1] : vector<16x32xf32> to vector<16xf32>
    %407 = vector.shape_cast %406 : vector<16xf32> to vector<16x1xf32>
    %cst_187 = arith.constant 3.200000e+01 : f32
    %408 = vector.broadcast %cst_187 : f32 to vector<16x1xf32>
    %409 = arith.divf %407, %408 : vector<16x1xf32>
    %410 = vector.broadcast %402 : vector<16x1xf32> to vector<16x32xf32>
    %411 = arith.subf %394, %410 : vector<16x32xf32>
    %cst_188 = arith.constant 9.99999996E-13 : f32
    %412 = vector.broadcast %cst_188 : f32 to vector<16x1xf32>
    %413 = arith.addf %409, %412 : vector<16x1xf32>
    %414 = math.rsqrt %413 : vector<16x1xf32>
    %415 = vector.broadcast %414 : vector<16x1xf32> to vector<16x32xf32>
    %416 = arith.mulf %411, %415 : vector<16x32xf32>
    %417 = vector.broadcast %396 : vector<1x32xf32> to vector<16x32xf32>
    %418 = arith.mulf %416, %417 : vector<16x32xf32>
    %419 = vector.broadcast %398 : vector<1x32xf32> to vector<16x32xf32>
    %420 = arith.addf %418, %419 : vector<16x32xf32>
    %c1_189 = arith.constant 1 : index
    %c0_190 = arith.constant 0 : index
    %c0_191 = arith.constant 0 : index
    %421 = vector.load %arg19[%c1_189, %c0_190, %c0_191] : memref<2x32x64xf32, #tpu.memory_space<vmem>>, vector<1x32x64xf32>
    %422 = vector.shape_cast %421 : vector<1x32x64xf32> to vector<32x64xf32>
    %cst_192 = arith.constant dense<0.000000e+00> : vector<16x64xf32>
    %423 = tpu.matmul %420, %422, %cst_192 {dimension_numbers = #tpu.dot_dimension_numbers<[1], [0], [0], [1], [0, 0, 1, 1], [], []>} : vector<16x32xf32>, vector<32x64xf32>, vector<16x64xf32> -> vector<16x64xf32>
    %c1_193 = arith.constant 1 : index
    %c0_194 = arith.constant 0 : index
    %c0_195 = arith.constant 0 : index
    %424 = vector.load %arg20[%c1_193, %c0_194, %c0_195] : memref<2x1x64xf32, #tpu.memory_space<vmem>>, vector<1x1x64xf32>
    %425 = vector.shape_cast %424 : vector<1x1x64xf32> to vector<1x64xf32>
    %426 = vector.broadcast %425 : vector<1x64xf32> to vector<16x64xf32>
    %427 = arith.addf %423, %426 : vector<16x64xf32>
    %428 = arith.mulf %427, %427 : vector<16x64xf32>
    %429 = arith.mulf %427, %428 : vector<16x64xf32>
    %cst_196 = arith.constant 4.471500e-02 : f32
    %430 = vector.broadcast %cst_196 : f32 to vector<16x64xf32>
    %431 = arith.mulf %430, %429 : vector<16x64xf32>
    %432 = arith.addf %427, %431 : vector<16x64xf32>
    %cst_197 = arith.constant 0.797884583 : f32
    %433 = vector.broadcast %cst_197 : f32 to vector<16x64xf32>
    %434 = arith.mulf %433, %432 : vector<16x64xf32>
    %435 = math.tanh %434 : vector<16x64xf32>
    %cst_198 = arith.constant 1.000000e+00 : f32
    %436 = vector.broadcast %cst_198 : f32 to vector<16x64xf32>
    %437 = arith.addf %436, %435 : vector<16x64xf32>
    %cst_199 = arith.constant 5.000000e-01 : f32
    %438 = vector.broadcast %cst_199 : f32 to vector<16x64xf32>
    %439 = arith.mulf %438, %437 : vector<16x64xf32>
    %440 = arith.mulf %427, %439 : vector<16x64xf32>
    %c1_200 = arith.constant 1 : index
    %c0_201 = arith.constant 0 : index
    %c0_202 = arith.constant 0 : index
    %441 = vector.load %arg21[%c1_200, %c0_201, %c0_202] : memref<2x64x32xf32, #tpu.memory_space<vmem>>, vector<1x64x32xf32>
    %442 = vector.shape_cast %441 : vector<1x64x32xf32> to vector<64x32xf32>
    %cst_203 = arith.constant dense<0.000000e+00> : vector<16x32xf32>
    %443 = tpu.matmul %440, %442, %cst_203 {dimension_numbers = #tpu.dot_dimension_numbers<[1], [0], [0], [1], [0, 0, 1, 1], [], []>} : vector<16x64xf32>, vector<64x32xf32>, vector<16x32xf32> -> vector<16x32xf32>
    %444 = arith.addf %394, %443 : vector<16x32xf32>
    %c1_204 = arith.constant 1 : index
    %c0_205 = arith.constant 0 : index
    %c0_206 = arith.constant 0 : index
    %445 = vector.load %arg22[%c1_204, %c0_205, %c0_206] : memref<2x1x32xf32, #tpu.memory_space<vmem>>, vector<1x1x32xf32>
    %446 = vector.shape_cast %445 : vector<1x1x32xf32> to vector<1x32xf32>
    %447 = vector.broadcast %446 : vector<1x32xf32> to vector<16x32xf32>
    %448 = arith.addf %444, %447 : vector<16x32xf32>
    %449 = vector.shape_cast %448 : vector<16x32xf32> to vector<2x8x32xf32>
    %450 = vector.extract_strided_slice %449 {offsets = [0, 0, 0], sizes = [2, 1, 32], strides = [1, 1, 1]} : vector<2x8x32xf32> to vector<2x1x32xf32>
    %451 = vector.shape_cast %450 : vector<2x1x32xf32> to vector<2x32xf32>
    %c0_207 = arith.constant 0 : index
    %c0_208 = arith.constant 0 : index
    %452 = vector.load %arg23[%c0_207, %c0_208] : memref<1x32xf32, #tpu.memory_space<vmem>>, vector<1x32xf32>
    %c0_209 = arith.constant 0 : index
    %c0_210 = arith.constant 0 : index
    %453 = vector.load %arg24[%c0_209, %c0_210] : memref<1x32xf32, #tpu.memory_space<vmem>>, vector<1x32xf32>
    %cst_211 = arith.constant dense<0.000000e+00> : vector<2xf32>
    %454 = vector.multi_reduction <add>, %451, %cst_211 [1] : vector<2x32xf32> to vector<2xf32>
    %455 = vector.shape_cast %454 : vector<2xf32> to vector<2x1xf32>
    %cst_212 = arith.constant 3.200000e+01 : f32
    %456 = vector.broadcast %cst_212 : f32 to vector<2x1xf32>
    %457 = arith.divf %455, %456 : vector<2x1xf32>
    %458 = vector.broadcast %457 : vector<2x1xf32> to vector<2x32xf32>
    %459 = arith.subf %451, %458 : vector<2x32xf32>
    %460 = arith.mulf %459, %459 : vector<2x32xf32>
    %cst_213 = arith.constant dense<0.000000e+00> : vector<2xf32>
    %461 = vector.multi_reduction <add>, %460, %cst_213 [1] : vector<2x32xf32> to vector<2xf32>
    %462 = vector.shape_cast %461 : vector<2xf32> to vector<2x1xf32>
    %cst_214 = arith.constant 3.200000e+01 : f32
    %463 = vector.broadcast %cst_214 : f32 to vector<2x1xf32>
    %464 = arith.divf %462, %463 : vector<2x1xf32>
    %465 = vector.broadcast %457 : vector<2x1xf32> to vector<2x32xf32>
    %466 = arith.subf %451, %465 : vector<2x32xf32>
    %cst_215 = arith.constant 9.99999996E-13 : f32
    %467 = vector.broadcast %cst_215 : f32 to vector<2x1xf32>
    %468 = arith.addf %464, %467 : vector<2x1xf32>
    %469 = math.rsqrt %468 : vector<2x1xf32>
    %470 = vector.broadcast %469 : vector<2x1xf32> to vector<2x32xf32>
    %471 = arith.mulf %466, %470 : vector<2x32xf32>
    %472 = vector.broadcast %452 : vector<1x32xf32> to vector<2x32xf32>
    %473 = arith.mulf %471, %472 : vector<2x32xf32>
    %474 = vector.broadcast %453 : vector<1x32xf32> to vector<2x32xf32>
    %475 = arith.addf %473, %474 : vector<2x32xf32>
    %c0_216 = arith.constant 0 : index
    %c0_217 = arith.constant 0 : index
    %476 = vector.load %arg25[%c0_216, %c0_217] : memref<32x128xf32, #tpu.memory_space<vmem>>, vector<32x128xf32>
    %cst_218 = arith.constant dense<0.000000e+00> : vector<2x128xf32>
    %477 = tpu.matmul %475, %476, %cst_218 {dimension_numbers = #tpu.dot_dimension_numbers<[1], [0], [0], [1], [0, 0, 1, 1], [], []>} : vector<2x32xf32>, vector<32x128xf32>, vector<2x128xf32> -> vector<2x128xf32>
    %c0_219 = arith.constant 0 : index
    %c0_220 = arith.constant 0 : index
    %478 = vector.load %arg26[%c0_219, %c0_220] : memref<1x128xf32, #tpu.memory_space<vmem>>, vector<1x128xf32>
    %479 = vector.broadcast %478 : vector<1x128xf32> to vector<2x128xf32>
    %480 = arith.addf %477, %479 : vector<2x128xf32>
    %c0_221 = arith.constant 0 : index
    %c0_222 = arith.constant 0 : index
    %481 = vector.load %arg27[%c0_221, %c0_222] : memref<2x128xf32, #tpu.memory_space<vmem>>, vector<2x128xf32>
    tpu.vector_store %arg27[%c0_221, %c0_222], %480 {strides = array<i32>} : memref<2x128xf32, #tpu.memory_space<vmem>>, vector<2x128xf32>,
    return
  }
  func.func @transform_0(%arg0: i32) -> (i32, i32) {
    %c0_i32 = arith.constant 0 : i32
    %c0_i32_0 = arith.constant 0 : i32
    %c0_i32_1 = arith.constant 0 : i32
    return %c0_i32, %c0_i32_0 : i32, i32
  }
  func.func @transform_1(%arg0: i32) -> (i32, i32) {
    %c0_i32 = arith.constant 0 : i32
    %c0_i32_0 = arith.constant 0 : i32
    %c0_i32_1 = arith.constant 0 : i32
    return %c0_i32, %c0_i32_0 : i32, i32
  }
  func.func @transform_2(%arg0: i32) -> (i32, i32) {
    %c0_i32 = arith.constant 0 : i32
    %c0_i32_0 = arith.constant 0 : i32
    %c0_i32_1 = arith.constant 0 : i32
    return %c0_i32, %c0_i32_0 : i32, i32
  }
  func.func @transform_3(%arg0: i32) -> (i32, i32) {
    %c0_i32 = arith.constant 0 : i32
    %c0_i32_0 = arith.constant 0 : i32
    %c0_i32_1 = arith.constant 0 : i32
    return %c0_i32, %c0_i32_0 : i32, i32
  }
  func.func @transform_4(%arg0: i32) -> (i32, i32) {
    %c0_i32 = arith.constant 0 : i32
    %c0_i32_0 = arith.constant 0 : i32
    %c0_i32_1 = arith.constant 0 : i32
    return %c0_i32, %c0_i32_0 : i32, i32
  }
  func.func @transform_5(%arg0: i32) -> (i32, i32) {
    %c0_i32 = arith.constant 0 : i32
    %c0_i32_0 = arith.constant 0 : i32
    %c0_i32_1 = arith.constant 0 : i32
    return %c0_i32, %c0_i32_0 : i32, i32
  }
  func.func @transform_6(%arg0: i32) -> (i32, i32, i32) {
    %c0_i32 = arith.constant 0 : i32
    %c0_i32_0 = arith.constant 0 : i32
    %c0_i32_1 = arith.constant 0 : i32
    %c0_i32_2 = arith.constant 0 : i32
    return %c0_i32, %c0_i32_0, %c0_i32_1 : i32, i32, i32
  }
  func.func @transform_7(%arg0: i32) -> (i32, i32, i32) {
    %c0_i32 = arith.constant 0 : i32
    %c0_i32_0 = arith.constant 0 : i32
    %c0_i32_1 = arith.constant 0 : i32
    %c0_i32_2 = arith.constant 0 : i32
    return %c0_i32, %c0_i32_0, %c0_i32_1 : i32, i32, i32
  }
  func.func @transform_8(%arg0: i32) -> (i32, i32, i32) {
    %c0_i32 = arith.constant 0 : i32
    %c0_i32_0 = arith.constant 0 : i32
    %c0_i32_1 = arith.constant 0 : i32
    %c0_i32_2 = arith.constant 0 : i32
    return %c0_i32, %c0_i32_0, %c0_i32_1 : i32, i32, i32
  }
  func.func @transform_9(%arg0: i32) -> (i32, i32, i32) {
    %c0_i32 = arith.constant 0 : i32
    %c0_i32_0 = arith.constant 0 : i32
    %c0_i32_1 = arith.constant 0 : i32
    %c0_i32_2 = arith.constant 0 : i32
    return %c0_i32, %c0_i32_0, %c0_i32_1 : i32, i32, i32
  }
  func.func @transform_10(%arg0: i32) -> (i32, i32, i32) {
    %c0_i32 = arith.constant 0 : i32
    %c0_i32_0 = arith.constant 0 : i32
    %c0_i32_1 = arith.constant 0 : i32
    %c0_i32_2 = arith.constant 0 : i32
    return %c0_i32, %c0_i32_0, %c0_i32_1 : i32, i32, i32
  }
  func.func @transform_11(%arg0: i32) -> (i32, i32, i32) {
    %c0_i32 = arith.constant 0 : i32
    %c0_i32_0 = arith.constant 0 : i32
    %c0_i32_1 = arith.constant 0 : i32
    %c0_i32_2 = arith.constant 0 : i32
    return %c0_i32, %c0_i32_0, %c0_i32_1 : i32, i32, i32
  }
  func.func @transform_12(%arg0: i32) -> (i32, i32, i32) {
    %c0_i32 = arith.constant 0 : i32
    %c0_i32_0 = arith.constant 0 : i32
    %c0_i32_1 = arith.constant 0 : i32
    %c0_i32_2 = arith.constant 0 : i32
    return %c0_i32, %c0_i32_0, %c0_i32_1 : i32, i32, i32
  }
  func.func @transform_13(%arg0: i32) -> (i32, i32, i32) {
    %c0_i32 = arith.constant 0 : i32
    %c0_i32_0 = arith.constant 0 : i32
    %c0_i32_1 = arith.constant 0 : i32
    %c0_i32_2 = arith.constant 0 : i32
    return %c0_i32, %c0_i32_0, %c0_i32_1 : i32, i32, i32
  }
  func.func @transform_14(%arg0: i32) -> (i32, i32, i32) {
    %c0_i32 = arith.constant 0 : i32
    %c0_i32_0 = arith.constant 0 : i32
    %c0_i32_1 = arith.constant 0 : i32
    %c0_i32_2 = arith.constant 0 : i32
    return %c0_i32, %c0_i32_0, %c0_i32_1 : i32, i32, i32
  }
  func.func @transform_15(%arg0: i32) -> (i32, i32, i32) {
    %c0_i32 = arith.constant 0 : i32
    %c0_i32_0 = arith.constant 0 : i32
    %c0_i32_1 = arith.constant 0 : i32
    %c0_i32_2 = arith.constant 0 : i32
    return %c0_i32, %c0_i32_0, %c0_i32_1 : i32, i32, i32
  }
  func.func @transform_16(%arg0: i32) -> (i32, i32, i32) {
    %c0_i32 = arith.constant 0 : i32
    %c0_i32_0 = arith.constant 0 : i32
    %c0_i32_1 = arith.constant 0 : i32
    %c0_i32_2 = arith.constant 0 : i32
    return %c0_i32, %c0_i32_0, %c0_i32_1 : i32, i32, i32
  }
  func.func @transform_17(%arg0: i32) -> (i32, i32, i32) {
    %c0_i32 = arith.constant 0 : i32
    %c0_i32_0 = arith.constant 0 : i32
    %c0_i32_1 = arith.constant 0 : i32
    %c0_i32_2 = arith.constant 0 : i32
    return %c0_i32, %c0_i32_0, %c0_i32_1 : i32, i32, i32
  }
  func.func @transform_18(%arg0: i32) -> (i32, i32, i32) {
    %c0_i32 = arith.constant 0 : i32
    %c0_i32_0 = arith.constant 0 : i32
    %c0_i32_1 = arith.constant 0 : i32
    %c0_i32_2 = arith.constant 0 : i32
    return %c0_i32, %c0_i32_0, %c0_i32_1 : i32, i32, i32
  }
  func.func @transform_19(%arg0: i32) -> (i32, i32, i32) {
    %c0_i32 = arith.constant 0 : i32
    %c0_i32_0 = arith.constant 0 : i32
    %c0_i32_1 = arith.constant 0 : i32
    %c0_i32_2 = arith.constant 0 : i32
    return %c0_i32, %c0_i32_0, %c0_i32_1 : i32, i32, i32
  }
  func.func @transform_20(%arg0: i32) -> (i32, i32, i32) {
    %c0_i32 = arith.constant 0 : i32
    %c0_i32_0 = arith.constant 0 : i32
    %c0_i32_1 = arith.constant 0 : i32
    %c0_i32_2 = arith.constant 0 : i32
    return %c0_i32, %c0_i32_0, %c0_i32_1 : i32, i32, i32
  }
  func.func @transform_21(%arg0: i32) -> (i32, i32, i32) {
    %c0_i32 = arith.constant 0 : i32
    %c0_i32_0 = arith.constant 0 : i32
    %c0_i32_1 = arith.constant 0 : i32
    %c0_i32_2 = arith.constant 0 : i32
    return %c0_i32, %c0_i32_0, %c0_i32_1 : i32, i32, i32
  }
  func.func @transform_22(%arg0: i32) -> (i32, i32) {
    %c0_i32 = arith.constant 0 : i32
    %c0_i32_0 = arith.constant 0 : i32
    %c0_i32_1 = arith.constant 0 : i32
    return %c0_i32, %c0_i32_0 : i32, i32
  }
  func.func @transform_23(%arg0: i32) -> (i32, i32) {
    %c0_i32 = arith.constant 0 : i32
    %c0_i32_0 = arith.constant 0 : i32
    %c0_i32_1 = arith.constant 0 : i32
    return %c0_i32, %c0_i32_0 : i32, i32
  }
  func.func @transform_24(%arg0: i32) -> (i32, i32) {
    %c0_i32 = arith.constant 0 : i32
    %c0_i32_0 = arith.constant 0 : i32
    %c0_i32_1 = arith.constant 0 : i32
    return %c0_i32, %c0_i32_0 : i32, i32
  }
  func.func @transform_25(%arg0: i32) -> (i32, i32) {
    %c0_i32 = arith.constant 0 : i32
    %c0_i32_0 = arith.constant 0 : i32
    %c0_i32_1 = arith.constant 0 : i32
    return %c0_i32, %c0_i32_0 : i32, i32
  }
  func.func @transform_26(%arg0: i32) -> (i32, i32) {
    %c0_i32 = arith.constant 0 : i32
    %c0_i32_0 = arith.constant 0 : i32
    %c0_i32_1 = arith.constant 0 : i32
    return %c0_i32, %c0_i32_0 : i32, i32
  }
}

</mosaic_0001>

<bundles_post_ra>
// kernel: vit_forward.1
= control target key start
LH: loop header
LB: loop body
LE: loop exit
PB: predicated region body
PF: predicated region fallthrough
CT: control target
= control target key end

     0   :  { %s3362_s0 = inlined_call_operand.vmem [shape: f32[8,192], index: 0, kind: input, shape index: {}]   ;;  %s3363_s1 = inlined_call_operand.vmem [shape: f32[192,32], index: 1, kind: input, shape index: {}]   ;;  %s3364_s2 = inlined_call_operand.vmem [shape: f32[1,32], index: 2, kind: input, shape index: {}]   ;;  %s3365_s3 = inlined_call_operand.vmem [shape: f32[1,32], index: 3, kind: input, shape index: {}]   ;;  %s3366_s4 = inlined_call_operand.vmem [shape: f32[8,32], index: 4, kind: input, shape index: {}]   ;;  %s3367_s5 = inlined_call_operand.vmem [shape: f32[1,8], index: 5, kind: input, shape index: {}]   ;;  %s3368_s6 = inlined_call_operand.vmem [shape: f32[2,1,32], index: 6, kind: input, shape index: {}]   ;;  %s3369_s7 = inlined_call_operand.vmem [shape: f32[2,1,32], index: 7, kind: input, shape index: {}]   ;;  %s3370_s8 = inlined_call_operand.vmem [shape: f32[2,32,32], index: 8, kind: input, shape index: {}]   ;;  %s3371_s9 = inlined_call_operand.vmem [shape: f32[2,1,32], index: 9, kind: input, shape index: {}]   ;;  %s3372_s10 = inlined_call_operand.vmem [shape: f32[2,32,32], index: 10, kind: input, shape index: {}]   ;;  %s3373_s11 = inlined_call_operand.vmem [shape: f32[2,1,32], index: 11, kind: input, shape index: {}]   ;;  %s3374_s12 = inlined_call_operand.vmem [shape: f32[2,32,32], index: 12, kind: input, shape index: {}]   ;;  %s3375_s13 = inlined_call_operand.vmem [shape: f32[2,1,32], index: 13, kind: input, shape index: {}]   ;;  %s3376_s14 = inlined_call_operand.vmem [shape: f32[2,32,32], index: 14, kind: input, shape index: {}]   ;;  %s3377_s15 = inlined_call_operand.vmem [shape: f32[2,1,32], index: 15, kind: input, shape index: {}]   ;;  %s3378_s16 = inlined_call_operand.vmem [shape: f32[2,1,32], index: 16, kind: input, shape index: {}]   ;;  %s3379_s17 = inlined_call_operand.vmem [shape: f32[2,1,32], index: 17, kind: input, shape index: {}]   ;;  %s3380_s18 = inlined_call_operand.vmem [shape: f32[2,32,64], index: 18, kind: input, shape index: {}]   ;;  %s3381_s19 = inlined_call_operand.vmem [shape: f32[2,1,64], index: 19, kind: input, shape index: {}]   ;;  %s3382_s20 = inlined_call_operand.vmem [shape: f32[2,64,32], index: 20, kind: input, shape index: {}]   ;;  %s3383_s21 = inlined_call_operand.vmem [shape: f32[2,1,32], index: 21, kind: input, shape index: {}]   ;;  %s3384_s22 = inlined_call_operand.vmem [shape: f32[1,32], index: 22, kind: input, shape index: {}]   ;;  %s3385_s23 = inlined_call_operand.vmem [shape: f32[1,32], index: 23, kind: input, shape index: {}]   ;;  %s3386_s24 = inlined_call_operand.vmem [shape: f32[32,128], index: 24, kind: input, shape index: {}]   ;;  %s3387_s25 = inlined_call_operand.vmem [shape: f32[1,128], index: 25, kind: input, shape index: {}]   ;;  %s3388_s26 = inlined_call_operand.hbm [shape: f32[2,128], index: 26, kind: output, shape index: {}]  }
   0x1   :  { %3404 = sst [smem:[#allocation6_spill]] %s3362_s0 }
   0x2   :  { %3405 = sst [smem:[#allocation7_spill]] %s3363_s1 }
   0x3   :  { %3406 = sst [smem:[#allocation8_spill]] %s3364_s2 }
   0x4   :  { %3407 = sst [smem:[#allocation9_spill]] %s3365_s3 }
   0x5   :  { %3408 = sst [smem:[#allocation10_spill]] %s3366_s4 }
   0x6   :  { %3409 = sst [smem:[#allocation11_spill]] %s3367_s5 }
   0x7   :  { %3410 = sst [smem:[#allocation12_spill]] %s3368_s6 }
   0x8   :  { %3411 = sst [smem:[#allocation13_spill]] %s3369_s7 }
   0x9   :  { %3412 = sst [smem:[#allocation14_spill]] %s3370_s8 }
   0xa   :  { %3413 = sst [smem:[#allocation15_spill]] %s3371_s9 }
   0xb   :  { %3414 = sst [smem:[#allocation16_spill]] %s3372_s10 }
   0xc   :  { %3415 = sst [smem:[#allocation17_spill]] %s3388_s26 }
   0xd   :  { %s3416_s7 = sld [smem:[#allocation7_spill]]  ;;  %vm114_vm0 = vcmask 523264  }
   0xe   :  { %s3417_s5 = sld [smem:[#allocation6_spill]] }
  0x13   :  { %v101_v0 = vld [vmem:[%s3416_s7 + $0x78] sm:$0xff]  ;;  %v100_v1 = vld [vmem:[%s3416_s7 + $0x70] sm:$0xff]  ;;  %v99_v2 = vld [vmem:[%s3416_s7 + $0x68] sm:$0xff] }
  0x14   :  { %118 = vmatpush.msra.mxu0 %v101_v0  ;;  %v109_v3 = vld [vmem:[%s3416_s7 + $0xb8] sm:$0xff]  ;;  %v98_v4 = vld [vmem:[%s3416_s7 + $0x60] sm:$0xff]  ;;  %v108_v5 = vld [vmem:[%s3416_s7 + $0xb0] sm:$0xff] }
  0x15   :  { %146 = vmatpush.msra.mxu1 %v109_v3  ;;  %v107_v6 = vld [vmem:[%s3416_s7 + $0xa8] sm:$0xff]  ;;  %v97_v7 = vld [vmem:[%s3416_s7 + $0x58] sm:$0xff]  ;;  %v96_v8 = vld [vmem:[%s3416_s7 + $0x50] sm:$0xff] }
  0x16   :  { %119 = vmatpush.msra.mxu0 %v100_v1  ;;  %v106_v9 = vld [vmem:[%s3416_s7 + $0xa0] sm:$0xff]  ;;  %v95_v10 = vld [vmem:[%s3416_s7 + $0x48] sm:$0xff]  ;;  %v105_v11 = vld [vmem:[%s3416_s7 + $0x98] sm:$0xff] }
  0x17   :  { %147 = vmatpush.msra.mxu1 %v108_v5  ;;  %v104_v12 = vld [vmem:[%s3416_s7 + $0x90] sm:$0xff]  ;;  %v94_v13 = vld [vmem:[%s3416_s7 + $0x40] sm:$0xff]  ;;  %v103_v14 = vld [vmem:[%s3416_s7 + $0x88] sm:$0xff] }
  0x18   :  { %120 = vmatpush.msra.mxu0 %v99_v2  ;;  %v93_v15 = vld [vmem:[%s3416_s7 + $0x38] sm:$0xff]  ;;  %v102_v16 = vld [vmem:[%s3416_s7 + $0x80] sm:$0xff]  ;;  %v92_v17 = vld [vmem:[%s3416_s7 + $0x30] sm:$0xff] }
  0x19   :  { %148 = vmatpush.msra.mxu1 %v107_v6  ;;  %v85_v18 = vld [vmem:[%s3417_s5 + $0x8] sm:$0xff] }
  0x1a   :  { %121 = vmatpush.msra.mxu0 %v98_v4 }
  0x1b   :  { %149 = vmatpush.msra.mxu1 %v106_v9 }
  0x1c   :  { %122 = vmatpush.msra.mxu0 %v97_v7 }
  0x1d   :  { %150 = vmatpush.msra.mxu1 %v105_v11 }
  0x1e   :  { %123 = vmatpush.msra.mxu0 %v96_v8 }
  0x1f   :  { %151 = vmatpush.msra.mxu1 %v104_v12 }
  0x20   :  { %124 = vmatpush.msra.mxu0 %v95_v10 }
  0x21   :  { %152 = vmatpush.msra.mxu1 %v103_v14 }
  0x22   :  { %125 = vmatpush.msra.mxu0 %v94_v13 }
  0x24   :  { %126 = vmatpush.msra.mxu0 %v93_v15 }
  0x25   :  { %31 = vsyncpa [#allocation4], 0  ;;  %v91_v19 = vld [vmem:[%s3416_s7 + $0x28] sm:$0xff]  ;;  %153 = vmatpush.msra.mxu1 %v102_v16  ;;  %v90_v20 = vld [vmem:[%s3416_s7 + $0x20] sm:$0xff]  ;;  %vm158_vm1 = vcmask 261120   ;;  %s3418_s27 = sld [smem:[#allocation9_spill]] }
  0x26   :  { %127 = vmatpush.msra.mxu0 %v92_v17  ;;  %2257 = vmatmul.msk.f32.vlgmr.msra.gmra.mxu1 %vm114_vm0, %v85_v18  ;;  %v89_v21 = vld [vmem:[%s3416_s7 + $0x18] sm:$0xff]  ;;  %v88_v22 = vld [vmem:[%s3416_s7 + $0x10] sm:$0xff]  ;;  %v87_v23 = vld [vmem:[%s3416_s7 + $0x8] sm:$0xff]  ;;  %s3419_s8 = sld [smem:[#allocation10_spill]]  ;;  %v2536_v28 = vmov 0.0   ;;  %vm165_vm2 = vcmask 253952  }
  0x27   :  { %v86_v24 = vld [vmem:[%s3416_s7] sm:$0xff]  ;;  %159 = vst.msk [vmem:[#allocation2] sm:$0xff] %vm158_vm1, %v2536_v28  ;;  %s3420_s4 = sld [smem:[#allocation8_spill]]  ;;  %vm168_vm3 = vcmask 257024   ;;  %vm175_vm4 = vcmask 261124   ;;  %v2537_v43 = vmov 32.0  }
  0x28   :  { %128 = vmatpush.msra.mxu0 %v91_v19  ;;  %v84_v25 = vld [vmem:[%s3417_s5] sm:$0xff]  ;;  %160 = vst.msk [vmem:[#allocation2 + $0x8] sm:$0xff] %vm158_vm1, %v2536_v28  ;;  %2417 = vrcp.f32 %v2537_v43  ;;  %s3421_s2 = sld [smem:[#allocation14_spill]]  ;;  %v314_v62 = vld [vmem:[%s3374_s12 + $0x18] sm:$0xff]  ;;  %v313_v1 = vld [vmem:[%s3374_s12 + $0x10] sm:$0xff]  ;;  %vm346_vm12 = vcmask 64512  }
  0x29   :  { %s3422_s1 = sld [smem:[#allocation16_spill]]  ;;  %331 = vmatpush.msrb.mxu1 %v314_v62  ;;  %v312_v4 = vld [vmem:[%s3374_s12 + $0x8] sm:$0xff]  ;;  %v311_v7 = vld [vmem:[%s3374_s12] sm:$0xff]  ;;  %s3402_s29 = smov 120  }
  0x2a   :  { %129 = vmatpush.msra.mxu0 %v90_v20  ;;  %s3423_s9 = sld [smem:[#allocation12_spill]]  ;;  %s3398_s3 = smov 104  }
  0x2b   :  { %v161_v26 = vld [vmem:[%s3418_s27] sm:$0x1]  ;;  %332 = vmatpush.msrb.mxu1 %v313_v1  ;;  %s3424_s6 = sld [smem:[#allocation13_spill]]  ;;  %s3400_s27 = smov 112  }
  0x2c   :  { %130 = vmatpush.msra.mxu0 %v89_v21  ;;  %v162_v27 = vld [vmem:[%s3419_s8] sm:$0x1]  ;;  %v164_v31 = vld [vmem:[%s3419_s8 + $0x1] sm:$0xf]  ;;  %s3426_s10 = sld [smem:[#allocation11_spill]] }
  0x2d   :  { %v163_v29 = vadd.f32 %v162_v27, %v161_v26  ;;  %v2392_v30 = vld [vmem:[%s3420_s4] ss:$0 sm:$0xff]  ;;  %v172_v35 = vrot.slane %v164_v31, 4  ;;  %333 = vmatpush.msrb.mxu1 %v312_v4  ;;  %s3425_s4 = sld [smem:[#allocation15_spill]] }
  0x2e   :  { %131 = vmatpush.msra.mxu0 %v88_v22  ;;  %v2418_v44 = vpop.eup %2417  ;;  %v246_v60 = vld [vmem:[%s3421_s2 + $0x18] sm:$0xff]  ;;  %v245_v63 = vld [vmem:[%s3421_s2 + $0x10] sm:$0xff]  ;;  %v244_v2 = vld [vmem:[%s3421_s2 + $0x8] sm:$0xff]  ;;  %s3430_s0 = sld [smem:[#allocation17_spill]] }
  0x2f   :  { %166 = vst.msk [vmem:[#allocation2] sm:$0x1] %vm165_vm2, %v163_v29  ;;  %v189_v45 = vmul.f32 32.0, %v2418_v44  ;;  %vm193_vm5 = vweird.f32 %v2418_v44  ;;  %v283_v61 = vld [vmem:[%s3422_s1 + $0x18] sm:$0xff]  ;;  %269 = vmatpush.msra.mxu2 %v246_v60  ;;  %v282_v0 = vld [vmem:[%s3422_s1 + $0x10] sm:$0xff]  ;;  %v281_v3 = vld [vmem:[%s3422_s1 + $0x8] sm:$0xff]  ;;  %334 = vmatpush.msrb.mxu1 %v311_v7 }
  0x30   :  { %132 = vmatpush.msra.mxu0 %v87_v23  ;;  %170 = vst.msk [vmem:[#allocation2 + $0x8] sm:$0x1] %vm165_vm2, %v163_v29  ;;  %300 = vmatpush.msra.mxu3 %v283_v61  ;;  %v243_v5 = vld [vmem:[%s3421_s2] sm:$0xff] }
  0x31   :  { %v190_v46 = vsub.f32 1.0, %v189_v45  ;;  %270 = vmatpush.msra.mxu2 %v245_v63  ;;  %v280_v6 = vld [vmem:[%s3422_s1] sm:$0xff] }
  0x32   :  { %133 = vmatpush.msra.mxu0 %v86_v24  ;;  %301 = vmatpush.msra.mxu3 %v282_v0  ;;  %v2393_v22 = vld [vmem:[%s3423_s9] ss:$0 sm:$0xff] }
  0x33   :  { %134 = vmatmul.f32.vlgmr.msra.gmra.mxu0 %v84_v25  ;;  %v191_v47 = vmul.f32 %v2418_v44, %v190_v46  ;;  %271 = vmatpush.msra.mxu2 %v244_v2  ;;  %v2394_v26 = vld [vmem:[%s3424_s6] ss:$0 sm:$0xff] }
  0x34   :  { %302 = vmatpush.msra.mxu3 %v281_v3 }
  0x35   :  { %v192_v48 = vadd.f32 %v2418_v44, %v191_v47  ;;  %272 = vmatpush.msra.mxu2 %v243_v5 }
  0x36   :  { %303 = vmatpush.msra.mxu3 %v280_v6 }
  0x37   :  { %v2778_v49 = vsel %vm193_vm5, %v2418_v44, %v192_v48 }
  0xa3   :  { %v155_v33 = vpop.f32.mrf.mxu1 }
  0xb0   :  { %v135_v32 = vpop.f32.mrf.mxu0 }
  0xb1   :  { %v136_v34 = vadd.f32 %v2392_v30, %v135_v32 }
  0xb3   :  { %v156_v36 = vadd.f32 %v155_v33, %v136_v34 }
  0xb5   :  { %v167_v37 = vadd.f32 %v164_v31, %v156_v36  ;;  %v174_v38 = vadd.f32 %v172_v35, %v156_v36 }
  0xb7   :  { %169 = vst.msk [vmem:[#allocation2 + $0x1] sm:$0xf] %vm168_vm3, %v167_v37  ;;  %v2397_v37 = vld [vmem:[%s3373_s11] ss:$0 sm:$0xff] }
  0xb8   :  { %176 = vst.msk [vmem:[#allocation2 + $0x5] sm:$0xf0] %vm175_vm4, %v174_v38  ;;  %v2395_v38 = vld [vmem:[%s3375_s13] ss:$0 sm:$0xff] }
  0xbe   :  { %v2770_v39 = vld [vmem:[#allocation2] sm:$0xff] }
  0xbf   :  { %v182_v40 = vsel %vm158_vm1, %v2770_v39, 0.0  ;;  %v2774_v41 = vld [vmem:[#allocation2 + $0x8] sm:$0xff] }
  0xc0   :  { %183 = vadd.xlane.f32.xlu0 %v182_v40  ;;  %v185_v42 = vsel %vm158_vm1, %v2774_v41, 0.0  ;;  %v2396_v40 = vld [vmem:[%s3425_s4] ss:$0 sm:$0xff] }
  0xc8   :  { %186 = vadd.xlane.f32.xlu0 %v185_v42 }
 0x133   :  { %v184_v50 = vpop.xlane.xlu0 %183 }
 0x134   :  { %v195_v51 = vmul.f32 %v2778_v49, %v184_v50 }
 0x136   :  { %v197_v52 = vsub.f32 %v2770_v39, %v195_v51 }
 0x138   :  { %v199_v53 = vmul.f32 %v197_v52, %v197_v52 }
 0x13a   :  { %v201_v54 = vsel %vm158_vm1, %v199_v53, 0.0 }
 0x13b   :  { %202 = vadd.xlane.f32.xlu1 %v201_v54  ;;  %v187_v55 = vpop.xlane.xlu0 %186 }
 0x13c   :  { %v196_v56 = vmul.f32 %v2778_v49, %v187_v55 }
 0x13e   :  { %v2785_v57 = vsub.f32 %v2774_v41, %v196_v56 }
 0x140   :  { %v200_v58 = vmul.f32 %v2785_v57, %v2785_v57 }
 0x142   :  { %v204_v59 = vsel %vm158_vm1, %v200_v58, 0.0  ;;  %v2883_v58 = vld [vmem:[%s3426_s10] ss:$0 sm:$0xff] }
 0x143   :  { %205 = vadd.xlane.f32.xlu1 %v204_v59 }
 0x1ae   :  { %v203_v8 = vpop.xlane.xlu1 %202 }
 0x1af   :  { %v207_v9 = vmul.f32 %v203_v8, %v2778_v49 }
 0x1b1   :  { %v209_v10 = vadd.f32 1e-12, %v207_v9 }
 0x1b3   :  { %2419 = vrsqrt.f32 %v209_v10  ;;  %vm217_vm7 = vweird.f32 %v209_v10 }
 0x1b6   :  { %v206_v11 = vpop.xlane.xlu1 %205 }
 0x1b7   :  { %v208_v12 = vmul.f32 %v206_v11, %v2778_v49 }
 0x1b9   :  { %v2420_v13 = vpop.eup %2419  ;;  %v210_v14 = vadd.f32 1e-12, %v208_v12 }
 0x1ba   :  { %v212_v15 = vmul.f32 %v2420_v13, %v209_v10  ;;  %vm218_vm6 = vweird.f32 %v2420_v13 }
 0x1bb   :  { %2421 = vrsqrt.f32 %v210_v14  ;;  %vm219_vm8 = vmor %vm217_vm7, %vm218_vm6  ;;  %vm227_vm10 = vweird.f32 %v210_v14 }
 0x1bc   :  { %v213_v16 = vmul.f32 %v2420_v13, %v212_v15 }
 0x1be   :  { %v214_v17 = vmul.f32 0.5, %v213_v16 }
 0x1c0   :  { %v215_v18 = vsub.f32 1.5, %v214_v17 }
 0x1c1   :  { %v2422_v19 = vpop.eup %2421 }
 0x1c2   :  { %v216_v20 = vmul.f32 %v2420_v13, %v215_v18  ;;  %v222_v21 = vmul.f32 %v2422_v19, %v210_v14  ;;  %vm228_vm9 = vweird.f32 %v2422_v19 }
 0x1c3   :  { %vm229_vm11 = vmor %vm227_vm10, %vm228_vm9 }
 0x1c4   :  { %v220_v23 = vsel %vm219_vm8, %v2420_v13, %v216_v20  ;;  %v223_v24 = vmul.f32 %v2422_v19, %v222_v21 }
 0x1c5   :  { %v231_v25 = vmul.f32 %v220_v23, %v197_v52 }
 0x1c6   :  { %v224_v27 = vmul.f32 0.5, %v223_v24 }
 0x1c7   :  { %v236_v28 = vmul.f32 %v2393_v22, %v231_v25 }
 0x1c8   :  { %v225_v29 = vsub.f32 1.5, %v224_v27  ;;  %v342_v27 = vld [vmem:[%s3376_s14] sm:$0xff] }
 0x1c9   :  { %v241_v30 = vadd.f32 %v2394_v26, %v236_v28 }
 0x1ca   :  { %v226_v31 = vmul.f32 %v2422_v19, %v225_v29 }
 0x1cb   :  { %2258 = vmatmul.msk.f32.vlgmr.msra.gmra.mxu2 %vm158_vm1, %v241_v30  ;;  %2260 = vmatmul.msk.f32.vlgmr.msra.gmra.mxu3 %vm158_vm1, %v241_v30 }
 0x1cc   :  { %v230_v32 = vsel %vm229_vm11, %v2422_v19, %v226_v31  ;;  %2262 = vmatmul.msk.f32.vlgmr.msrb.gmra.mxu1 %vm158_vm1, %v241_v30 }
 0x1cd   :  { %v232_v33 = vmul.f32 %v230_v32, %v2785_v57 }
 0x1cf   :  { %v237_v34 = vmul.f32 %v2393_v22, %v232_v33 }
 0x1d1   :  { %v242_v35 = vadd.f32 %v2394_v26, %v237_v34 }
 0x1d3   :  { %2259 = vmatmul.msk.f32.gmra.mxu2 %vm158_vm1, %v242_v35  ;;  %2261 = vmatmul.msk.f32.gmra.mxu3 %vm158_vm1, %v242_v35 }
 0x1d4   :  { %2263 = vmatmul.msk.f32.gmra.mxu1 %vm158_vm1, %v242_v35 }
 0x249   :  { %v336_v36 = vpop.f32.mrf.mxu1 }
 0x24a   :  { %v2852_v45 = vadd.f32 %v2395_v38, %v336_v36 }
 0x24e   :  { %v274_v42 = vpop.f32.mrf.mxu2  ;;  %v305_v43 = vpop.f32.mrf.mxu3 }
 0x24f   :  { %v2850_v44 = vadd.f32 %v2397_v37, %v305_v43  ;;  %v2858_v46 = vadd.f32 %v2396_v40, %v274_v42 }
 0x251   :  { %476 = vrot.lane.b32.xlu2 %v2850_v44, %s3402_s29  ;;  %2264 = vmatpush.xpose.msk.msrb.mxu2 %vm346_vm12, %v2850_v44  ;;  %v339_v47 = vpop.f32.mrf.mxu1 }
 0x252   :  { %v2865_v53 = vadd.f32 %v2395_v38, %v339_v47 }
 0x254   :  { %2265 = vmatmul.msk.f32.vlgmr.msrb.gmra.mxu2 %vm346_vm12, %v2858_v46 }
 0x255   :  { %446 = vmatpush.msra.mxu2 %v2852_v45 }
 0x256   :  { %v277_v48 = vpop.f32.mrf.mxu2  ;;  %v308_v50 = vpop.f32.mrf.mxu3 }
 0x257   :  { %v2863_v51 = vadd.f32 %v2396_v40, %v277_v48  ;;  %v309_v52 = vadd.f32 %v2397_v37, %v308_v50 }
 0x259   :  { %474 = vrot.lane.b32.xlu2 %v2858_v46, %s3402_s29  ;;  %504 = vrot.lane.b32.xlu0 %v309_v52, %s3402_s29 }
 0x25a   :  { %2266 = vmatpush.xpose.msk.msrb.mxu3 %vm346_vm12, %v309_v52  ;;  %502 = vrot.lane.b32.xlu1 %v2863_v51, %s3402_s29 }
 0x25d   :  { %2267 = vmatmul.msk.f32.vlgmr.msrb.gmra.mxu3 %vm346_vm12, %v2863_v51 }
 0x25e   :  { %469 = vmatpush.msra.mxu3 %v2865_v53 }
 0x2ab   :  { %v477_v54 = vpop.permute.xlu2 %476 }
 0x2ac   :  { %2270 = vmatpush.xpose.msk.msrb.mxu0 %vm346_vm12, %v477_v54 }
 0x2b3   :  { %v475_v55 = vpop.permute.xlu2 %474 }
 0x2b4   :  { %2271 = vmatmul.msk.f32.vlgmr.msrb.gmra.mxu0 %vm346_vm12, %v475_v55 }
 0x2cb   :  { %v505_v56 = vpop.permute.xlu0 %504 }
 0x2cc   :  { %2272 = vmatpush.xpose.msk.msra.mxu1 %vm346_vm12, %v505_v56  ;;  %v503_v57 = vpop.permute.xlu1 %502 }
 0x2cf   :  { %2273 = vmatmul.msk.f32.vlgmr.msra.gmra.mxu1 %vm346_vm12, %v503_v57 }
 0x2d0   :  { %660 = vmatpush.msrb.mxu1 %v342_v27 }
 0x2d7   :  { %v370_v59 = vpop.f32.mrf.mxu2 }
 0x2d8   :  { %v399_v60 = vmul.f32 0.35355338, %v370_v59 }
 0x2da   :  { %v404_v61 = vadd.f32 %v2883_v58, %v399_v60  ;;  %v343_v60 = vld [vmem:[%s3376_s14 + $0x8] sm:$0xff] }
 0x2db   :  { %631 = vmatpush.msra.mxu0 %v343_v60 }
 0x2dc   :  { %v406_v62 = vsel %vm346_vm12, %v404_v61, -inf }
 0x2dd   :  { %407 = vmax.xlane.f32.xlu2 %v406_v62 }
 0x2e0   :  { %v396_v63 = vpop.f32.mrf.mxu3 }
 0x2e1   :  { %v400_v0 = vmul.f32 0.35355338, %v396_v63 }
 0x2e3   :  { %v405_v1 = vadd.f32 %v2883_v58, %v400_v0 }
 0x2e5   :  { %v409_v2 = vsel %vm346_vm12, %v405_v1, -inf }
 0x2e6   :  { %410 = vmax.xlane.f32.xlu0 %v409_v2 }
 0x2fa   :  { %557 = vrot.lane.b32.xlu0 %v2852_v45, %s3402_s29 }
 0x331   :  { %v499_v3 = vpop.f32.mrf.mxu0 }
 0x332   :  { %v530_v4 = vmul.f32 0.35355338, %v499_v3 }
 0x334   :  { %v532_v5 = vadd.f32 %v2883_v58, %v530_v4 }
 0x336   :  { %v534_v6 = vsel %vm346_vm12, %v532_v5, -inf }
 0x337   :  { %535 = vmax.xlane.f32.xlu1 %v534_v6 }
 0x34c   :  { %v527_v7 = vpop.f32.mrf.mxu1 }
 0x34d   :  { %v531_v8 = vmul.f32 0.35355338, %v527_v7 }
 0x34f   :  { %v533_v9 = vadd.f32 %v2883_v58, %v531_v8 }
 0x350   :  { %v408_v10 = vpop.xlane.xlu2 %407  ;;  %668 = vrot.lane.b32.xlu1 %v2858_v46, %s3400_s27 }
 0x351   :  { %v412_v11 = vsub.f32 %v404_v61, %v408_v10  ;;  %v537_v12 = vsel %vm346_vm12, %v533_v9, -inf }
 0x352   :  { %538 = vmax.xlane.f32.xlu0 %v537_v12 }
 0x353   :  { %v414_v13 = vmul.f32 1.442695, %v412_v11 }
 0x355   :  { %2423 = vpow2.f32 %v414_v13 }
 0x358   :  { %584 = vrot.lane.b32.xlu1 %v2865_v53, %s3402_s29 }
 0x359   :  { %v411_v14 = vpop.xlane.xlu0 %410 }
 0x35a   :  { %v413_v15 = vsub.f32 %v405_v1, %v411_v14 }
 0x35b   :  { %v2424_v16 = vpop.eup %2423 }
 0x35c   :  { %v416_v17 = vmul.f32 1.442695, %v413_v15  ;;  %v418_v18 = vsel %vm346_vm12, %v2424_v16, 0.0 }
 0x35d   :  { %419 = vadd.xlane.f32.xlu2 %v418_v18 }
 0x35e   :  { %2425 = vpow2.f32 %v416_v17 }
 0x360   :  { %698 = vrot.lane.b32.xlu1 %v309_v52, %s3400_s27 }
 0x364   :  { %v2426_v19 = vpop.eup %2425 }
 0x365   :  { %v421_v20 = vsel %vm346_vm12, %v2426_v19, 0.0 }
 0x366   :  { %422 = vadd.xlane.f32.xlu2 %v421_v20  ;;  %833 = vrot.lane.b32.xlu0 %v2858_v46, %s3398_s3 }
 0x368   :  { %696 = vrot.lane.b32.xlu1 %v2863_v51, %s3400_s27 }
 0x36c   :  { %v558_v21 = vpop.permute.xlu0 %557 }
 0x36d   :  { %578 = vmatpush.msrb.mxu2 %v558_v21 }
 0x36e   :  { %863 = vrot.lane.b32.xlu0 %v309_v52, %s3398_s3 }
 0x370   :  { %835 = vrot.lane.b32.xlu1 %v2850_v44, %s3398_s3 }
 0x376   :  { %861 = vrot.lane.b32.xlu0 %v2863_v51, %s3398_s3 }
 0x3aa   :  { %v536_v22 = vpop.xlane.xlu1 %535 }
 0x3ab   :  { %v540_v23 = vsub.f32 %v532_v5, %v536_v22 }
 0x3ad   :  { %v542_v24 = vmul.f32 1.442695, %v540_v23 }
 0x3af   :  { %2427 = vpow2.f32 %v542_v24 }
 0x3b5   :  { %v2428_v25 = vpop.eup %2427 }
 0x3b6   :  { %v546_v26 = vsel %vm346_vm12, %v2428_v25, 0.0 }
 0x3b7   :  { %547 = vadd.xlane.f32.xlu2 %v546_v26 }
 0x3c2   :  { %v669_v28 = vpop.permute.xlu1 %668 }
 0x3c5   :  { %v539_v40 = vpop.xlane.xlu0 %538 }
 0x3c6   :  { %v541_v42 = vsub.f32 %v533_v9, %v539_v40 }
 0x3c8   :  { %v544_v43 = vmul.f32 1.442695, %v541_v42 }
 0x3ca   :  { %v585_v29 = vpop.permute.xlu1 %584 }
 0x3cb   :  { %605 = vmatpush.msrb.mxu3 %v585_v29 }
 0x3cf   :  { %670 = vrot.lane.b32.xlu2 %v2850_v44, %s3400_s27 }
 0x3d0   :  { %v420_v30 = vpop.xlane.xlu2 %419 }
 0x3d1   :  { %2429 = vrcp.f32 %v420_v30 }
 0x3d2   :  { %v699_v31 = vpop.permute.xlu1 %698 }
 0x3d7   :  { %v2430_v32 = vpop.eup %2429 }
 0x3d8   :  { %v426_v33 = vmul.f32 %v2430_v32, %v2424_v16  ;;  %v834_v56 = vpop.permute.xlu0 %833 }
 0x3d9   :  { %v423_v34 = vpop.xlane.xlu2 %422 }
 0x3da   :  { %2431 = vrcp.f32 %v423_v34  ;;  %2268 = vmatmul.msk.f32.vlgmr.msra.gmra.mxu2 %vm346_vm12, %v426_v33  ;;  %v697_v35 = vpop.permute.xlu1 %696  ;;  %v344_v33 = vld [vmem:[%s3376_s14 + $0x10] sm:$0xff] }
 0x3db   :  { %2433 = vpow2.f32 %v544_v43  ;;  %823 = vmatpush.msrb.mxu0 %v344_v33 }
 0x3e0   :  { %v2432_v36 = vpop.eup %2431  ;;  %v864_v13 = vpop.permute.xlu0 %863 }
 0x3e1   :  { %v427_v37 = vmul.f32 %v2432_v36, %v2426_v19  ;;  %v2434_v44 = vpop.eup %2433 }
 0x3e2   :  { %v836_v38 = vpop.permute.xlu1 %835  ;;  %v549_v46 = vsel %vm346_vm12, %v2434_v44, 0.0 }
 0x3e3   :  { %2269 = vmatmul.msk.f32.vlgmr.msra.gmra.mxu3 %vm346_vm12, %v427_v37  ;;  %2288 = vmatpush.xpose.msk.msra.mxu1 %vm346_vm12, %v836_v38 }
 0x3e4   :  { %2282 = vmatpush.xpose.msk.msra.mxu3 %vm346_vm12, %v699_v31 }
 0x3e8   :  { %v862_v15 = vpop.permute.xlu0 %861 }
 0x3f8   :  { %550 = vadd.xlane.f32.xlu2 %v549_v46 }
 0x42a   :  { %v548_v47 = vpop.xlane.xlu2 %547 }
 0x42b   :  { %2435 = vrcp.f32 %v548_v47 }
 0x431   :  { %v2436_v48 = vpop.eup %2435 }
 0x432   :  { %v554_v50 = vmul.f32 %v2436_v48, %v2428_v25  ;;  %v671_v51 = vpop.permute.xlu2 %670 }
 0x433   :  { %2280 = vmatpush.xpose.msk.msra.mxu2 %vm346_vm12, %v671_v51 }
 0x434   :  { %2274 = vmatmul.msk.f32.vlgmr.msrb.gmra.mxu2 %vm346_vm12, %v554_v50 }
 0x43c   :  { %2281 = vmatmul.msk.f32.vlgmr.msra.gmra.mxu2 %vm346_vm12, %v669_v28 }
 0x45d   :  { %v448_v52 = vpop.f32.mrf.mxu2 }
 0x45e   :  { %2278 = vmatmul.msk.f32.vlgmr.msrb.gmra.mxu1 %vm346_vm12, %v448_v52 }
 0x466   :  { %v471_v54 = vpop.f32.mrf.mxu3 }
 0x467   :  { %2279 = vmatmul.msk.f32.gmra.mxu1 %vm346_vm12, %v471_v54 }
 0x46b   :  { %v551_v55 = vpop.xlane.xlu2 %550 }
 0x46c   :  { %2437 = vrcp.f32 %v551_v55 }
 0x46f   :  { %2289 = vmatmul.msk.f32.vlgmr.msra.gmra.mxu1 %vm346_vm12, %v834_v56 }
 0x472   :  { %v2438_v57 = vpop.eup %2437 }
 0x473   :  { %v555_v59 = vmul.f32 %v2438_v57, %v2434_v44  ;;  %v345_v57 = vld [vmem:[%s3376_s14 + $0x18] sm:$0xff] }
 0x475   :  { %2275 = vmatmul.msk.f32.vlgmr.msrb.gmra.mxu3 %vm346_vm12, %v555_v59 }
 0x47d   :  { %2283 = vmatmul.msk.f32.vlgmr.msra.gmra.mxu3 %vm346_vm12, %v697_v35 }
 0x4b7   :  { %v580_v61 = vpop.f32.mrf.mxu2 }
 0x4b8   :  { %2276 = vmatmul.msk.f32.vlgmr.msra.gmra.mxu0 %vm346_vm12, %v580_v61 }
 0x4bf   :  { %v693_v62 = vpop.f32.mrf.mxu2 }
 0x4c0   :  { %v724_v63 = vmul.f32 0.35355338, %v693_v62 }
 0x4c2   :  { %v726_v0 = vadd.f32 %v2883_v58, %v724_v63 }
 0x4c4   :  { %v728_v1 = vsel %vm346_vm12, %v726_v0, -inf }
 0x4c5   :  { %729 = vmax.xlane.f32.xlu1 %v728_v1 }
 0x4db   :  { %v2944_v12 = vpop.f32.mrf.mxu1 }
 0x4e4   :  { %v2946_v14 = vpop.f32.mrf.mxu1 }
 0x4ec   :  { %v858_v17 = vpop.f32.mrf.mxu1 }
 0x4ed   :  { %v889_v20 = vmul.f32 0.35355338, %v858_v17 }
 0x4ef   :  { %v891_v21 = vadd.f32 %v2883_v58, %v889_v20 }
 0x4f1   :  { %v893_v23 = vsel %vm346_vm12, %v891_v21, -inf }
 0x4f8   :  { %v607_v2 = vpop.f32.mrf.mxu3 }
 0x4f9   :  { %2277 = vmatmul.msk.f32.gmra.mxu0 %vm346_vm12, %v607_v2 }
 0x500   :  { %v721_v3 = vpop.f32.mrf.mxu3 }
 0x501   :  { %v725_v4 = vmul.f32 0.35355338, %v721_v3 }
 0x503   :  { %v727_v5 = vadd.f32 %v2883_v58, %v725_v4 }
 0x505   :  { %v731_v6 = vsel %vm346_vm12, %v727_v5, -inf }
 0x506   :  { %732 = vmax.xlane.f32.xlu0 %v731_v6 }
 0x51a   :  { %915 = vrot.lane.b32.xlu0 %v2852_v45, %s3398_s3 }
 0x538   :  { %v730_v7 = vpop.xlane.xlu1 %729 }
 0x539   :  { %v734_v8 = vsub.f32 %v726_v0, %v730_v7  ;;  %v633_v0 = vpop.f32.mrf.mxu0  ;;  %v2399_v7 = vld [vmem:[%s3377_s15] ss:$0 sm:$0xff] }
 0x53a   :  { %v663_v3 = vadd.f32 %v2944_v12, %v633_v0 }
 0x53b   :  { %v736_v9 = vmul.f32 1.442695, %v734_v8 }
 0x53d   :  { %2439 = vpow2.f32 %v736_v9 }
 0x543   :  { %v2440_v10 = vpop.eup %2439 }
 0x544   :  { %v740_v11 = vsel %vm346_vm12, %v2440_v10, 0.0 }
 0x545   :  { %741 = vadd.xlane.f32.xlu2 %v740_v11 }
 0x55d   :  { %750 = vrot.lane.b32.xlu2 %v2852_v45, %s3400_s27 }
 0x576   :  { %v636_v1 = vpop.f32.mrf.mxu0 }
 0x579   :  { %v733_v16 = vpop.xlane.xlu0 %732 }
 0x57a   :  { %v735_v18 = vsub.f32 %v727_v5, %v733_v16 }
 0x57c   :  { %v738_v19 = vmul.f32 1.442695, %v735_v18 }
 0x57e   :  { %2441 = vpow2.f32 %v738_v19 }
 0x584   :  { %v2442_v22 = vpop.eup %2441 }
 0x585   :  { %v743_v24 = vsel %vm346_vm12, %v2442_v22, 0.0 }
 0x586   :  { %894 = vmax.xlane.f32.xlu2 %v893_v23  ;;  %744 = vadd.xlane.f32.xlu1 %v743_v24 }
 0x58c   :  { %v916_v47 = vpop.permute.xlu0 %915 }
 0x5b8   :  { %v742_v45 = vpop.xlane.xlu2 %741 }
 0x5b9   :  { %2443 = vrcp.f32 %v742_v45  ;;  %v1065_v45 = vld [vmem:[%s3380_s18 + $0x18] sm:$0xff] }
 0x5bf   :  { %v2444_v25 = vpop.eup %2443 }
 0x5c0   :  { %v748_v26 = vmul.f32 %v2444_v25, %v2440_v10  ;;  %v751_v27 = vpop.permute.xlu2 %750  ;;  %v1063_v25 = vld [vmem:[%s3380_s18 + $0x8] sm:$0xff] }
 0x5c1   :  { %771 = vmatpush.msrb.mxu2 %v751_v27 }
 0x5c2   :  { %2284 = vmatmul.msk.f32.vlgmr.msrb.gmra.mxu2 %vm346_vm12, %v748_v26 }
 0x5c3   :  { %2290 = vmatpush.xpose.msk.msra.mxu2 %vm346_vm12, %v864_v13 }
 0x5c7   :  { %988 = vmatpush.msrb.mxu2 %v345_v57  ;;  %v1117_v57 = vld [vmem:[%s3382_s20] sm:$0xff] }
 0x5ca   :  { %2291 = vmatmul.msk.f32.vlgmr.msra.gmra.mxu2 %vm346_vm12, %v862_v15 }
 0x5f9   :  { %v895_v28 = vpop.xlane.xlu2 %894  ;;  %v745_v40 = vpop.xlane.xlu1 %744 }
 0x5fa   :  { %v899_v29 = vsub.f32 %v891_v21, %v895_v28 }
 0x5fc   :  { %v901_v30 = vmul.f32 1.442695, %v899_v29 }
 0x5fe   :  { %2445 = vpow2.f32 %v901_v30 }
 0x5ff   :  { %2447 = vrcp.f32 %v745_v40 }
 0x604   :  { %v2446_v31 = vpop.eup %2445 }
 0x605   :  { %v905_v32 = vsel %vm346_vm12, %v2446_v31, 0.0  ;;  %v2448_v43 = vpop.eup %2447 }
 0x606   :  { %906 = vadd.xlane.f32.xlu1 %v905_v32  ;;  %v749_v44 = vmul.f32 %v2448_v43, %v2442_v22 }
 0x61f   :  { %776 = vrot.lane.b32.xlu1 %v2865_v53, %s3400_s27 }
 0x645   :  { %v773_v34 = vpop.f32.mrf.mxu2 }
 0x646   :  { %2286 = vmatmul.msk.f32.vlgmr.msrb.gmra.mxu0 %vm346_vm12, %v773_v34 }
 0x64d   :  { %v886_v35 = vpop.f32.mrf.mxu2 }
 0x64e   :  { %v890_v36 = vmul.f32 0.35355338, %v886_v35  ;;  %v2400_v35 = vld [vmem:[%s3378_s16] ss:$0 sm:$0xff] }
 0x650   :  { %v892_v37 = vadd.f32 %v2883_v58, %v890_v36 }
 0x652   :  { %v896_v38 = vsel %vm346_vm12, %v892_v37, -inf }
 0x653   :  { %897 = vmax.xlane.f32.xlu2 %v896_v38  ;;  %v2401_v38 = vld [vmem:[%s3379_s17] ss:$0 sm:$0xff] }
 0x66b   :  { %941 = vrot.lane.b32.xlu2 %v2865_v53, %s3398_s3 }
 0x679   :  { %v907_v42 = vpop.xlane.xlu1 %906 }
 0x67a   :  { %2449 = vrcp.f32 %v907_v42 }
 0x680   :  { %v2450_v48 = vpop.eup %2449 }
 0x681   :  { %v913_v50 = vmul.f32 %v2450_v48, %v2446_v31 }
 0x691   :  { %v777_v46 = vpop.permute.xlu1 %776 }
 0x692   :  { %797 = vmatpush.msrb.mxu3 %v777_v46 }
 0x693   :  { %2285 = vmatmul.msk.f32.vlgmr.msrb.gmra.mxu3 %vm346_vm12, %v749_v44 }
 0x694   :  { %936 = vmatpush.msra.mxu3 %v916_v47 }
 0x696   :  { %1088 = vmatpush.msrb.mxu3 %v1065_v45 }
 0x69b   :  { %2292 = vmatmul.msk.f32.vlgmr.msra.gmra.mxu3 %vm346_vm12, %v913_v50  ;;  %v1124_v50 = vld [vmem:[%s3382_s20 + $0x38] sm:$0xff] }
 0x69c   :  { %1139 = vmatpush.msra.mxu0 %v1124_v50  ;;  %v2311_v50 = vld [vmem:[%s3422_s1 + $0x30] sm:$0xff] }
 0x6c3   :  { %v825_v2 = vpop.f32.mrf.mxu0 }
 0x6c4   :  { %v831_v4 = vadd.f32 %v825_v2, %v663_v3 }
 0x6c6   :  { %v898_v51 = vpop.xlane.xlu2 %897 }
 0x6c7   :  { %v900_v52 = vsub.f32 %v892_v37, %v898_v51  ;;  %v1123_v51 = vld [vmem:[%s3382_s20 + $0x30] sm:$0xff] }
 0x6c8   :  { %1140 = vmatpush.msra.mxu0 %v1123_v51  ;;  %v2318_v51 = vld [vmem:[%s3374_s12 + $0x30] sm:$0xff] }
 0x6c9   :  { %v903_v54 = vmul.f32 1.442695, %v900_v52  ;;  %v1122_v52 = vld [vmem:[%s3382_s20 + $0x28] sm:$0xff] }
 0x6ca   :  { %1141 = vmatpush.msra.mxu0 %v1122_v52  ;;  %v2303_v52 = vld [vmem:[%s3421_s2 + $0x28] sm:$0xff] }
 0x6cb   :  { %2451 = vpow2.f32 %v903_v54  ;;  %v1121_v54 = vld [vmem:[%s3382_s20 + $0x20] sm:$0xff] }
 0x6cc   :  { %1142 = vmatpush.msra.mxu0 %v1121_v54  ;;  %v2310_v54 = vld [vmem:[%s3422_s1 + $0x28] sm:$0xff] }
 0x6ce   :  { %v942_v53 = vpop.permute.xlu2 %941 }
 0x6cf   :  { %962 = vmatpush.msrb.mxu1 %v942_v53  ;;  %v1120_v53 = vld [vmem:[%s3382_s20 + $0x18] sm:$0xff] }
 0x6d0   :  { %1143 = vmatpush.msra.mxu0 %v1120_v53  ;;  %v2317_v53 = vld [vmem:[%s3374_s12 + $0x28] sm:$0xff] }
 0x6d1   :  { %v2452_v55 = vpop.eup %2451 }
 0x6d2   :  { %v908_v56 = vsel %vm346_vm12, %v2452_v55, 0.0 }
 0x6d3   :  { %909 = vadd.xlane.f32.xlu1 %v908_v56  ;;  %v1118_v56 = vld [vmem:[%s3382_s20 + $0x8] sm:$0xff] }
 0x716   :  { %v799_v59 = vpop.f32.mrf.mxu3 }
 0x717   :  { %2287 = vmatmul.msk.f32.gmra.mxu0 %vm346_vm12, %v799_v59  ;;  %v2402_v59 = vld [vmem:[%s3381_s19] ss:$0 sm:$0xff] }
 0x71e   :  { %v938_v60 = vpop.f32.mrf.mxu3 }
 0x71f   :  { %2294 = vmatmul.msk.f32.vlgmr.msrb.gmra.mxu2 %vm346_vm12, %v938_v60 }
 0x746   :  { %v910_v61 = vpop.xlane.xlu1 %909 }
 0x747   :  { %2453 = vrcp.f32 %v910_v61 }
 0x74d   :  { %v2454_v62 = vpop.eup %2453 }
 0x74e   :  { %v914_v63 = vmul.f32 %v2454_v62, %v2452_v55  ;;  %v1119_v55 = vld [vmem:[%s3382_s20 + $0x10] sm:$0xff] }
 0x74f   :  { %1144 = vmatpush.msra.mxu0 %v1119_v55  ;;  %v2302_v55 = vld [vmem:[%s3421_s2 + $0x20] sm:$0xff] }
 0x750   :  { %2293 = vmatmul.msk.f32.vlgmr.msrb.gmra.mxu1 %vm346_vm12, %v914_v63 }
 0x751   :  { %1145 = vmatpush.msra.mxu0 %v1118_v56  ;;  %v2309_v56 = vld [vmem:[%s3422_s1 + $0x20] sm:$0xff] }
 0x753   :  { %1146 = vmatpush.msra.mxu0 %v1117_v57  ;;  %v2316_v57 = vld [vmem:[%s3374_s12 + $0x20] sm:$0xff] }
 0x794   :  { %v828_v18 = vpop.f32.mrf.mxu0 }
 0x7a2   :  { %v990_v5 = vpop.f32.mrf.mxu2 }
 0x7a3   :  { %v996_v6 = vadd.f32 %v990_v5, %v831_v4 }
 0x7a5   :  { %v998_v8 = vadd.f32 %v996_v6, %v2770_v39  ;;  %v666_v39 = vadd.f32 %v2946_v14, %v636_v1  ;;  %v1064_v14 = vld [vmem:[%s3380_s18 + $0x10] sm:$0xff] }
 0x7a6   :  { %1089 = vmatpush.msrb.mxu3 %v1064_v14 }
 0x7a7   :  { %v2979_v9 = vadd.f32 %v2399_v7, %v998_v8  ;;  %v832_v19 = vadd.f32 %v828_v18, %v666_v39 }
 0x7a8   :  { %1090 = vmatpush.msrb.mxu3 %v1063_v25 }
 0x7a9   :  { %v1008_v10 = vsel %vm158_vm1, %v2979_v9, 0.0 }
 0x7aa   :  { %1009 = vadd.xlane.f32.xlu0 %v1008_v10 }
 0x7cd   :  { %v964_v11 = vpop.f32.mrf.mxu1 }
 0x7ce   :  { %2295 = vmatmul.msk.f32.gmra.mxu2 %vm346_vm12, %v964_v11 }
 0x81d   :  { %v1010_v13 = vpop.xlane.xlu0 %1009 }
 0x81e   :  { %v1014_v12 = vmul.f32 %v1010_v13, %v2778_v49 }
 0x820   :  { %v1016_v15 = vsub.f32 %v2979_v9, %v1014_v12 }
 0x822   :  { %v1018_v16 = vmul.f32 %v1016_v15, %v1016_v15 }
 0x824   :  { %v1020_v17 = vsel %vm158_vm1, %v1018_v16, 0.0 }
 0x825   :  { %1021 = vadd.xlane.f32.xlu2 %v1020_v17 }
 0x851   :  { %v993_v20 = vpop.f32.mrf.mxu2 }
 0x852   :  { %v997_v21 = vadd.f32 %v993_v20, %v832_v19 }
 0x854   :  { %v999_v22 = vadd.f32 %v997_v21, %v2774_v41  ;;  %v1062_v41 = vld [vmem:[%s3380_s18] sm:$0xff] }
 0x855   :  { %1091 = vmatpush.msrb.mxu3 %v1062_v41  ;;  %v2403_v21 = vld [vmem:[%s3383_s21] ss:$0 sm:$0xff] }
 0x856   :  { %v2989_v23 = vadd.f32 %v2399_v7, %v999_v22 }
 0x858   :  { %v1011_v24 = vsel %vm158_vm1, %v2989_v23, 0.0 }
 0x859   :  { %1012 = vadd.xlane.f32.xlu1 %v1011_v24 }
 0x898   :  { %v1022_v26 = vpop.xlane.xlu2 %1021 }
 0x899   :  { %v1026_v27 = vmul.f32 %v1022_v26, %v2778_v49 }
 0x89b   :  { %v1028_v28 = vadd.f32 1e-12, %v1026_v27 }
 0x89d   :  { %2455 = vrsqrt.f32 %v1028_v28  ;;  %vm1036_vm14 = vweird.f32 %v1028_v28 }
 0x8a3   :  { %v2456_v29 = vpop.eup %2455 }
 0x8a4   :  { %v1031_v30 = vmul.f32 %v2456_v29, %v1028_v28  ;;  %vm1037_vm13 = vweird.f32 %v2456_v29 }
 0x8a5   :  { %vm1038_vm15 = vmor %vm1036_vm14, %vm1037_vm13 }
 0x8a6   :  { %v1032_v31 = vmul.f32 %v2456_v29, %v1031_v30 }
 0x8a8   :  { %v1033_v32 = vmul.f32 0.5, %v1032_v31 }
 0x8aa   :  { %v1034_v33 = vsub.f32 1.5, %v1033_v32 }
 0x8ac   :  { %v1035_v34 = vmul.f32 %v2456_v29, %v1034_v33 }
 0x8ae   :  { %v1039_v36 = vsel %vm1038_vm15, %v2456_v29, %v1035_v34 }
 0x8af   :  { %v1050_v37 = vmul.f32 %v1039_v36, %v1016_v15 }
 0x8b1   :  { %v1055_v40 = vmul.f32 %v2400_v35, %v1050_v37 }
 0x8b3   :  { %v1060_v42 = vadd.f32 %v2401_v38, %v1055_v40 }
 0x8b5   :  { %2296 = vmatmul.msk.f32.vlgmr.msrb.gmra.mxu3 %vm158_vm1, %v1060_v42 }
 0x8cc   :  { %v1013_v43 = vpop.xlane.xlu1 %1012 }
 0x8cd   :  { %v1015_v44 = vmul.f32 %v1013_v43, %v2778_v49 }
 0x8cf   :  { %v1017_v46 = vsub.f32 %v2989_v23, %v1015_v44 }
 0x8d1   :  { %v1019_v47 = vmul.f32 %v1017_v46, %v1017_v46 }
 0x8d3   :  { %v1023_v48 = vsel %vm158_vm1, %v1019_v47, 0.0  ;;  %v2312_v47 = vld [vmem:[%s3422_s1 + $0x38] sm:$0xff] }
 0x8d4   :  { %1024 = vadd.xlane.f32.xlu1 %v1023_v48  ;;  %v2319_v48 = vld [vmem:[%s3374_s12 + $0x38] sm:$0xff]  ;;  %1281 = vmatpush.msra.mxu2 %v2312_v47 }
 0x8d5   :  { %1314 = vmatpush.msra.mxu3 %v2319_v48 }
 0x8d6   :  { %1282 = vmatpush.msra.mxu2 %v2311_v50 }
 0x8d7   :  { %1315 = vmatpush.msra.mxu3 %v2318_v51 }
 0x8d8   :  { %1283 = vmatpush.msra.mxu2 %v2310_v54 }
 0x8d9   :  { %1316 = vmatpush.msra.mxu3 %v2317_v53 }
 0x8da   :  { %1284 = vmatpush.msra.mxu2 %v2309_v56 }
 0x8db   :  { %1317 = vmatpush.msra.mxu3 %v2316_v57 }
 0x938   :  { %v1093_v60 = vpop.f32.mrf.mxu3 }
 0x939   :  { %v1094_v61 = vadd.f32 %v2402_v59, %v1093_v60 }
 0x93b   :  { %v1099_v62 = vmul.f32 %v1094_v61, %v1094_v61 }
 0x93d   :  { %v1101_v63 = vmul.f32 %v1099_v62, %v1094_v61 }
 0x93f   :  { %v1103_v0 = vmul.f32 0.044715, %v1101_v63 }
 0x941   :  { %v1105_v1 = vadd.f32 %v1103_v0, %v1094_v61 }
 0x943   :  { %v1107_v2 = vmul.f32 0.7978846, %v1105_v1 }
 0x945   :  { %2457 = vtanh.f32 %v1107_v2 }
 0x947   :  { %v1025_v3 = vpop.xlane.xlu1 %1024 }
 0x948   :  { %v1027_v4 = vmul.f32 %v1025_v3, %v2778_v49 }
 0x94a   :  { %v1029_v5 = vadd.f32 1e-12, %v1027_v4  ;;  %v2404_v4 = vld [vmem:[%s3423_s9 + $0x1] ss:$0 sm:$0xff]  ;;  %s2248_s9 = sshll.u32 %s3430_s0, 4  ;;  %s2249_s9 = int_to_ptr.hbm [resolvable:$true] %s2248_s9 }
 0x94b   :  { %v2458_v6 = vpop.eup %2457 }
 0x94c   :  { %v1111_v7 = vadd.f32 1.0, %v2458_v6  ;;  %2459 = vrsqrt.f32 %v1029_v5  ;;  %vm1046_vm3 = vweird.f32 %v1029_v5 }
 0x94e   :  { %v1113_v8 = vmul.f32 0.5, %v1111_v7  ;;  %v2405_v7 = vld [vmem:[%s3424_s6 + $0x1] ss:$0 sm:$0xff]  ;;  %s3427_s6 = smov 120  }
 0x950   :  { %v1115_v10 = vmul.f32 %v1113_v8, %v1094_v61 }
 0x952   :  { %v2460_v11 = vpop.eup %2459  ;;  %2298 = vmatmul.msk.f32.vlgmr.msra.gmra.mxu0 %vm114_vm0, %v1115_v10 }
 0x953   :  { %v1041_v13 = vmul.f32 %v2460_v11, %v1029_v5  ;;  %vm1047_vm2 = vweird.f32 %v2460_v11 }
 0x954   :  { %vm1048_vm4 = vmor %vm1046_vm3, %vm1047_vm2  ;;  %vm2154_vm3 = vcmask 1041409  }
 0x955   :  { %v1042_v12 = vmul.f32 %v2460_v11, %v1041_v13 }
 0x957   :  { %v1043_v15 = vmul.f32 0.5, %v1042_v12 }
 0x959   :  { %v1044_v16 = vsub.f32 1.5, %v1043_v15 }
 0x95b   :  { %v1045_v17 = vmul.f32 %v2460_v11, %v1044_v16 }
 0x95d   :  { %v1049_v18 = vsel %vm1048_vm4, %v2460_v11, %v1045_v17  ;;  %v2406_v17 = vld [vmem:[%s3425_s4 + $0x1] ss:$0 sm:$0xff]  ;;  %vm2157_vm4 = vcmask 254976  }
 0x95e   :  { %v1051_v39 = vmul.f32 %v1049_v18, %v1017_v46  ;;  %v2305_v46 = vld [vmem:[%s3421_s2 + $0x38] sm:$0xff] }
 0x95f   :  { %1248 = vmatpush.msra.mxu1 %v2305_v46 }
 0x960   :  { %v1056_v19 = vmul.f32 %v2400_v35, %v1051_v39 }
 0x962   :  { %v1061_v20 = vadd.f32 %v2401_v38, %v1056_v19  ;;  %v2407_v19 = vld [vmem:[%s3373_s11 + $0x1] ss:$0 sm:$0xff]  ;;  %s3428_s11 = smov 112  }
 0x964   :  { %2297 = vmatmul.msk.f32.gmra.mxu3 %vm158_vm1, %v1061_v20  ;;  %v2408_v20 = vld [vmem:[%s3375_s13 + $0x1] ss:$0 sm:$0xff]  ;;  %s3429_s13 = smov 104  }
 0x9cf   :  { %v1148_v22 = vpop.f32.mrf.mxu0 }
 0x9d0   :  { %v1154_v24 = vadd.f32 %v1148_v22, %v2979_v9 }
 0x9d2   :  { %v3050_v45 = vadd.f32 %v2403_v21, %v1154_v24 }
 0x9d4   :  { %v1166_v14 = vsel %vm158_vm1, %v3050_v45, 0.0 }
 0x9d5   :  { %1167 = vadd.xlane.f32.xlu0 %v1166_v14 }
 0x9e7   :  { %v1096_v25 = vpop.f32.mrf.mxu3 }
 0x9e8   :  { %v1097_v41 = vadd.f32 %v2402_v59, %v1096_v25 }
 0x9ea   :  { %v1100_v26 = vmul.f32 %v1097_v41, %v1097_v41 }
 0x9ec   :  { %v1102_v27 = vmul.f32 %v1100_v26, %v1097_v41 }
 0x9ee   :  { %v1104_v28 = vmul.f32 0.044715, %v1102_v27 }
 0x9f0   :  { %v1106_v29 = vadd.f32 %v1104_v28, %v1097_v41 }
 0x9f2   :  { %v1108_v30 = vmul.f32 0.7978846, %v1106_v29 }
 0x9f4   :  { %2461 = vtanh.f32 %v1108_v30 }
 0x9fa   :  { %v2462_v31 = vpop.eup %2461 }
 0x9fb   :  { %v1112_v32 = vadd.f32 1.0, %v2462_v31 }
 0x9fd   :  { %v1114_v33 = vmul.f32 0.5, %v1112_v32 }
 0x9ff   :  { %v1116_v34 = vmul.f32 %v1114_v33, %v1097_v41 }
 0xa01   :  { %2299 = vmatmul.msk.f32.gmra.mxu0 %vm114_vm0, %v1116_v34 }
 0xa48   :  { %v1168_v9 = vpop.xlane.xlu0 %1167 }
 0xa49   :  { %v1172_v35 = vmul.f32 %v1168_v9, %v2778_v49 }
 0xa4b   :  { %v1174_v36 = vsub.f32 %v3050_v45, %v1172_v35 }
 0xa4d   :  { %v1176_v37 = vmul.f32 %v1174_v36, %v1174_v36 }
 0xa4f   :  { %v1178_v38 = vsel %vm158_vm1, %v1176_v37, 0.0 }
 0xa50   :  { %1179 = vadd.xlane.f32.xlu1 %v1178_v38 }
 0xa7e   :  { %v1151_v40 = vpop.f32.mrf.mxu0 }
 0xa7f   :  { %v1155_v42 = vadd.f32 %v1151_v40, %v2989_v23  ;;  %v2304_v23 = vld [vmem:[%s3421_s2 + $0x30] sm:$0xff] }
 0xa80   :  { %1249 = vmatpush.msra.mxu1 %v2304_v23 }
 0xa81   :  { %v3059_v43 = vadd.f32 %v2403_v21, %v1155_v42 }
 0xa82   :  { %1250 = vmatpush.msra.mxu1 %v2303_v52 }
 0xa83   :  { %v1169_v44 = vsel %vm158_vm1, %v3059_v43, 0.0 }
 0xa84   :  { %1170 = vadd.xlane.f32.xlu0 %v1169_v44  ;;  %1251 = vmatpush.msra.mxu1 %v2302_v55 }
 0xac3   :  { %v1180_v59 = vpop.xlane.xlu1 %1179 }
 0xac4   :  { %v1184_v60 = vmul.f32 %v1180_v59, %v2778_v49 }
 0xac6   :  { %v1186_v61 = vadd.f32 1e-12, %v1184_v60 }
 0xac8   :  { %2463 = vrsqrt.f32 %v1186_v61  ;;  %vm1194_vm6 = vweird.f32 %v1186_v61 }
 0xace   :  { %v2464_v62 = vpop.eup %2463 }
 0xacf   :  { %v1189_v63 = vmul.f32 %v2464_v62, %v1186_v61  ;;  %vm1195_vm5 = vweird.f32 %v2464_v62 }
 0xad0   :  { %vm1196_vm7 = vmor %vm1194_vm6, %vm1195_vm5 }
 0xad1   :  { %v1190_v0 = vmul.f32 %v2464_v62, %v1189_v63 }
 0xad3   :  { %v1191_v1 = vmul.f32 0.5, %v1190_v0 }
 0xad5   :  { %v1192_v2 = vsub.f32 1.5, %v1191_v1 }
 0xad7   :  { %v1193_v3 = vmul.f32 %v2464_v62, %v1192_v2 }
 0xad9   :  { %v1197_v5 = vsel %vm1196_vm7, %v2464_v62, %v1193_v3 }
 0xada   :  { %v1208_v6 = vmul.f32 %v1197_v5, %v1174_v36 }
 0xadc   :  { %v1213_v8 = vmul.f32 %v2404_v4, %v1208_v6 }
 0xade   :  { %v1218_v10 = vadd.f32 %v2405_v7, %v1213_v8 }
 0xae0   :  { %2307 = vmatmul.msk.f32.vlgmr.msra.gmra.mxu1 %vm158_vm1, %v1218_v10  ;;  %2314 = vmatmul.msk.f32.vlgmr.msra.gmra.mxu2 %vm158_vm1, %v1218_v10 }
 0xae1   :  { %2321 = vmatmul.msk.f32.vlgmr.msra.gmra.mxu3 %vm158_vm1, %v1218_v10 }
 0xaf7   :  { %v1171_v11 = vpop.xlane.xlu0 %1170 }
 0xaf8   :  { %v1173_v13 = vmul.f32 %v1171_v11, %v2778_v49 }
 0xafa   :  { %v1175_v12 = vsub.f32 %v3059_v43, %v1173_v13 }
 0xafc   :  { %v1177_v15 = vmul.f32 %v1175_v12, %v1175_v12 }
 0xafe   :  { %v1181_v16 = vsel %vm158_vm1, %v1177_v15, 0.0  ;;  %v2323_v15 = vld [vmem:[%s3376_s14 + $0x20] sm:$0xff] }
 0xaff   :  { %1182 = vadd.xlane.f32.xlu1 %v1181_v16 }
 0xb5d   :  { %v1253_v18 = vpop.f32.mrf.mxu1 }
 0xb5e   :  { %v3115_v39 = vadd.f32 %v2406_v17, %v1253_v18 }
 0xb60   :  { %1454 = vrot.lane.b32.xlu0 %v3115_v39, %s3427_s6 }
 0xb63   :  { %v1286_v21 = vpop.f32.mrf.mxu2 }
 0xb64   :  { %v3125_v22 = vadd.f32 %v2407_v19, %v1286_v21  ;;  %v1319_v24 = vpop.f32.mrf.mxu3 }
 0xb65   :  { %v3127_v14 = vadd.f32 %v2408_v20, %v1319_v24 }
 0xb66   :  { %1456 = vrot.lane.b32.xlu2 %v3125_v22, %s3427_s6  ;;  %2327 = vmatpush.xpose.msk.msrb.mxu0 %vm346_vm12, %v3125_v22 }
 0xb69   :  { %2328 = vmatmul.msk.f32.vlgmr.msrb.gmra.mxu0 %vm346_vm12, %v3115_v39 }
 0xb6a   :  { %1426 = vmatpush.msra.mxu0 %v3127_v14 }
 0xb72   :  { %v1183_v25 = vpop.xlane.xlu1 %1182 }
 0xb73   :  { %v1185_v41 = vmul.f32 %v1183_v25, %v2778_v49 }
 0xb75   :  { %v1187_v26 = vadd.f32 1e-12, %v1185_v41 }
 0xb77   :  { %2465 = vrsqrt.f32 %v1187_v26  ;;  %vm1204_vm9 = vweird.f32 %v1187_v26 }
 0xb7d   :  { %v2466_v27 = vpop.eup %2465 }
 0xb7e   :  { %v1199_v28 = vmul.f32 %v2466_v27, %v1187_v26  ;;  %vm1205_vm8 = vweird.f32 %v2466_v27 }
 0xb7f   :  { %vm1206_vm10 = vmor %vm1204_vm9, %vm1205_vm8 }
 0xb80   :  { %v1200_v29 = vmul.f32 %v2466_v27, %v1199_v28 }
 0xb82   :  { %v1201_v30 = vmul.f32 0.5, %v1200_v29  ;;  %v3194_v29 = vld [vmem:[%s3426_s10] ss:$0 sm:$0xff] }
 0xb84   :  { %v1202_v31 = vsub.f32 1.5, %v1201_v30 }
 0xb86   :  { %v1203_v32 = vmul.f32 %v2466_v27, %v1202_v31 }
 0xb88   :  { %v1207_v33 = vsel %vm1206_vm10, %v2466_v27, %v1203_v32 }
 0xb89   :  { %v1209_v34 = vmul.f32 %v1207_v33, %v1175_v12 }
 0xb8b   :  { %v1214_v9 = vmul.f32 %v2404_v4, %v1209_v34 }
 0xb8d   :  { %v1219_v35 = vadd.f32 %v2405_v7, %v1214_v9 }
 0xb8f   :  { %2308 = vmatmul.msk.f32.gmra.mxu1 %vm158_vm1, %v1219_v35  ;;  %2315 = vmatmul.msk.f32.gmra.mxu2 %vm158_vm1, %v1219_v35 }
 0xb90   :  { %2322 = vmatmul.msk.f32.gmra.mxu3 %vm158_vm1, %v1219_v35  ;;  %v2324_v35 = vld [vmem:[%s3376_s14 + $0x28] sm:$0xff] }
 0xbc0   :  { %v1457_v36 = vpop.permute.xlu2 %1456 }
 0xbc1   :  { %2333 = vmatpush.xpose.msk.msrb.mxu2 %vm346_vm12, %v1457_v36 }
 0xbc5   :  { %1611 = vmatpush.msra.mxu2 %v2324_v35 }
 0xbd2   :  { %v1455_v37 = vpop.permute.xlu0 %1454 }
 0xbd3   :  { %2334 = vmatmul.msk.f32.vlgmr.msrb.gmra.mxu2 %vm346_vm12, %v1455_v37 }
 0xbe6   :  { %v1353_v38 = vpop.f32.mrf.mxu0 }
 0xbe7   :  { %v1382_v40 = vmul.f32 0.35355338, %v1353_v38 }
 0xbe9   :  { %v1384_v42 = vadd.f32 %v2883_v58, %v1382_v40 }
 0xbeb   :  { %v1386_v44 = vsel %vm346_vm12, %v1384_v42, -inf }
 0xbec   :  { %1387 = vmax.xlane.f32.xlu1 %v1386_v44 }
 0xc0c   :  { %v1256_v47 = vpop.f32.mrf.mxu1 }
 0xc0d   :  { %v3152_v51 = vadd.f32 %v2406_v17, %v1256_v47 }
 0xc12   :  { %v1289_v46 = vpop.f32.mrf.mxu2 }
 0xc13   :  { %v3144_v48 = vadd.f32 %v2407_v19, %v1289_v46  ;;  %v1322_v23 = vpop.f32.mrf.mxu3 }
 0xc14   :  { %v3146_v50 = vadd.f32 %v2408_v20, %v1322_v23 }
 0xc15   :  { %1484 = vrot.lane.b32.xlu0 %v3144_v48, %s3427_s6  ;;  %2329 = vmatpush.xpose.msk.msrb.mxu1 %vm346_vm12, %v3144_v48 }
 0xc18   :  { %2330 = vmatmul.msk.f32.vlgmr.msrb.gmra.mxu1 %vm346_vm12, %v3152_v51 }
 0xc19   :  { %1449 = vmatpush.msra.mxu1 %v3146_v50 }
 0xc1d   :  { %1537 = vrot.lane.b32.xlu0 %v3127_v14, %s3427_s6 }
 0xc25   :  { %1650 = vrot.lane.b32.xlu0 %v3125_v22, %s3428_s11 }
 0xc2d   :  { %1648 = vrot.lane.b32.xlu0 %v3115_v39, %s3428_s11 }
 0xc56   :  { %v1479_v52 = vpop.f32.mrf.mxu2 }
 0xc57   :  { %v1510_v54 = vmul.f32 0.35355338, %v1479_v52 }
 0xc59   :  { %v1512_v53 = vadd.f32 %v2883_v58, %v1510_v54 }
 0xc5b   :  { %v1514_v55 = vsel %vm346_vm12, %v1512_v53, -inf }
 0xc5c   :  { %1515 = vmax.xlane.f32.xlu1 %v1514_v55 }
 0xc5f   :  { %v1388_v56 = vpop.xlane.xlu1 %1387 }
 0xc60   :  { %v1392_v57 = vsub.f32 %v1384_v42, %v1388_v56 }
 0xc62   :  { %v1394_v59 = vmul.f32 1.442695, %v1392_v57 }
 0xc64   :  { %2467 = vpow2.f32 %v1394_v59 }
 0xc6a   :  { %v2468_v60 = vpop.eup %2467 }
 0xc6b   :  { %v1398_v61 = vsel %vm346_vm12, %v2468_v60, 0.0 }
 0xc6c   :  { %1399 = vadd.xlane.f32.xlu1 %v1398_v61 }
 0xc85   :  { %1482 = vrot.lane.b32.xlu1 %v3152_v51, %s3427_s6 }
 0xc87   :  { %v1485_v62 = vpop.permute.xlu0 %1484 }
 0xc88   :  { %2335 = vmatpush.xpose.msk.msrb.mxu3 %vm346_vm12, %v1485_v62 }
 0xc8c   :  { %1640 = vmatpush.msra.mxu3 %v2323_v15 }
 0xc8f   :  { %v1538_v63 = vpop.permute.xlu0 %1537 }
 0xc90   :  { %1558 = vmatpush.msrb.mxu0 %v1538_v63 }
 0xc95   :  { %v1379_v0 = vpop.f32.mrf.mxu1 }
 0xc96   :  { %v1383_v1 = vmul.f32 0.35355338, %v1379_v0 }
 0xc97   :  { %v1651_v12 = vpop.permute.xlu0 %1650 }
 0xc98   :  { %v1385_v2 = vadd.f32 %v2883_v58, %v1383_v1 }
 0xc9a   :  { %v1389_v3 = vsel %vm346_vm12, %v1385_v2, -inf }
 0xc9f   :  { %v1649_v41 = vpop.permute.xlu0 %1648 }
 0xcaf   :  { %1390 = vmax.xlane.f32.xlu1 %v1389_v3 }
 0xcc8   :  { %1815 = vrot.lane.b32.xlu1 %v3125_v22, %s3429_s13 }
 0xccf   :  { %v1516_v4 = vpop.xlane.xlu1 %1515 }
 0xcd0   :  { %v1520_v5 = vsub.f32 %v1512_v53, %v1516_v4 }
 0xcd2   :  { %v1522_v6 = vmul.f32 1.442695, %v1520_v5 }
 0xcd4   :  { %2469 = vpow2.f32 %v1522_v6 }
 0xcda   :  { %v2470_v7 = vpop.eup %2469 }
 0xcdb   :  { %v1526_v8 = vsel %vm346_vm12, %v2470_v7, 0.0 }
 0xcdc   :  { %1527 = vadd.xlane.f32.xlu2 %v1526_v8 }
 0xcdf   :  { %v1400_v10 = vpop.xlane.xlu1 %1399 }
 0xce0   :  { %2471 = vrcp.f32 %v1400_v10 }
 0xce6   :  { %v2472_v11 = vpop.eup %2471 }
 0xce7   :  { %v1406_v13 = vmul.f32 %v2472_v11, %v2468_v60 }
 0xce9   :  { %2331 = vmatmul.msk.f32.vlgmr.msra.gmra.mxu0 %vm346_vm12, %v1406_v13 }
 0xcea   :  { %2343 = vmatpush.xpose.msk.msra.mxu0 %vm346_vm12, %v1651_v12 }
 0xcf7   :  { %v1483_v58 = vpop.permute.xlu1 %1482 }
 0xcf8   :  { %2336 = vmatmul.msk.f32.vlgmr.msrb.gmra.mxu3 %vm346_vm12, %v1483_v58 }
 0xd22   :  { %v1391_v16 = vpop.xlane.xlu1 %1390 }
 0xd23   :  { %v1393_v17 = vsub.f32 %v1385_v2, %v1391_v16 }
 0xd25   :  { %v1396_v18 = vmul.f32 1.442695, %v1393_v17  ;;  %v2325_v17 = vld [vmem:[%s3376_s14 + $0x30] sm:$0xff] }
 0xd26   :  { %1803 = vmatpush.msrb.mxu2 %v2325_v17 }
 0xd27   :  { %2473 = vpow2.f32 %v1396_v18 }
 0xd2d   :  { %v2474_v19 = vpop.eup %2473 }
 0xd2e   :  { %v1401_v20 = vsel %vm346_vm12, %v2474_v19, 0.0 }
 0xd2f   :  { %1402 = vadd.xlane.f32.xlu0 %v1401_v20 }
 0xd3a   :  { %v1816_v21 = vpop.permute.xlu1 %1815 }
 0xd3b   :  { %2351 = vmatpush.xpose.msk.msrb.mxu3 %vm346_vm12, %v1816_v21 }
 0xd43   :  { %1678 = vrot.lane.b32.xlu0 %v3144_v48, %s3428_s11 }
 0xd4b   :  { %1730 = vrot.lane.b32.xlu0 %v3127_v14, %s3428_s11 }
 0xd4f   :  { %v1528_v22 = vpop.xlane.xlu2 %1527 }
 0xd50   :  { %2475 = vrcp.f32 %v1528_v22 }
 0xd53   :  { %1843 = vrot.lane.b32.xlu0 %v3144_v48, %s3429_s13 }
 0xd56   :  { %v2476_v24 = vpop.eup %2475 }
 0xd57   :  { %v1534_v25 = vmul.f32 %v2476_v24, %v2470_v7 }
 0xd59   :  { %2337 = vmatmul.msk.f32.vlgmr.msrb.gmra.mxu0 %vm346_vm12, %v1534_v25 }
 0xd61   :  { %2344 = vmatmul.msk.f32.vlgmr.msra.gmra.mxu0 %vm346_vm12, %v1649_v41 }
 0xd66   :  { %v1428_v26 = vpop.f32.mrf.mxu0 }
 0xd67   :  { %2341 = vmatmul.msk.f32.vlgmr.msra.gmra.mxu3 %vm346_vm12, %v1428_v26 }
 0xd7b   :  { %v1507_v27 = vpop.f32.mrf.mxu3 }
 0xd7c   :  { %v1511_v28 = vmul.f32 0.35355338, %v1507_v27 }
 0xd7e   :  { %v1513_v30 = vadd.f32 %v3194_v29, %v1511_v28 }
 0xd80   :  { %v1517_v31 = vsel %vm346_vm12, %v1513_v30, -inf }
 0xd81   :  { %1518 = vmax.xlane.f32.xlu2 %v1517_v31 }
 0xda2   :  { %v1403_v32 = vpop.xlane.xlu0 %1402 }
 0xda3   :  { %2477 = vrcp.f32 %v1403_v32 }
 0xda9   :  { %v2478_v33 = vpop.eup %2477 }
 0xdaa   :  { %v1407_v34 = vmul.f32 %v2478_v33, %v2474_v19 }
 0xdac   :  { %2332 = vmatmul.msk.f32.vlgmr.msra.gmra.mxu1 %vm346_vm12, %v1407_v34 }
 0xdb5   :  { %v1679_v9 = vpop.permute.xlu0 %1678 }
 0xdbd   :  { %v1731_v36 = vpop.permute.xlu0 %1730 }
 0xdbe   :  { %1751 = vmatpush.msrb.mxu0 %v1731_v36 }
 0xdc5   :  { %v1844_v37 = vpop.permute.xlu0 %1843 }
 0xdc6   :  { %2353 = vmatpush.xpose.msk.msra.mxu0 %vm346_vm12, %v1844_v37 }
 0xdd6   :  { %v1560_v38 = vpop.f32.mrf.mxu0 }
 0xdd7   :  { %2339 = vmatmul.msk.f32.vlgmr.msra.gmra.mxu2 %vm346_vm12, %v1560_v38 }
 0xdde   :  { %v1673_v40 = vpop.f32.mrf.mxu0 }
 0xddf   :  { %v1704_v42 = vmul.f32 0.35355338, %v1673_v40 }
 0xde1   :  { %v1706_v44 = vadd.f32 %v3194_v29, %v1704_v42 }
 0xde3   :  { %v1708_v46 = vsel %vm346_vm12, %v1706_v44, -inf }
 0xde4   :  { %1709 = vmax.xlane.f32.xlu2 %v1708_v46 }
 0xdea   :  { %v3224_v6 = vpop.f32.mrf.mxu3 }
 0xdf4   :  { %v1519_v47 = vpop.xlane.xlu2 %1518 }
 0xdf5   :  { %v1521_v48 = vsub.f32 %v1513_v30, %v1519_v47 }
 0xdf7   :  { %v1524_v23 = vmul.f32 1.442695, %v1521_v48 }
 0xdf9   :  { %2479 = vpow2.f32 %v1524_v23 }
 0xdff   :  { %v2480_v52 = vpop.eup %2479 }
 0xe00   :  { %v1529_v54 = vsel %vm346_vm12, %v2480_v52, 0.0 }
 0xe01   :  { %1530 = vadd.xlane.f32.xlu2 %v1529_v54 }
 0xe19   :  { %1564 = vrot.lane.b32.xlu2 %v3146_v50, %s3427_s6 }
 0xe21   :  { %1676 = vrot.lane.b32.xlu2 %v3152_v51, %s3428_s11 }
 0xe29   :  { %1813 = vrot.lane.b32.xlu2 %v3115_v39, %s3429_s13  ;;  %v1451_v53 = vpop.f32.mrf.mxu1 }
 0xe2a   :  { %2342 = vmatmul.msk.f32.gmra.mxu3 %vm346_vm12, %v1451_v53 }
 0xe57   :  { %v1710_v55 = vpop.xlane.xlu2 %1709 }
 0xe58   :  { %v1714_v56 = vsub.f32 %v1706_v44, %v1710_v55  ;;  %v2326_v55 = vld [vmem:[%s3376_s14 + $0x38] sm:$0xff] }
 0xe5a   :  { %v1716_v57 = vmul.f32 1.442695, %v1714_v56 }
 0xe5c   :  { %2481 = vpow2.f32 %v1716_v57 }
 0xe62   :  { %v2482_v59 = vpop.eup %2481 }
 0xe63   :  { %v1720_v60 = vsel %vm346_vm12, %v2482_v59, 0.0 }
 0xe64   :  { %1721 = vadd.xlane.f32.xlu1 %v1720_v60  ;;  %v1613_v60 = vpop.f32.mrf.mxu2 }
 0xe74   :  { %v1531_v61 = vpop.xlane.xlu2 %1530 }
 0xe75   :  { %2483 = vrcp.f32 %v1531_v61 }
 0xe7b   :  { %v2484_v62 = vpop.eup %2483 }
 0xe7c   :  { %v1535_v63 = vmul.f32 %v2484_v62, %v2480_v52  ;;  %v1565_v0 = vpop.permute.xlu2 %1564 }
 0xe7d   :  { %1841 = vrot.lane.b32.xlu1 %v3152_v51, %s3429_s13  ;;  %1585 = vmatpush.msrb.mxu1 %v1565_v0 }
 0xe7e   :  { %2338 = vmatmul.msk.f32.vlgmr.msrb.gmra.mxu1 %vm346_vm12, %v1535_v63  ;;  %v1643_v63 = vadd.f32 %v3224_v6, %v1613_v60  ;;  %v2374_v60 = vld [vmem:[%s3382_s20 + $0x68] sm:$0xff] }
 0xe7f   :  { %2345 = vmatpush.xpose.msk.msra.mxu1 %vm346_vm12, %v1679_v9 }
 0xe84   :  { %v1677_v39 = vpop.permute.xlu2 %1676 }
 0xe86   :  { %2346 = vmatmul.msk.f32.vlgmr.msra.gmra.mxu1 %vm346_vm12, %v1677_v39 }
 0xe8c   :  { %v1814_v1 = vpop.permute.xlu2 %1813 }
 0xe8d   :  { %2352 = vmatmul.msk.f32.vlgmr.msrb.gmra.mxu3 %vm346_vm12, %v1814_v1 }
 0xead   :  { %v3227_v11 = vpop.f32.mrf.mxu3 }
 0xed7   :  { %v1722_v2 = vpop.xlane.xlu1 %1721 }
 0xed8   :  { %2485 = vrcp.f32 %v1722_v2  ;;  %v2409_v2 = vld [vmem:[%s3377_s15 + $0x1] ss:$0 sm:$0xff] }
 0xede   :  { %v2486_v3 = vpop.eup %2485 }
 0xedf   :  { %v1728_v4 = vmul.f32 %v2486_v3, %v2482_v59 }
 0xee1   :  { %2347 = vmatmul.msk.f32.vlgmr.msrb.gmra.mxu0 %vm346_vm12, %v1728_v4 }
 0xee2   :  { %1968 = vmatpush.msrb.mxu0 %v2326_v55 }
 0xeef   :  { %v1842_v5 = vpop.permute.xlu1 %1841 }
 0xef0   :  { %2354 = vmatmul.msk.f32.vlgmr.msra.gmra.mxu0 %vm346_vm12, %v1842_v5 }
 0xefb   :  { %v1587_v51 = vpop.f32.mrf.mxu1 }
 0xefc   :  { %2340 = vmatmul.msk.f32.gmra.mxu2 %vm346_vm12, %v1587_v51 }
 0xf03   :  { %v1701_v7 = vpop.f32.mrf.mxu1 }
 0xf04   :  { %v1705_v8 = vmul.f32 0.35355338, %v1701_v7 }
 0xf06   :  { %v1707_v10 = vadd.f32 %v3194_v29, %v1705_v8 }
 0xf08   :  { %v1711_v13 = vsel %vm346_vm12, %v1707_v10, -inf }
 0xf09   :  { %1712 = vmax.xlane.f32.xlu2 %v1711_v13 }
 0xf10   :  { %v1838_v12 = vpop.f32.mrf.mxu3 }
 0xf11   :  { %v1869_v58 = vmul.f32 0.35355338, %v1838_v12 }
 0xf13   :  { %v1871_v15 = vadd.f32 %v3194_v29, %v1869_v58 }
 0xf15   :  { %v1873_v16 = vsel %vm346_vm12, %v1871_v15, -inf }
 0xf16   :  { %1874 = vmax.xlane.f32.xlu0 %v1873_v16 }
 0xf5e   :  { %v1753_v18 = vpop.f32.mrf.mxu0 }
 0xf5f   :  { %2349 = vmatmul.msk.f32.vlgmr.msrb.gmra.mxu2 %vm346_vm12, %v1753_v18 }
 0xf6d   :  { %v1866_v19 = vpop.f32.mrf.mxu0 }
 0xf6e   :  { %v1870_v20 = vmul.f32 0.35355338, %v1866_v19 }
 0xf70   :  { %v1872_v21 = vadd.f32 %v3194_v29, %v1870_v20  ;;  %v2387_v29 = vpack.i.bf16 %v3146_v50, %v3127_v14 }
 0xf72   :  { %v1876_v22 = vsel %vm346_vm12, %v1872_v21, -inf }
 0xf73   :  { %1877 = vmax.xlane.f32.xlu1 %v1876_v22  ;;  %v2365_v22 = vld [vmem:[%s3380_s18 + $0x38] sm:$0xff] }
 0xf7c   :  { %v1713_v24 = vpop.xlane.xlu2 %1712 }
 0xf7d   :  { %v1715_v25 = vsub.f32 %v1707_v10, %v1713_v24  ;;  %v2364_v24 = vld [vmem:[%s3380_s18 + $0x30] sm:$0xff] }
 0xf7f   :  { %v1718_v41 = vmul.f32 1.442695, %v1715_v25  ;;  %v1616_v61 = vpop.f32.mrf.mxu2  ;;  %v2363_v25 = vld [vmem:[%s3380_s18 + $0x28] sm:$0xff] }
 0xf80   :  { %v1646_v7 = vadd.f32 %v3227_v11, %v1616_v61  ;;  %v2373_v61 = vld [vmem:[%s3382_s20 + $0x60] sm:$0xff] }
 0xf81   :  { %2487 = vpow2.f32 %v1718_v41  ;;  %v2362_v41 = vld [vmem:[%s3380_s18 + $0x20] sm:$0xff] }
 0xf87   :  { %v2488_v26 = vpop.eup %2487 }
 0xf88   :  { %v1723_v27 = vsel %vm346_vm12, %v2488_v26, 0.0 }
 0xf89   :  { %1724 = vadd.xlane.f32.xlu2 %v1723_v27  ;;  %v1875_v28 = vpop.xlane.xlu0 %1874 }
 0xf8a   :  { %v1879_v30 = vsub.f32 %v1871_v15, %v1875_v28 }
 0xf8c   :  { %v1881_v31 = vmul.f32 1.442695, %v1879_v30 }
 0xf8e   :  { %2489 = vpow2.f32 %v1881_v31 }
 0xf94   :  { %v2490_v32 = vpop.eup %2489 }
 0xf95   :  { %v1885_v33 = vsel %vm346_vm12, %v2490_v32, 0.0 }
 0xf96   :  { %1886 = vadd.xlane.f32.xlu0 %v1885_v33 }
 0xfa1   :  { %1756 = vrot.lane.b32.xlu2 %v3146_v50, %s3428_s11 }
 0xfaa   :  { %2388 = vrot.lane.b32.xlu0 %v2387_v29, %s3429_s13 }
 0xfe2   :  { %v1805_v62 = vpop.f32.mrf.mxu2 }
 0xfe3   :  { %v1811_v0 = vadd.f32 %v1805_v62, %v1643_v63  ;;  %v2372_v62 = vld [vmem:[%s3382_s20 + $0x58] sm:$0xff]  ;;  %v2371_v63 = vld [vmem:[%s3382_s20 + $0x50] sm:$0xff] }
 0xfe6   :  { %v1878_v34 = vpop.xlane.xlu1 %1877 }
 0xfe7   :  { %v1880_v9 = vsub.f32 %v1872_v21, %v1878_v34 }
 0xfe9   :  { %v1883_v35 = vmul.f32 1.442695, %v1880_v9  ;;  %v2410_v9 = vld [vmem:[%s3378_s16 + $0x1] ss:$0 sm:$0xff] }
 0xfeb   :  { %2491 = vpow2.f32 %v1883_v35 }
 0xff1   :  { %v2492_v36 = vpop.eup %2491 }
 0xff2   :  { %v1888_v37 = vsel %vm346_vm12, %v2492_v36, 0.0 }
 0xff3   :  { %1889 = vadd.xlane.f32.xlu1 %v1888_v37  ;;  %v2411_v37 = vld [vmem:[%s3379_s17 + $0x1] ss:$0 sm:$0xff] }
 0xffc   :  { %v1725_v38 = vpop.xlane.xlu2 %1724 }
 0xffd   :  { %2493 = vrcp.f32 %v1725_v38 }
0x1003   :  { %v2494_v40 = vpop.eup %2493 }
0x1004   :  { %v1729_v42 = vmul.f32 %v2494_v40, %v2488_v26  ;;  %v1757_v44 = vpop.permute.xlu2 %1756 }
0x1005   :  { %1777 = vmatpush.msrb.mxu1 %v1757_v44 }
0x1006   :  { %2348 = vmatmul.msk.f32.vlgmr.msrb.gmra.mxu1 %vm346_vm12, %v1729_v42 }
0x1009   :  { %v1887_v46 = vpop.xlane.xlu0 %1886 }
0x100a   :  { %2495 = vrcp.f32 %v1887_v46 }
0x1010   :  { %v2496_v14 = vpop.eup %2495 }
0x1011   :  { %v1893_v23 = vmul.f32 %v2496_v14, %v2490_v32 }
0x101c   :  { %v2389_v50 = vpop.permute.xlu0 %2388 }
0x101d   :  { %v2391_v47 = vunpack.i.h.bf16 %v2389_v50  ;;  %v2390_v48 = vunpack.i.l.bf16 %v2389_v50 }
0x101f   :  { %1916 = vmatpush.msra.mxu1 %v2390_v48  ;;  %1942 = vmatpush.msra.mxu3 %v2391_v47 }
0x1020   :  { %2355 = vmatmul.msk.f32.vlgmr.msra.gmra.mxu1 %vm346_vm12, %v1893_v23 }
0x1021   :  { %2073 = vmatpush.msrb.mxu1 %v2365_v22 }
0x1023   :  { %2074 = vmatpush.msrb.mxu1 %v2364_v24 }
0x1025   :  { %2075 = vmatpush.msrb.mxu1 %v2363_v25 }
0x1027   :  { %2076 = vmatpush.msrb.mxu1 %v2362_v41 }
0x1066   :  { %v1890_v52 = vpop.xlane.xlu1 %1889 }
0x1067   :  { %2497 = vrcp.f32 %v1890_v52 }
0x106d   :  { %v2498_v54 = vpop.eup %2497 }
0x106e   :  { %v1894_v53 = vmul.f32 %v2498_v54, %v2492_v36 }
0x1070   :  { %2356 = vmatmul.msk.f32.vlgmr.msra.gmra.mxu3 %vm346_vm12, %v1894_v53 }
0x1083   :  { %v1779_v56 = vpop.f32.mrf.mxu1 }
0x1084   :  { %2350 = vmatmul.msk.f32.gmra.mxu2 %vm346_vm12, %v1779_v56 }
0x109d   :  { %v1918_v57 = vpop.f32.mrf.mxu1 }
0x109e   :  { %2357 = vmatmul.msk.f32.vlgmr.msrb.gmra.mxu0 %vm346_vm12, %v1918_v57  ;;  %v2376_v57 = vld [vmem:[%s3382_s20 + $0x78] sm:$0xff] }
0x109f   :  { %2125 = vmatpush.msra.mxu2 %v2376_v57 }
0x10f3   :  { %v1944_v59 = vpop.f32.mrf.mxu3 }
0x10f4   :  { %2358 = vmatmul.msk.f32.gmra.mxu0 %vm346_vm12, %v1944_v59  ;;  %v2375_v59 = vld [vmem:[%s3382_s20 + $0x70] sm:$0xff] }
0x10f5   :  { %2126 = vmatpush.msra.mxu2 %v2375_v59 }
0x10f7   :  { %2127 = vmatpush.msra.mxu2 %v2374_v60  ;;  %v2414_v60 = vld [vmem:[%s3384_s22] ss:$0 sm:$0xff]  ;;  %s2541_s22 = smov [#allocation3]  }
0x10f8   :  { %s2246_s10 = sshll.u32 %s2541_s22, 4  ;;  %s2247_s10 = int_to_ptr.vmem [resolvable:$true] %s2246_s10 }
0x10f9   :  { %2128 = vmatpush.msra.mxu2 %v2373_v61 }
0x10fb   :  { %2129 = vmatpush.msra.mxu2 %v2372_v62 }
0x10fd   :  { %2130 = vmatpush.msra.mxu2 %v2371_v63 }
0x1107   :  { %v1808_v51 = vpop.f32.mrf.mxu2 }
0x1108   :  { %v1812_v8 = vadd.f32 %v1808_v51, %v1646_v7 }
0x111b   :  { %v1970_v39 = vpop.f32.mrf.mxu0 }
0x111c   :  { %v1976_v1 = vadd.f32 %v1970_v39, %v1811_v0  ;;  %v2370_v0 = vld [vmem:[%s3382_s20 + $0x48] sm:$0xff]  ;;  %v2369_v39 = vld [vmem:[%s3382_s20 + $0x40] sm:$0xff] }
0x111d   :  { %2131 = vmatpush.msra.mxu2 %v2370_v0 }
0x111e   :  { %v1978_v3 = vadd.f32 %v1976_v1, %v3050_v45  ;;  %v2412_v1 = vld [vmem:[%s3381_s19 + $0x1] ss:$0 sm:$0xff] }
0x111f   :  { %2132 = vmatpush.msra.mxu2 %v2369_v39  ;;  %v2415_v39 = vld [vmem:[%s3385_s23] ss:$0 sm:$0xff] }
0x1120   :  { %v3260_v4 = vadd.f32 %v2409_v2, %v1978_v3 }
0x1122   :  { %v1991_v5 = vsel %vm158_vm1, %v3260_v4, 0.0 }
0x1123   :  { %1992 = vadd.xlane.f32.xlu1 %v1991_v5 }
0x1171   :  { %v1973_v6 = vpop.f32.mrf.mxu0 }
0x1172   :  { %v1977_v10 = vadd.f32 %v1973_v6, %v1812_v8 }
0x1174   :  { %v1979_v13 = vadd.f32 %v1977_v10, %v3059_v43 }
0x1176   :  { %v3266_v12 = vadd.f32 %v2409_v2, %v1979_v13 }
0x1178   :  { %v1994_v58 = vsel %vm158_vm1, %v3266_v12, 0.0 }
0x1179   :  { %1995 = vadd.xlane.f32.xlu1 %v1994_v58 }
0x1196   :  { %v1993_v45 = vpop.xlane.xlu1 %1992 }
0x1197   :  { %v1997_v15 = vmul.f32 %v1993_v45, %v2778_v49 }
0x1199   :  { %v1999_v16 = vsub.f32 %v3260_v4, %v1997_v15 }
0x119b   :  { %v2001_v17 = vmul.f32 %v1999_v16, %v1999_v16 }
0x119d   :  { %v2003_v18 = vsel %vm158_vm1, %v2001_v17, 0.0 }
0x119e   :  { %2004 = vadd.xlane.f32.xlu2 %v2003_v18 }
0x11ec   :  { %v1996_v11 = vpop.xlane.xlu1 %1995 }
0x11ed   :  { %v1998_v19 = vmul.f32 %v1996_v11, %v2778_v49 }
0x11ef   :  { %v2000_v43 = vsub.f32 %v3266_v12, %v1998_v19 }
0x11f1   :  { %v2002_v20 = vmul.f32 %v2000_v43, %v2000_v43 }
0x11f3   :  { %v2006_v21 = vsel %vm158_vm1, %v2002_v20, 0.0 }
0x11f4   :  { %2007 = vadd.xlane.f32.xlu1 %v2006_v21 }
0x1211   :  { %v2005_v26 = vpop.xlane.xlu2 %2004 }
0x1212   :  { %v2009_v27 = vmul.f32 %v2005_v26, %v2778_v49 }
0x1214   :  { %v2011_v28 = vadd.f32 1e-12, %v2009_v27  ;;  %v2413_v27 = vld [vmem:[%s3383_s21 + $0x1] ss:$0 sm:$0xff] }
0x1216   :  { %2499 = vrsqrt.f32 %v2011_v28  ;;  %vm2019_vm12 = vweird.f32 %v2011_v28 }
0x121c   :  { %v2500_v30 = vpop.eup %2499 }
0x121d   :  { %v2014_v31 = vmul.f32 %v2500_v30, %v2011_v28  ;;  %vm2020_vm11 = vweird.f32 %v2500_v30 }
0x121e   :  { %vm2021_vm13 = vmor %vm2019_vm12, %vm2020_vm11 }
0x121f   :  { %v2015_v32 = vmul.f32 %v2500_v30, %v2014_v31 }
0x1221   :  { %v2016_v33 = vmul.f32 0.5, %v2015_v32 }
0x1223   :  { %v2017_v29 = vsub.f32 1.5, %v2016_v33 }
0x1225   :  { %v2018_v34 = vmul.f32 %v2500_v30, %v2017_v29 }
0x1227   :  { %v2022_v35 = vsel %vm2021_vm13, %v2500_v30, %v2018_v34 }
0x1228   :  { %v2033_v36 = vmul.f32 %v2022_v35, %v1999_v16 }
0x122a   :  { %v2038_v38 = vmul.f32 %v2410_v9, %v2033_v36 }
0x122c   :  { %v2043_v40 = vadd.f32 %v2411_v37, %v2038_v38 }
0x122e   :  { %2367 = vmatmul.msk.f32.vlgmr.msrb.gmra.mxu1 %vm158_vm1, %v2043_v40 }
0x1267   :  { %v2008_v42 = vpop.xlane.xlu1 %2007 }
0x1268   :  { %v2010_v44 = vmul.f32 %v2008_v42, %v2778_v49 }
0x126a   :  { %v2012_v46 = vadd.f32 1e-12, %v2010_v44  ;;  %v2209_v44 = vld [vmem:[%s3386_s24 + $0x18] sm:$0xff] }
0x126b   :  { %2232 = vmatpush.msrb.mxu3 %v2209_v44 }
0x126c   :  { %2501 = vrsqrt.f32 %v2012_v46  ;;  %vm2029_vm15 = vweird.f32 %v2012_v46 }
0x1272   :  { %v2502_v14 = vpop.eup %2501 }
0x1273   :  { %v2024_v50 = vmul.f32 %v2502_v14, %v2012_v46  ;;  %vm2030_vm14 = vweird.f32 %v2502_v14  ;;  %v2208_v46 = vld [vmem:[%s3386_s24 + $0x10] sm:$0xff] }
0x1274   :  { %vm2031_vm2 = vmor %vm2029_vm15, %vm2030_vm14  ;;  %2233 = vmatpush.msrb.mxu3 %v2208_v46 }
0x1275   :  { %v2025_v47 = vmul.f32 %v2502_v14, %v2024_v50  ;;  %v2206_v50 = vld [vmem:[%s3386_s24] sm:$0xff] }
0x1277   :  { %v2026_v48 = vmul.f32 0.5, %v2025_v47 }
0x1279   :  { %v2027_v23 = vsub.f32 1.5, %v2026_v48 }
0x127b   :  { %v2028_v52 = vmul.f32 %v2502_v14, %v2027_v23 }
0x127d   :  { %v2032_v54 = vsel %vm2031_vm2, %v2502_v14, %v2028_v52  ;;  %v2207_v14 = vld [vmem:[%s3386_s24 + $0x8] sm:$0xff] }
0x127e   :  { %v2034_v53 = vmul.f32 %v2032_v54, %v2000_v43  ;;  %2234 = vmatpush.msrb.mxu3 %v2207_v14 }
0x1280   :  { %v2039_v55 = vmul.f32 %v2410_v9, %v2034_v53  ;;  %2235 = vmatpush.msrb.mxu3 %v2206_v50 }
0x1282   :  { %v2044_v56 = vadd.f32 %v2411_v37, %v2039_v55 }
0x1284   :  { %2368 = vmatmul.msk.f32.gmra.mxu1 %vm158_vm1, %v2044_v56 }
0x12ab   :  { %v2078_v2 = vpop.f32.mrf.mxu1 }
0x12ac   :  { %v2079_v3 = vadd.f32 %v2412_v1, %v2078_v2 }
0x12ae   :  { %v2084_v5 = vmul.f32 %v2079_v3, %v2079_v3 }
0x12b0   :  { %v2086_v51 = vmul.f32 %v2084_v5, %v2079_v3 }
0x12b2   :  { %v2088_v7 = vmul.f32 0.044715, %v2086_v51  ;;  %v2416_v51 = vld [vmem:[%s3387_s25] ss:$0 sm:$0xff] }
0x12b4   :  { %v2090_v8 = vadd.f32 %v2088_v7, %v2079_v3 }
0x12b6   :  { %v2092_v6 = vmul.f32 0.7978846, %v2090_v8 }
0x12b8   :  { %2503 = vtanh.f32 %v2092_v6 }
0x12be   :  { %v2504_v10 = vpop.eup %2503 }
0x12bf   :  { %v2096_v13 = vadd.f32 1.0, %v2504_v10 }
0x12c1   :  { %v2098_v58 = vmul.f32 0.5, %v2096_v13 }
0x12c3   :  { %v2100_v45 = vmul.f32 %v2098_v58, %v2079_v3 }
0x12c5   :  { %2377 = vmatmul.msk.f32.vlgmr.msra.gmra.mxu2 %vm114_vm0, %v2100_v45 }
0x1301   :  { %v2081_v15 = vpop.f32.mrf.mxu1 }
0x1302   :  { %v2082_v16 = vadd.f32 %v2412_v1, %v2081_v15 }
0x1304   :  { %v2085_v17 = vmul.f32 %v2082_v16, %v2082_v16 }
0x1306   :  { %v2087_v18 = vmul.f32 %v2085_v17, %v2082_v16 }
0x1308   :  { %v2089_v11 = vmul.f32 0.044715, %v2087_v18 }
0x130a   :  { %v2091_v19 = vadd.f32 %v2089_v11, %v2082_v16 }
0x130c   :  { %v2093_v43 = vmul.f32 0.7978846, %v2091_v19 }
0x130e   :  { %2505 = vtanh.f32 %v2093_v43 }
0x1314   :  { %v2506_v20 = vpop.eup %2505 }
0x1315   :  { %v2097_v21 = vadd.f32 1.0, %v2506_v20 }
0x1317   :  { %v2099_v22 = vmul.f32 0.5, %v2097_v21 }
0x1319   :  { %v2101_v24 = vmul.f32 %v2099_v22, %v2082_v16 }
0x131b   :  { %2378 = vmatmul.msk.f32.gmra.mxu2 %vm114_vm0, %v2101_v24 }
0x1348   :  { %v2134_v25 = vpop.f32.mrf.mxu2 }
0x1349   :  { %v2140_v26 = vadd.f32 %v2134_v25, %v3260_v4 }
0x134b   :  { %v2147_v31 = vadd.f32 %v2413_v27, %v2140_v26 }
0x139e   :  { %v2137_v41 = vpop.f32.mrf.mxu2 }
0x139f   :  { %v2141_v28 = vadd.f32 %v2137_v41, %v3266_v12 }
0x13a1   :  { %v2148_v30 = vadd.f32 %v2413_v27, %v2141_v28 }
0x13a3   :  { %v2153_v32 = vrot.slane %v2148_v30, 7 }
0x13a5   :  { %v2155_v33 = vsel %vm2154_vm3, %v2153_v32, %v2147_v31 }
0x13a6   :  { %v2158_v29 = vsel %vm2157_vm4, %v2155_v33, 0.0 }
0x13a7   :  { %2159 = vadd.xlane.f32.xlu0 %v2158_v29 }
0x141a   :  { %v2160_v34 = vpop.xlane.xlu0 %2159 }
0x141b   :  { %v2161_v9 = vmul.f32 %v2160_v34, %v2778_v49 }
0x141d   :  { %v2163_v35 = vrot.slane %v2161_v9, 1  ;;  %v2166_v4 = vsub.f32 %v2147_v31, %v2161_v9 }
0x141f   :  { %v2167_v36 = vsub.f32 %v2148_v30, %v2163_v35  ;;  %v2168_v38 = vmul.f32 %v2166_v4, %v2166_v4 }
0x1421   :  { %v2169_v37 = vmul.f32 %v2167_v36, %v2167_v36 }
0x1423   :  { %v2172_v40 = vrot.slane %v2169_v37, 7 }
0x1425   :  { %v2173_v12 = vsel %vm2154_vm3, %v2172_v40, %v2168_v38 }
0x1426   :  { %v2175_v42 = vsel %vm2157_vm4, %v2173_v12, 0.0 }
0x1427   :  { %2176 = vadd.xlane.f32.xlu1 %v2175_v42 }
0x149a   :  { %v2177_v47 = vpop.xlane.xlu1 %2176 }
0x149b   :  { %v2178_v48 = vmul.f32 %v2177_v47, %v2778_v49 }
0x149d   :  { %v2179_v23 = vadd.f32 1e-12, %v2178_v48 }
0x149f   :  { %2507 = vrsqrt.f32 %v2179_v23  ;;  %vm2186_vm5 = vweird.f32 %v2179_v23 }
0x14a5   :  { %v2508_v52 = vpop.eup %2507 }
0x14a6   :  { %v2181_v54 = vmul.f32 %v2508_v52, %v2179_v23  ;;  %vm2187_vm0 = vweird.f32 %v2508_v52 }
0x14a7   :  { %vm2188_vm6 = vmor %vm2186_vm5, %vm2187_vm0 }
0x14a8   :  { %v2182_v53 = vmul.f32 %v2508_v52, %v2181_v54 }
0x14aa   :  { %v2183_v55 = vmul.f32 0.5, %v2182_v53 }
0x14ac   :  { %v2184_v56 = vsub.f32 1.5, %v2183_v55 }
0x14ae   :  { %v2185_v57 = vmul.f32 %v2508_v52, %v2184_v56 }
0x14b0   :  { %v2189_v59 = vsel %vm2188_vm6, %v2508_v52, %v2185_v57 }
0x14b1   :  { %v2191_v61 = vrot.slane %v2189_v59, 1  ;;  %v2194_v62 = vmul.f32 %v2189_v59, %v2166_v4 }
0x14b3   :  { %v2195_v63 = vmul.f32 %v2191_v61, %v2167_v36  ;;  %v2199_v49 = vmul.f32 %v2414_v60, %v2194_v62 }
0x14b5   :  { %v2200_v0 = vmul.f32 %v2414_v60, %v2195_v63  ;;  %v2204_v2 = vadd.f32 %v2415_v39, %v2199_v49 }
0x14b7   :  { %v2205_v1 = vadd.f32 %v2415_v39, %v2200_v0 }
0x14b9   :  { %v2216_v3 = vrot.slane %v2205_v1, 7 }
0x14bb   :  { %v2217_v5 = vsel %vm2154_vm3, %v2216_v3, %v2204_v2 }
0x14bc   :  { %2380 = vmatmul.msk.f32.vlgmr.msrb.gmra.mxu3 %vm158_vm1, %v2217_v5 }
0x153f   :  { %v2237_v7 = vpop.f32.mrf.mxu3 }
0x1540   :  { %v2238_v8 = vadd.f32 %v2416_v51, %v2237_v7 }
0x1542   :  { %2240 = vst [vmem:[#allocation3] sm:$0x3] %v2238_v8 }
0x1543   :  { %2251 = dma.vmem_to_hbm [thread:$0]  %s2247_s10, 32, %s2249_s9, [#allocation4]  }
0x1544   :  { %2534 = dma.done.wait [#allocation4], 32  }
0x1545   :  { %2535 = vsyncadd [#allocation4], 4294967264 }
0x1546   :  { %2256 = vsyncpa [#allocation4], 1 }

</bundles_post_ra>
